<compile_context>
chip_gen: v7x
topology: tpu7x:2x2x1
jax: 0.10.0
libtpu: 0.0.40
codegen_flags: <defaults>
</compile_context>

<pallas_src>
import math

import jax
import jax.numpy as jnp
from jax import lax
from jax.experimental import pallas as pl
from jax.experimental.pallas import tpu as pltpu

# ----------------------------- configuration (args) -----------------------------
D_MODEL = 32
N_HEADS = 4          # args.n_heads
N_LAYERS = 2         # args.n_layers (decoder layers)
FEEDFORWARD = 64     # args.feedforward
MAX_LEN = 16         # args.max_len
PAD_IDX = 0          # data_loader.pad_token_idx

BASE_VOCAB = 50
SPECIAL_TOKENS = 3
VOCAB_SIZE = BASE_VOCAB + SPECIAL_TOKENS     # bert vocab + special tokens

# Faithful to the (swapped) BertConfig call in the PyTorch module:
BERT_NUM_LAYERS = N_HEADS     # num_hidden_layers = args.n_heads
BERT_NUM_HEADS = N_LAYERS     # num_attention_heads = args.n_layers
# TODO(synk): HF BertConfig default intermediate_size is 3072; scaled down for this synthetic demo.
BERT_INTERMEDIATE = 4 * D_MODEL

LANE = 128            # lane-dense padded width for kernel outputs


# ============================= in-kernel math helpers =============================

def _ln(x, g, b, eps):
    """LayerNorm over the last dim; g/b broadcast over rows (stats in f32)."""
    mu = jnp.mean(x, axis=-1, keepdims=True)
    var = jnp.mean(jnp.square(x - mu), axis=-1, keepdims=True)
    return (x - mu) * lax.rsqrt(var + eps) * g + b


def _mha(q_all, k_all, v_all, mask, n_heads):
    """All-heads scaled-dot-product attention for one batch slice.

    q_all: (Lq, D), k_all/v_all: (Lk, D), mask: (Lq, Lk) float (1.0 == masked).
    Heads live in the lane axis (static slices); q·kᵀ uses dot_general with
    contracting dims so no transpose is materialized.
    """
    d_model = q_all.shape[-1]
    dk = d_model // n_heads
    scale = 1.0 / math.sqrt(dk)
    ctx = []
    for h in range(n_heads):
        qh = q_all[:, h * dk:(h + 1) * dk]
        kh = k_all[:, h * dk:(h + 1) * dk]
        vh = v_all[:, h * dk:(h + 1) * dk]
        s = lax.dot_general(qh, kh, (((1,), (1,)), ((), ())),
                            preferred_element_type=jnp.float32) * scale
        s = jnp.where(mask > 0.5, jnp.float32(-1e9), s)     # masked_fill_(mask, -1e9)
        s = s - jnp.max(s, axis=-1, keepdims=True)
        p = jnp.exp(s)
        p = p * pl.reciprocal(jnp.sum(p, axis=-1, keepdims=True), approx=True)
        ctx.append(jnp.dot(p, vh, preferred_element_type=jnp.float32))
    return jnp.concatenate(ctx, axis=-1)                    # (Lq, D)


# ================================ fused BERT stack ================================

def _bert_stack_kernel(x0_ref, mask_ref, emb_g_ref, emb_b_ref,
                       wqkv_ref, bqkv_ref, wo_ref, bo_ref, ln1g_ref, ln1b_ref,
                       w1_ref, b1_ref, w2_ref, b2_ref, ln2g_ref, ln2b_ref,
                       out_ref, x_scr):
    """grid = (batch ['parallel'], bert_layer ['arbitrary']). Activation in VMEM scratch."""
    l = pl.program_id(1)
    D = D_MODEL

    @pl.when(l == 0)
    def _():   # embedding LayerNorm (eps=1e-12), done once per batch slice
        x_scr[...] = _ln(x0_ref[0], emb_g_ref[...], emb_b_ref[...], 1e-12)

    x = x_scr[...]                       # (L, D)
    mask = mask_ref[0]                   # (L, L), 1.0 == masked key

    # --- self-attention block (fused QKV proj + attention + out proj + post-LN) ---
    qkv = jnp.dot(x, wqkv_ref[0], preferred_element_type=jnp.float32) + bqkv_ref[0]
    ctx = _mha(qkv[:, :D], qkv[:, D:2 * D], qkv[:, 2 * D:], mask, BERT_NUM_HEADS)
    attn = jnp.dot(ctx, wo_ref[0], preferred_element_type=jnp.float32) + bo_ref[0]
    x = _ln(attn + x, ln1g_ref[0], ln1b_ref[0], 1e-12)

    # --- GELU FFN block + post-LN ---
    h = jax.nn.gelu(jnp.dot(x, w1_ref[0], preferred_element_type=jnp.float32) + b1_ref[0],
                    approximate=True)
    f = jnp.dot(h, w2_ref[0], preferred_element_type=jnp.float32) + b2_ref[0]
    x = _ln(f + x, ln2g_ref[0], ln2b_ref[0], 1e-12)

    x_scr[...] = x

    @pl.when(l == pl.num_programs(1) - 1)
    def _():   # lane-dense (L, 128) store of the last hidden state (zero-padded)
        pad = jnp.zeros((x.shape[0], LANE - D), jnp.float32)
        out_ref[0] = jnp.concatenate([x, pad], axis=-1)


# =============================== fused decoder stack ===============================

def _decoder_stack_kernel(x0_ref, enc_ref, smask_ref, emask_ref, projw_ref,
                          sa_wqkv_ref, sa_bqkv_ref, sa_wo_ref, sa_bo_ref,
                          sa_lng_ref, sa_lnb_ref,
                          ca_wq_ref, ca_bq_ref, ca_wkv_ref, ca_bkv_ref,
                          ca_wo_ref, ca_bo_ref, ca_lng_ref, ca_lnb_ref,
                          ff_w1_ref, ff_b1_ref, ff_w2_ref, ff_b2_ref,
                          ff_lng_ref, ff_lnb_ref,
                          out_ref, x_scr):
    """grid = (batch ['parallel'], dec_layer ['arbitrary']). Final vocab proj fused in."""
    l = pl.program_id(1)
    D = D_MODEL

    @pl.when(l == 0)
    def _():
        x_scr[...] = x0_ref[0]           # embeddings + positional encoding

    x = x_scr[...]                       # (L, D)
    enc = enc_ref[0]                     # (Le, 128), zero-padded beyond D
    smask = smask_ref[0]                 # (L, L)   causal + pad, 1.0 == masked
    emask = emask_ref[0]                 # (L, Le)  encoder pad mask

    # --- masked self-attention block ---
    qkv = jnp.dot(x, sa_wqkv_ref[0], preferred_element_type=jnp.float32) + sa_bqkv_ref[0]
    ctx = _mha(qkv[:, :D], qkv[:, D:2 * D], qkv[:, 2 * D:], smask, N_HEADS)
    a = jnp.dot(ctx, sa_wo_ref[0], preferred_element_type=jnp.float32) + sa_bo_ref[0]
    x = _ln(a + x, sa_lng_ref[0], sa_lnb_ref[0], 1e-5)

    # --- encoder-decoder attention block (K/V from BERT hidden, fused K+V proj) ---
    q = jnp.dot(x, ca_wq_ref[0], preferred_element_type=jnp.float32) + ca_bq_ref[0]
    kv = jnp.dot(enc, ca_wkv_ref[0], preferred_element_type=jnp.float32) + ca_bkv_ref[0]
    ctx = _mha(q, kv[:, :D], kv[:, D:], emask, N_HEADS)
    a = jnp.dot(ctx, ca_wo_ref[0], preferred_element_type=jnp.float32) + ca_bo_ref[0]
    x = _ln(a + x, ca_lng_ref[0], ca_lnb_ref[0], 1e-5)

    # --- position-wise FFN (Conv1d k=1 == per-position Linear), ReLU, post-LN ---
    h = jnp.maximum(
        jnp.dot(x, ff_w1_ref[0], preferred_element_type=jnp.float32) + ff_b1_ref[0], 0.0)
    f = jnp.dot(h, ff_w2_ref[0], preferred_element_type=jnp.float32) + ff_b2_ref[0]
    x = _ln(f + x, ff_lng_ref[0], ff_lnb_ref[0], 1e-5)

    x_scr[...] = x

    @pl.when(l == pl.num_programs(1) - 1)
    def _():   # fused final vocab projection, lane-dense (L, 128) store
        out_ref[0] = jnp.dot(x, projw_ref[...], preferred_element_type=jnp.float32)


# ================================ BlockSpec helpers ================================

def _per_batch_spec(shape):
    """(B, ...) array: one batch slice per grid step, constant over the layer axis."""
    rest = tuple(shape[1:])
    zeros = (0,) * len(rest)
    return pl.BlockSpec((1,) + rest, lambda b, l, z=zeros: (b,) + z)


def _per_layer_spec(shape):
    """(n_layers, ...) stacked weight: layer l's slice per grid step."""
    rest = tuple(shape[1:])
    zeros = (0,) * len(rest)
    return pl.BlockSpec((1,) + rest, lambda b, l, z=zeros: (l,) + z)


def _const_spec(shape):
    """Whole array resident for every grid step."""
    zeros = (0,) * len(shape)
    return pl.BlockSpec(tuple(shape), lambda b, l, z=zeros: z)


# ================================ pallas_call wrappers ================================

def bert_stack(x0, mask, bp):
    """x0: (B, Le, D) raw embedding sum; mask: (B, Le, Le) float (1.0 == masked)."""
    B, Le, _ = x0.shape
    st = bp["stack"]
    weights = [st["wqkv"], st["bqkv"], st["wo"], st["bo"], st["ln1_g"], st["ln1_b"],
               st["w1"], st["b1"], st["w2"], st["b2"], st["ln2_g"], st["ln2_b"]]
    args = [x0, mask, bp["emb_ln_g"], bp["emb_ln_b"]] + weights
    in_specs = ([_per_batch_spec(x0.shape), _per_batch_spec(mask.shape),
                 _const_spec(bp["emb_ln_g"].shape), _const_spec(bp["emb_ln_b"].shape)]
                + [_per_layer_spec(w.shape) for w in weights])
    return pl.pallas_call(
        _bert_stack_kernel,
        grid=(B, BERT_NUM_LAYERS),
        in_specs=in_specs,
        out_specs=_per_batch_spec((B, Le, LANE)),
        out_shape=jax.ShapeDtypeStruct((B, Le, LANE), jnp.float32),
        scratch_shapes=[pltpu.VMEM((Le, D_MODEL), jnp.float32)],
        compiler_params=pltpu.CompilerParams(
            dimension_semantics=("parallel", "arbitrary")),
    )(*args)


def decoder_stack(x0, enc_hidden, smask, emask, dp):
    """x0: (B, Ld, D); enc_hidden: (B, Le, 128) (BERT out, zero-padded lanes)."""
    B, Ld, _ = x0.shape
    st = dp["stack"]
    weight_names = ["sa_wqkv", "sa_bqkv", "sa_wo", "sa_bo", "sa_ln_g", "sa_ln_b",
                    "ca_wq", "ca_bq", "ca_wkv", "ca_bkv", "ca_wo", "ca_bo",
                    "ca_ln_g", "ca_ln_b",
                    "ff_w1", "ff_b1", "ff_w2", "ff_b2", "ff_ln_g", "ff_ln_b"]
    weights = [st[n] for n in weight_names]
    args = [x0, enc_hidden, smask, emask, dp["proj_w_pad"]] + weights
    in_specs = ([_per_batch_spec(x0.shape), _per_batch_spec(enc_hidden.shape),
                 _per_batch_spec(smask.shape), _per_batch_spec(emask.shape),
                 _const_spec(dp["proj_w_pad"].shape)]
                + [_per_layer_spec(w.shape) for w in weights])
    return pl.pallas_call(
        _decoder_stack_kernel,
        grid=(B, N_LAYERS),
        in_specs=in_specs,
        out_specs=_per_batch_spec((B, Ld, LANE)),
        out_shape=jax.ShapeDtypeStruct((B, Ld, LANE), jnp.float32),
        scratch_shapes=[pltpu.VMEM((Ld, D_MODEL), jnp.float32)],
        compiler_params=pltpu.CompilerParams(
            dimension_semantics=("parallel", "arbitrary")),
    )(*args)


# =================================== glue (JAX) ===================================

def sinusoid_pos_encoding(max_len, d_model):
    position = jnp.arange(max_len, dtype=jnp.float32)[:, None]
    div_term = jnp.exp(jnp.arange(0, d_model, 2, dtype=jnp.float32)
                       * -(math.log(10000.0) / d_model))
    pe = jnp.zeros((max_len, d_model), jnp.float32)
    pe = pe.at[:, 0::2].set(jnp.sin(position * div_term))
    pe = pe.at[:, 1::2].set(jnp.cos(position * div_term))
    return pe


def transformer_forward(params, enc_inputs, dec_inputs, token_type_ids, attention_mask):
    bp, dp = params["bert"], params["decoder"]
    B, Le = enc_inputs.shape
    _, Ld = dec_inputs.shape

    # ---- BERT encoder (synthetic ETRI-KoBERT): embeddings + fused layer stack ----
    x0 = (bp["word_emb"][enc_inputs]
          + bp["pos_emb"][:Le][None, :, :]
          + bp["type_emb"][token_type_ids])
    bert_mask = jnp.broadcast_to((attention_mask == 0)[:, None, :],
                                 (B, Le, Le)).astype(jnp.float32)
    enc_hidden = bert_stack(x0, bert_mask, bp)              # (B, Le, 128)

    # ---- decoder: embeddings + masks + fused layer stack (+ fused vocab proj) ----
    d0 = dp["vocab_emb"][dec_inputs] + dp["pos_enc"][:Ld][None, :, :]
    pad_m = jnp.broadcast_to((dec_inputs == PAD_IDX)[:, None, :], (B, Ld, Ld))
    sub_m = jnp.triu(jnp.ones((Ld, Ld), jnp.int32), k=1)[None]
    smask = ((pad_m.astype(jnp.int32) + sub_m) > 0).astype(jnp.float32)
    emask = jnp.broadcast_to((enc_inputs == PAD_IDX)[:, None, :],
                             (B, Ld, Le)).astype(jnp.float32)
    logits_pad = decoder_stack(d0, enc_hidden, smask, emask, dp)   # (B, Ld, 128)

    # slice off the lane padding -> matches .view(-1, vocab_size)
    return logits_pad[:, :, :VOCAB_SIZE].reshape(B * Ld, VOCAB_SIZE)


# ================================= parameter init =================================

def init_params(key):
    kb, kd, kp = jax.random.split(key, 3)

    def nrm(k, shape):
        return 0.02 * jax.random.normal(k, shape, jnp.float32)

    # ---- BERT (stacked along layer axis) ----
    NLb = BERT_NUM_LAYERS
    kbs = jax.random.split(kb, 8)
    bert = dict(
        word_emb=nrm(kbs[0], (VOCAB_SIZE, D_MODEL)),
        pos_emb=nrm(kbs[1], (MAX_LEN, D_MODEL)),
        type_emb=nrm(kbs[2], (2, D_MODEL)),
        emb_ln_g=jnp.ones((1, D_MODEL), jnp.float32),
        emb_ln_b=jnp.zeros((1, D_MODEL), jnp.float32),
        stack=dict(
            wqkv=nrm(kbs[3], (NLb, D_MODEL, 3 * D_MODEL)),
            bqkv=jnp.zeros((NLb, 1, 3 * D_MODEL), jnp.float32),
            wo=nrm(kbs[4], (NLb, D_MODEL, D_MODEL)),
            bo=jnp.zeros((NLb, 1, D_MODEL), jnp.float32),
            ln1_g=jnp.ones((NLb, 1, D_MODEL), jnp.float32),
            ln1_b=jnp.zeros((NLb, 1, D_MODEL), jnp.float32),
            w1=nrm(kbs[5], (NLb, D_MODEL, BERT_INTERMEDIATE)),
            b1=jnp.zeros((NLb, 1, BERT_INTERMEDIATE), jnp.float32),
            w2=nrm(kbs[6], (NLb, BERT_INTERMEDIATE, D_MODEL)),
            b2=jnp.zeros((NLb, 1, D_MODEL), jnp.float32),
            ln2_g=jnp.ones((NLb, 1, D_MODEL), jnp.float32),
            ln2_b=jnp.zeros((NLb, 1, D_MODEL), jnp.float32),
        ),
    )

    # ---- decoder (stacked along layer axis) ----
    NLd = N_LAYERS
    kds = jax.random.split(kd, 10)
    # cross-attention K/V weight padded to LANE input rows (enc hidden is zero-padded)
    ca_wkv = jnp.zeros((NLd, LANE, 2 * D_MODEL), jnp.float32)
    ca_wkv = ca_wkv.at[:, :D_MODEL, :].set(nrm(kds[4], (NLd, D_MODEL, 2 * D_MODEL)))
    proj_w_pad = jnp.zeros((D_MODEL, LANE), jnp.float32)
    proj_w_pad = proj_w_pad.at[:, :VOCAB_SIZE].set(nrm(kp, (D_MODEL, VOCAB_SIZE)))
    dec = dict(
        vocab_emb=nrm(kds[0], (VOCAB_SIZE, D_MODEL)),
        pos_enc=sinusoid_pos_encoding(MAX_LEN, D_MODEL),
        proj_w_pad=proj_w_pad,                      # bias-free final projection
        stack=dict(
            sa_wqkv=nrm(kds[1], (NLd, D_MODEL, 3 * D_MODEL)),
            sa_bqkv=jnp.zeros((NLd, 1, 3 * D_MODEL), jnp.float32),
            sa_wo=nrm(kds[2], (NLd, D_MODEL, D_MODEL)),
            sa_bo=jnp.zeros((NLd, 1, D_MODEL), jnp.float32),
            sa_ln_g=jnp.ones((NLd, 1, D_MODEL), jnp.float32),
            sa_ln_b=jnp.zeros((NLd, 1, D_MODEL), jnp.float32),
            ca_wq=nrm(kds[3], (NLd, D_MODEL, D_MODEL)),
            ca_bq=jnp.zeros((NLd, 1, D_MODEL), jnp.float32),
            ca_wkv=ca_wkv,
            ca_bkv=jnp.zeros((NLd, 1, 2 * D_MODEL), jnp.float32),
            ca_wo=nrm(kds[5], (NLd, D_MODEL, D_MODEL)),
            ca_bo=jnp.zeros((NLd, 1, D_MODEL), jnp.float32),
            ca_ln_g=jnp.ones((NLd, 1, D_MODEL), jnp.float32),
            ca_ln_b=jnp.zeros((NLd, 1, D_MODEL), jnp.float32),
            ff_w1=nrm(kds[6], (NLd, D_MODEL, FEEDFORWARD)),
            ff_b1=jnp.zeros((NLd, 1, FEEDFORWARD), jnp.float32),
            ff_w2=nrm(kds[7], (NLd, FEEDFORWARD, D_MODEL)),
            ff_b2=jnp.zeros((NLd, 1, D_MODEL), jnp.float32),
            ff_ln_g=jnp.ones((NLd, 1, D_MODEL), jnp.float32),
            ff_ln_b=jnp.zeros((NLd, 1, D_MODEL), jnp.float32),
        ),
    )
    return dict(bert=bert, decoder=dec)


# ===================================== main =====================================

if __name__ == "__main__":
    B, ENC_LEN, DEC_LEN = 2, 8, 8
    key = jax.random.PRNGKey(0)
    k1, k2 = jax.random.split(key)

    enc_inputs = jax.random.randint(k1, (B, ENC_LEN), 1, VOCAB_SIZE, dtype=jnp.int32)
    enc_inputs = enc_inputs.at[:, -2:].set(PAD_IDX)          # some encoder padding
    dec_inputs = jax.random.randint(k2, (B, DEC_LEN), 1, VOCAB_SIZE, dtype=jnp.int32)
    dec_inputs = dec_inputs.at[:, -1:].set(PAD_IDX)          # some decoder padding
    token_type_ids = jnp.zeros((B, ENC_LEN), jnp.int32)
    attention_mask = (enc_inputs != PAD_IDX).astype(jnp.int32)

    params = init_params(jax.random.PRNGKey(42))

    fwd = jax.jit(transformer_forward)
    logits = fwd(params, enc_inputs, dec_inputs, token_type_ids, attention_mask)
    logits = jax.block_until_ready(logits)

    assert logits.shape == (B * DEC_LEN, VOCAB_SIZE), logits.shape
    assert logits.dtype == jnp.float32
    assert bool(jnp.all(jnp.isfinite(logits)))
    print("KERNEL_OK")
</pallas_src>

<mosaic_0001>
module attributes {stable_mosaic.version = 11 : i64} {
  func.func @_bert_stack_kernel(%arg0: i32, %arg1: i32, %arg2: memref<1x8x32xf32, #tpu.memory_space<vmem>>, %arg3: memref<1x8x8xf32, #tpu.memory_space<vmem>>, %arg4: memref<1x32xf32, #tpu.memory_space<vmem>>, %arg5: memref<1x32xf32, #tpu.memory_space<vmem>>, %arg6: memref<1x32x96xf32, #tpu.memory_space<vmem>>, %arg7: memref<1x1x96xf32, #tpu.memory_space<vmem>>, %arg8: memref<1x32x32xf32, #tpu.memory_space<vmem>>, %arg9: memref<1x1x32xf32, #tpu.memory_space<vmem>>, %arg10: memref<1x1x32xf32, #tpu.memory_space<vmem>>, %arg11: memref<1x1x32xf32, #tpu.memory_space<vmem>>, %arg12: memref<1x32x128xf32, #tpu.memory_space<vmem>>, %arg13: memref<1x1x128xf32, #tpu.memory_space<vmem>>, %arg14: memref<1x128x32xf32, #tpu.memory_space<vmem>>, %arg15: memref<1x1x32xf32, #tpu.memory_space<vmem>>, %arg16: memref<1x1x32xf32, #tpu.memory_space<vmem>>, %arg17: memref<1x1x32xf32, #tpu.memory_space<vmem>>, %arg18: memref<1x8x128xf32, #tpu.memory_space<vmem>>, %arg19: memref<8x32xf32, #tpu.memory_space<vmem>>) attributes {dimension_semantics = [#tpu.dimension_semantics<parallel>, #tpu.dimension_semantics<arbitrary>], iteration_bounds = array<i64: 2, 4>, scalar_prefetch = 0 : i64, scratch_operands = 1 : i64, tpu.core_type = #tpu.core_type<tc>, window_params = [{transform_indices = @transform_0, window_bounds = array<i64: 1, 8, 32>}, {transform_indices = @transform_1, window_bounds = array<i64: 1, 8, 8>}, {pipeline_mode = #tpu.pipeline_mode<synchronous>, transform_indices = @transform_2, window_bounds = array<i64: 1, 32>}, {pipeline_mode = #tpu.pipeline_mode<synchronous>, transform_indices = @transform_3, window_bounds = array<i64: 1, 32>}, {transform_indices = @transform_4, window_bounds = array<i64: 1, 32, 96>}, {transform_indices = @transform_5, window_bounds = array<i64: 1, 1, 96>}, {transform_indices = @transform_6, window_bounds = array<i64: 1, 32, 32>}, {transform_indices = @transform_7, window_bounds = array<i64: 1, 1, 32>}, {transform_indices = @transform_8, window_bounds = array<i64: 1, 1, 32>}, {transform_indices = @transform_9, window_bounds = array<i64: 1, 1, 32>}, {transform_indices = @transform_10, window_bounds = array<i64: 1, 32, 128>}, {transform_indices = @transform_11, window_bounds = array<i64: 1, 1, 128>}, {transform_indices = @transform_12, window_bounds = array<i64: 1, 128, 32>}, {transform_indices = @transform_13, window_bounds = array<i64: 1, 1, 32>}, {transform_indices = @transform_14, window_bounds = array<i64: 1, 1, 32>}, {transform_indices = @transform_15, window_bounds = array<i64: 1, 1, 32>}, {transform_indices = @transform_16, window_bounds = array<i64: 1, 8, 128>}]} {
    %c0_i32 = arith.constant 0 : i32
    %0 = arith.cmpi eq, %arg1, %c0_i32 : i32
    %1 = arith.extui %0 : i1 to i32
    %c0_i32_0 = arith.constant 0 : i32
    %2 = arith.cmpi ne, %1, %c0_i32_0 : i32
    scf.if %2 {
      %c0_75 = arith.constant 0 : index
      %c0_76 = arith.constant 0 : index
      %c0_77 = arith.constant 0 : index
      %151 = vector.load %arg2[%c0_75, %c0_76, %c0_77] : memref<1x8x32xf32, #tpu.memory_space<vmem>>, vector<1x8x32xf32>
      %152 = vector.shape_cast %151 : vector<1x8x32xf32> to vector<8x32xf32>
      %c0_78 = arith.constant 0 : index
      %c0_79 = arith.constant 0 : index
      %153 = vector.load %arg4[%c0_78, %c0_79] : memref<1x32xf32, #tpu.memory_space<vmem>>, vector<1x32xf32>
      %c0_80 = arith.constant 0 : index
      %c0_81 = arith.constant 0 : index
      %154 = vector.load %arg5[%c0_80, %c0_81] : memref<1x32xf32, #tpu.memory_space<vmem>>, vector<1x32xf32>
      %cst_82 = arith.constant dense<0.000000e+00> : vector<8xf32>
      %155 = vector.multi_reduction <add>, %152, %cst_82 [1] : vector<8x32xf32> to vector<8xf32>
      %156 = vector.shape_cast %155 : vector<8xf32> to vector<8x1xf32>
      %cst_83 = arith.constant 3.200000e+01 : f32
      %157 = vector.broadcast %cst_83 : f32 to vector<8x1xf32>
      %158 = arith.divf %156, %157 : vector<8x1xf32>
      %159 = vector.broadcast %158 : vector<8x1xf32> to vector<8x32xf32>
      %160 = arith.subf %152, %159 : vector<8x32xf32>
      %161 = arith.mulf %160, %160 : vector<8x32xf32>
      %cst_84 = arith.constant dense<0.000000e+00> : vector<8xf32>
      %162 = vector.multi_reduction <add>, %161, %cst_84 [1] : vector<8x32xf32> to vector<8xf32>
      %163 = vector.shape_cast %162 : vector<8xf32> to vector<8x1xf32>
      %cst_85 = arith.constant 3.200000e+01 : f32
      %164 = vector.broadcast %cst_85 : f32 to vector<8x1xf32>
      %165 = arith.divf %163, %164 : vector<8x1xf32>
      %166 = vector.broadcast %158 : vector<8x1xf32> to vector<8x32xf32>
      %167 = arith.subf %152, %166 : vector<8x32xf32>
      %cst_86 = arith.constant 9.99999996E-13 : f32
      %168 = vector.broadcast %cst_86 : f32 to vector<8x1xf32>
      %169 = arith.addf %165, %168 : vector<8x1xf32>
      %170 = math.rsqrt %169 : vector<8x1xf32>
      %171 = vector.broadcast %170 : vector<8x1xf32> to vector<8x32xf32>
      %172 = arith.mulf %167, %171 : vector<8x32xf32>
      %173 = vector.broadcast %153 : vector<1x32xf32> to vector<8x32xf32>
      %174 = arith.mulf %172, %173 : vector<8x32xf32>
      %175 = vector.broadcast %154 : vector<1x32xf32> to vector<8x32xf32>
      %176 = arith.addf %174, %175 : vector<8x32xf32>
      %c0_87 = arith.constant 0 : index
      %c0_88 = arith.constant 0 : index
      %177 = vector.load %arg19[%c0_87, %c0_88] : memref<8x32xf32, #tpu.memory_space<vmem>>, vector<8x32xf32>
      tpu.vector_store %arg19[%c0_87, %c0_88], %176 {strides = array<i32>} : memref<8x32xf32, #tpu.memory_space<vmem>>, vector<8x32xf32>,
    } else {
    }
    %c0 = arith.constant 0 : index
    %c0_1 = arith.constant 0 : index
    %3 = vector.load %arg19[%c0, %c0_1] : memref<8x32xf32, #tpu.memory_space<vmem>>, vector<8x32xf32>
    %c0_2 = arith.constant 0 : index
    %c0_3 = arith.constant 0 : index
    %c0_4 = arith.constant 0 : index
    %4 = vector.load %arg3[%c0_2, %c0_3, %c0_4] : memref<1x8x8xf32, #tpu.memory_space<vmem>>, vector<1x8x8xf32>
    %5 = vector.shape_cast %4 : vector<1x8x8xf32> to vector<8x8xf32>
    %c0_5 = arith.constant 0 : index
    %c0_6 = arith.constant 0 : index
    %c0_7 = arith.constant 0 : index
    %6 = vector.load %arg6[%c0_5, %c0_6, %c0_7] : memref<1x32x96xf32, #tpu.memory_space<vmem>>, vector<1x32x96xf32>
    %7 = vector.shape_cast %6 : vector<1x32x96xf32> to vector<32x96xf32>
    %cst = arith.constant dense<0.000000e+00> : vector<8x96xf32>
    %8 = tpu.matmul %3, %7, %cst {dimension_numbers = #tpu.dot_dimension_numbers<[1], [0], [0], [1], [0, 0, 1, 1], [], []>} : vector<8x32xf32>, vector<32x96xf32>, vector<8x96xf32> -> vector<8x96xf32>
    %c0_8 = arith.constant 0 : index
    %c0_9 = arith.constant 0 : index
    %c0_10 = arith.constant 0 : index
    %9 = vector.load %arg7[%c0_8, %c0_9, %c0_10] : memref<1x1x96xf32, #tpu.memory_space<vmem>>, vector<1x1x96xf32>
    %10 = vector.shape_cast %9 : vector<1x1x96xf32> to vector<1x96xf32>
    %11 = vector.broadcast %10 : vector<1x96xf32> to vector<8x96xf32>
    %12 = arith.addf %8, %11 : vector<8x96xf32>
    %13 = vector.extract_strided_slice %12 {offsets = [0, 0], sizes = [8, 32], strides = [1, 1]} : vector<8x96xf32> to vector<8x32xf32>
    %14 = vector.extract_strided_slice %12 {offsets = [0, 32], sizes = [8, 32], strides = [1, 1]} : vector<8x96xf32> to vector<8x32xf32>
    %15 = vector.extract_strided_slice %12 {offsets = [0, 64], sizes = [8, 32], strides = [1, 1]} : vector<8x96xf32> to vector<8x32xf32>
    %16 = vector.extract_strided_slice %13 {offsets = [0, 0], sizes = [8, 16], strides = [1, 1]} : vector<8x32xf32> to vector<8x16xf32>
    %17 = vector.extract_strided_slice %14 {offsets = [0, 0], sizes = [8, 16], strides = [1, 1]} : vector<8x32xf32> to vector<8x16xf32>
    %18 = vector.extract_strided_slice %15 {offsets = [0, 0], sizes = [8, 16], strides = [1, 1]} : vector<8x32xf32> to vector<8x16xf32>
    %cst_11 = arith.constant dense<0.000000e+00> : vector<8x8xf32>
    %19 = tpu.matmul %16, %17, %cst_11 {dimension_numbers = #tpu.dot_dimension_numbers<[1], [1], [0], [0], [0, 0, 1, 0], [], []>} : vector<8x16xf32>, vector<8x16xf32>, vector<8x8xf32> -> vector<8x8xf32>
    %cst_12 = arith.constant 2.500000e-01 : f32
    %20 = vector.broadcast %cst_12 : f32 to vector<8x8xf32>
    %21 = arith.mulf %19, %20 : vector<8x8xf32>
    %cst_13 = arith.constant 5.000000e-01 : f32
    %22 = vector.broadcast %cst_13 : f32 to vector<8x8xf32>
    %23 = arith.cmpf ogt, %5, %22 : vector<8x8xf32>
    %cst_14 = arith.constant -1.000000e+09 : f32
    %24 = vector.broadcast %cst_14 : f32 to vector<8x8xf32>
    %25 = arith.select %23, %24, %21 : vector<8x8xi1>, vector<8x8xf32>
    %cst_15 = arith.constant dense<0xFF800000> : vector<8xf32>
    %26 = vector.multi_reduction <maximumf>, %25, %cst_15 [1] : vector<8x8xf32> to vector<8xf32>
    %27 = vector.shape_cast %26 : vector<8xf32> to vector<8x1xf32>
    %28 = vector.broadcast %27 : vector<8x1xf32> to vector<8x8xf32>
    %29 = arith.subf %25, %28 : vector<8x8xf32>
    %30 = math.exp %29 : vector<8x8xf32>
    %cst_16 = arith.constant dense<0.000000e+00> : vector<8xf32>
    %31 = vector.multi_reduction <add>, %30, %cst_16 [1] : vector<8x8xf32> to vector<8xf32>
    %32 = vector.shape_cast %31 : vector<8xf32> to vector<8x1xf32>
    %33 = tpu.reciprocal %32 {approx = true} : vector<8x1xf32> -> vector<8x1xf32>
    %34 = vector.broadcast %33 : vector<8x1xf32> to vector<8x8xf32>
    %35 = arith.mulf %30, %34 : vector<8x8xf32>
    %cst_17 = arith.constant dense<0.000000e+00> : vector<8x16xf32>
    %36 = tpu.matmul %35, %18, %cst_17 {dimension_numbers = #tpu.dot_dimension_numbers<[1], [0], [0], [1], [0, 0, 1, 1], [], []>} : vector<8x8xf32>, vector<8x16xf32>, vector<8x16xf32> -> vector<8x16xf32>
    %37 = vector.extract_strided_slice %13 {offsets = [0, 16], sizes = [8, 16], strides = [1, 1]} : vector<8x32xf32> to vector<8x16xf32>
    %38 = vector.extract_strided_slice %14 {offsets = [0, 16], sizes = [8, 16], strides = [1, 1]} : vector<8x32xf32> to vector<8x16xf32>
    %39 = vector.extract_strided_slice %15 {offsets = [0, 16], sizes = [8, 16], strides = [1, 1]} : vector<8x32xf32> to vector<8x16xf32>
    %cst_18 = arith.constant dense<0.000000e+00> : vector<8x8xf32>
    %40 = tpu.matmul %37, %38, %cst_18 {dimension_numbers = #tpu.dot_dimension_numbers<[1], [1], [0], [0], [0, 0, 1, 0], [], []>} : vector<8x16xf32>, vector<8x16xf32>, vector<8x8xf32> -> vector<8x8xf32>
    %cst_19 = arith.constant 2.500000e-01 : f32
    %41 = vector.broadcast %cst_19 : f32 to vector<8x8xf32>
    %42 = arith.mulf %40, %41 : vector<8x8xf32>
    %cst_20 = arith.constant 5.000000e-01 : f32
    %43 = vector.broadcast %cst_20 : f32 to vector<8x8xf32>
    %44 = arith.cmpf ogt, %5, %43 : vector<8x8xf32>
    %cst_21 = arith.constant -1.000000e+09 : f32
    %45 = vector.broadcast %cst_21 : f32 to vector<8x8xf32>
    %46 = arith.select %44, %45, %42 : vector<8x8xi1>, vector<8x8xf32>
    %cst_22 = arith.constant dense<0xFF800000> : vector<8xf32>
    %47 = vector.multi_reduction <maximumf>, %46, %cst_22 [1] : vector<8x8xf32> to vector<8xf32>
    %48 = vector.shape_cast %47 : vector<8xf32> to vector<8x1xf32>
    %49 = vector.broadcast %48 : vector<8x1xf32> to vector<8x8xf32>
    %50 = arith.subf %46, %49 : vector<8x8xf32>
    %51 = math.exp %50 : vector<8x8xf32>
    %cst_23 = arith.constant dense<0.000000e+00> : vector<8xf32>
    %52 = vector.multi_reduction <add>, %51, %cst_23 [1] : vector<8x8xf32> to vector<8xf32>
    %53 = vector.shape_cast %52 : vector<8xf32> to vector<8x1xf32>
    %54 = tpu.reciprocal %53 {approx = true} : vector<8x1xf32> -> vector<8x1xf32>
    %55 = vector.broadcast %54 : vector<8x1xf32> to vector<8x8xf32>
    %56 = arith.mulf %51, %55 : vector<8x8xf32>
    %cst_24 = arith.constant dense<0.000000e+00> : vector<8x16xf32>
    %57 = tpu.matmul %56, %39, %cst_24 {dimension_numbers = #tpu.dot_dimension_numbers<[1], [0], [0], [1], [0, 0, 1, 1], [], []>} : vector<8x8xf32>, vector<8x16xf32>, vector<8x16xf32> -> vector<8x16xf32>
    %58 = tpu.concatenate %36, %57 in 1 : vector<8x16xf32>, vector<8x16xf32> -> vector<8x32xf32>
    %c0_25 = arith.constant 0 : index
    %c0_26 = arith.constant 0 : index
    %c0_27 = arith.constant 0 : index
    %59 = vector.load %arg8[%c0_25, %c0_26, %c0_27] : memref<1x32x32xf32, #tpu.memory_space<vmem>>, vector<1x32x32xf32>
    %60 = vector.shape_cast %59 : vector<1x32x32xf32> to vector<32x32xf32>
    %cst_28 = arith.constant dense<0.000000e+00> : vector<8x32xf32>
    %61 = tpu.matmul %58, %60, %cst_28 {dimension_numbers = #tpu.dot_dimension_numbers<[1], [0], [0], [1], [0, 0, 1, 1], [], []>} : vector<8x32xf32>, vector<32x32xf32>, vector<8x32xf32> -> vector<8x32xf32>
    %c0_29 = arith.constant 0 : index
    %c0_30 = arith.constant 0 : index
    %c0_31 = arith.constant 0 : index
    %62 = vector.load %arg9[%c0_29, %c0_30, %c0_31] : memref<1x1x32xf32, #tpu.memory_space<vmem>>, vector<1x1x32xf32>
    %63 = vector.shape_cast %62 : vector<1x1x32xf32> to vector<1x32xf32>
    %64 = vector.broadcast %63 : vector<1x32xf32> to vector<8x32xf32>
    %65 = arith.addf %61, %64 : vector<8x32xf32>
    %66 = arith.addf %65, %3 : vector<8x32xf32>
    %c0_32 = arith.constant 0 : index
    %c0_33 = arith.constant 0 : index
    %c0_34 = arith.constant 0 : index
    %67 = vector.load %arg10[%c0_32, %c0_33, %c0_34] : memref<1x1x32xf32, #tpu.memory_space<vmem>>, vector<1x1x32xf32>
    %68 = vector.shape_cast %67 : vector<1x1x32xf32> to vector<1x32xf32>
    %c0_35 = arith.constant 0 : index
    %c0_36 = arith.constant 0 : index
    %c0_37 = arith.constant 0 : index
    %69 = vector.load %arg11[%c0_35, %c0_36, %c0_37] : memref<1x1x32xf32, #tpu.memory_space<vmem>>, vector<1x1x32xf32>
    %70 = vector.shape_cast %69 : vector<1x1x32xf32> to vector<1x32xf32>
    %cst_38 = arith.constant dense<0.000000e+00> : vector<8xf32>
    %71 = vector.multi_reduction <add>, %66, %cst_38 [1] : vector<8x32xf32> to vector<8xf32>
    %72 = vector.shape_cast %71 : vector<8xf32> to vector<8x1xf32>
    %cst_39 = arith.constant 3.200000e+01 : f32
    %73 = vector.broadcast %cst_39 : f32 to vector<8x1xf32>
    %74 = arith.divf %72, %73 : vector<8x1xf32>
    %75 = vector.broadcast %74 : vector<8x1xf32> to vector<8x32xf32>
    %76 = arith.subf %66, %75 : vector<8x32xf32>
    %77 = arith.mulf %76, %76 : vector<8x32xf32>
    %cst_40 = arith.constant dense<0.000000e+00> : vector<8xf32>
    %78 = vector.multi_reduction <add>, %77, %cst_40 [1] : vector<8x32xf32> to vector<8xf32>
    %79 = vector.shape_cast %78 : vector<8xf32> to vector<8x1xf32>
    %cst_41 = arith.constant 3.200000e+01 : f32
    %80 = vector.broadcast %cst_41 : f32 to vector<8x1xf32>
    %81 = arith.divf %79, %80 : vector<8x1xf32>
    %82 = vector.broadcast %74 : vector<8x1xf32> to vector<8x32xf32>
    %83 = arith.subf %66, %82 : vector<8x32xf32>
    %cst_42 = arith.constant 9.99999996E-13 : f32
    %84 = vector.broadcast %cst_42 : f32 to vector<8x1xf32>
    %85 = arith.addf %81, %84 : vector<8x1xf32>
    %86 = math.rsqrt %85 : vector<8x1xf32>
    %87 = vector.broadcast %86 : vector<8x1xf32> to vector<8x32xf32>
    %88 = arith.mulf %83, %87 : vector<8x32xf32>
    %89 = vector.broadcast %68 : vector<1x32xf32> to vector<8x32xf32>
    %90 = arith.mulf %88, %89 : vector<8x32xf32>
    %91 = vector.broadcast %70 : vector<1x32xf32> to vector<8x32xf32>
    %92 = arith.addf %90, %91 : vector<8x32xf32>
    %c0_43 = arith.constant 0 : index
    %c0_44 = arith.constant 0 : index
    %c0_45 = arith.constant 0 : index
    %93 = vector.load %arg12[%c0_43, %c0_44, %c0_45] : memref<1x32x128xf32, #tpu.memory_space<vmem>>, vector<1x32x128xf32>
    %94 = vector.shape_cast %93 : vector<1x32x128xf32> to vector<32x128xf32>
    %cst_46 = arith.constant dense<0.000000e+00> : vector<8x128xf32>
    %95 = tpu.matmul %92, %94, %cst_46 {dimension_numbers = #tpu.dot_dimension_numbers<[1], [0], [0], [1], [0, 0, 1, 1], [], []>} : vector<8x32xf32>, vector<32x128xf32>, vector<8x128xf32> -> vector<8x128xf32>
    %c0_47 = arith.constant 0 : index
    %c0_48 = arith.constant 0 : index
    %c0_49 = arith.constant 0 : index
    %96 = vector.load %arg13[%c0_47, %c0_48, %c0_49] : memref<1x1x128xf32, #tpu.memory_space<vmem>>, vector<1x1x128xf32>
    %97 = vector.shape_cast %96 : vector<1x1x128xf32> to vector<1x128xf32>
    %98 = vector.broadcast %97 : vector<1x128xf32> to vector<8x128xf32>
    %99 = arith.addf %95, %98 : vector<8x128xf32>
    %100 = arith.mulf %99, %99 : vector<8x128xf32>
    %101 = arith.mulf %99, %100 : vector<8x128xf32>
    %cst_50 = arith.constant 4.471500e-02 : f32
    %102 = vector.broadcast %cst_50 : f32 to vector<8x128xf32>
    %103 = arith.mulf %102, %101 : vector<8x128xf32>
    %104 = arith.addf %99, %103 : vector<8x128xf32>
    %cst_51 = arith.constant 0.797884583 : f32
    %105 = vector.broadcast %cst_51 : f32 to vector<8x128xf32>
    %106 = arith.mulf %105, %104 : vector<8x128xf32>
    %107 = math.tanh %106 : vector<8x128xf32>
    %cst_52 = arith.constant 1.000000e+00 : f32
    %108 = vector.broadcast %cst_52 : f32 to vector<8x128xf32>
    %109 = arith.addf %108, %107 : vector<8x128xf32>
    %cst_53 = arith.constant 5.000000e-01 : f32
    %110 = vector.broadcast %cst_53 : f32 to vector<8x128xf32>
    %111 = arith.mulf %110, %109 : vector<8x128xf32>
    %112 = arith.mulf %99, %111 : vector<8x128xf32>
    %c0_54 = arith.constant 0 : index
    %c0_55 = arith.constant 0 : index
    %c0_56 = arith.constant 0 : index
    %113 = vector.load %arg14[%c0_54, %c0_55, %c0_56] : memref<1x128x32xf32, #tpu.memory_space<vmem>>, vector<1x128x32xf32>
    %114 = vector.shape_cast %113 : vector<1x128x32xf32> to vector<128x32xf32>
    %cst_57 = arith.constant dense<0.000000e+00> : vector<8x32xf32>
    %115 = tpu.matmul %112, %114, %cst_57 {dimension_numbers = #tpu.dot_dimension_numbers<[1], [0], [0], [1], [0, 0, 1, 1], [], []>} : vector<8x128xf32>, vector<128x32xf32>, vector<8x32xf32> -> vector<8x32xf32>
    %c0_58 = arith.constant 0 : index
    %c0_59 = arith.constant 0 : index
    %c0_60 = arith.constant 0 : index
    %116 = vector.load %arg15[%c0_58, %c0_59, %c0_60] : memref<1x1x32xf32, #tpu.memory_space<vmem>>, vector<1x1x32xf32>
    %117 = vector.shape_cast %116 : vector<1x1x32xf32> to vector<1x32xf32>
    %118 = vector.broadcast %117 : vector<1x32xf32> to vector<8x32xf32>
    %119 = arith.addf %115, %118 : vector<8x32xf32>
    %120 = arith.addf %119, %92 : vector<8x32xf32>
    %c0_61 = arith.constant 0 : index
    %c0_62 = arith.constant 0 : index
    %c0_63 = arith.constant 0 : index
    %121 = vector.load %arg16[%c0_61, %c0_62, %c0_63] : memref<1x1x32xf32, #tpu.memory_space<vmem>>, vector<1x1x32xf32>
    %122 = vector.shape_cast %121 : vector<1x1x32xf32> to vector<1x32xf32>
    %c0_64 = arith.constant 0 : index
    %c0_65 = arith.constant 0 : index
    %c0_66 = arith.constant 0 : index
    %123 = vector.load %arg17[%c0_64, %c0_65, %c0_66] : memref<1x1x32xf32, #tpu.memory_space<vmem>>, vector<1x1x32xf32>
    %124 = vector.shape_cast %123 : vector<1x1x32xf32> to vector<1x32xf32>
    %cst_67 = arith.constant dense<0.000000e+00> : vector<8xf32>
    %125 = vector.multi_reduction <add>, %120, %cst_67 [1] : vector<8x32xf32> to vector<8xf32>
    %126 = vector.shape_cast %125 : vector<8xf32> to vector<8x1xf32>
    %cst_68 = arith.constant 3.200000e+01 : f32
    %127 = vector.broadcast %cst_68 : f32 to vector<8x1xf32>
    %128 = arith.divf %126, %127 : vector<8x1xf32>
    %129 = vector.broadcast %128 : vector<8x1xf32> to vector<8x32xf32>
    %130 = arith.subf %120, %129 : vector<8x32xf32>
    %131 = arith.mulf %130, %130 : vector<8x32xf32>
    %cst_69 = arith.constant dense<0.000000e+00> : vector<8xf32>
    %132 = vector.multi_reduction <add>, %131, %cst_69 [1] : vector<8x32xf32> to vector<8xf32>
    %133 = vector.shape_cast %132 : vector<8xf32> to vector<8x1xf32>
    %cst_70 = arith.constant 3.200000e+01 : f32
    %134 = vector.broadcast %cst_70 : f32 to vector<8x1xf32>
    %135 = arith.divf %133, %134 : vector<8x1xf32>
    %136 = vector.broadcast %128 : vector<8x1xf32> to vector<8x32xf32>
    %137 = arith.subf %120, %136 : vector<8x32xf32>
    %cst_71 = arith.constant 9.99999996E-13 : f32
    %138 = vector.broadcast %cst_71 : f32 to vector<8x1xf32>
    %139 = arith.addf %135, %138 : vector<8x1xf32>
    %140 = math.rsqrt %139 : vector<8x1xf32>
    %141 = vector.broadcast %140 : vector<8x1xf32> to vector<8x32xf32>
    %142 = arith.mulf %137, %141 : vector<8x32xf32>
    %143 = vector.broadcast %122 : vector<1x32xf32> to vector<8x32xf32>
    %144 = arith.mulf %142, %143 : vector<8x32xf32>
    %145 = vector.broadcast %124 : vector<1x32xf32> to vector<8x32xf32>
    %146 = arith.addf %144, %145 : vector<8x32xf32>
    %c0_72 = arith.constant 0 : index
    %c0_73 = arith.constant 0 : index
    %147 = vector.load %arg19[%c0_72, %c0_73] : memref<8x32xf32, #tpu.memory_space<vmem>>, vector<8x32xf32>
    tpu.vector_store %arg19[%c0_72, %c0_73], %146 {strides = array<i32>} : memref<8x32xf32, #tpu.memory_space<vmem>>, vector<8x32xf32>,
    %c3_i32 = arith.constant 3 : i32
    %148 = arith.cmpi eq, %arg1, %c3_i32 : i32
    %149 = arith.extui %148 : i1 to i32
    %c0_i32_74 = arith.constant 0 : i32
    %150 = arith.cmpi ne, %149, %c0_i32_74 : i32
    scf.if %150 {
      %cst_75 = arith.constant 0.000000e+00 : f32
      %151 = vector.broadcast %cst_75 : f32 to vector<8x96xf32>
      %152 = tpu.concatenate %146, %151 in 1 : vector<8x32xf32>, vector<8x96xf32> -> vector<8x128xf32>
      %c0_76 = arith.constant 0 : index
      %c0_77 = arith.constant 0 : index
      %c0_78 = arith.constant 0 : index
      %153 = vector.load %arg18[%c0_76, %c0_77, %c0_78] : memref<1x8x128xf32, #tpu.memory_space<vmem>>, vector<1x8x128xf32>
      %154 = vector.shape_cast %153 : vector<1x8x128xf32> to vector<8x128xf32>
      %155 = vector.shape_cast %152 : vector<8x128xf32> to vector<1x8x128xf32>
      tpu.vector_store %arg18[%c0_76, %c0_77, %c0_78], %155 {strides = array<i32>} : memref<1x8x128xf32, #tpu.memory_space<vmem>>, vector<1x8x128xf32>,
    } else {
    }
    return
  }
  func.func @transform_0(%arg0: i32, %arg1: i32) -> (i32, i32, i32) {
    %c0_i32 = arith.constant 0 : i32
    %c0_i32_0 = arith.constant 0 : i32
    %c0_i32_1 = arith.constant 0 : i32
    return %arg0, %c0_i32, %c0_i32_0 : i32, i32, i32
  }
  func.func @transform_1(%arg0: i32, %arg1: i32) -> (i32, i32, i32) {
    %c0_i32 = arith.constant 0 : i32
    %c0_i32_0 = arith.constant 0 : i32
    %c0_i32_1 = arith.constant 0 : i32
    return %arg0, %c0_i32, %c0_i32_0 : i32, i32, i32
  }
  func.func @transform_2(%arg0: i32, %arg1: i32) -> (i32, i32) {
    %c0_i32 = arith.constant 0 : i32
    %c0_i32_0 = arith.constant 0 : i32
    %c0_i32_1 = arith.constant 0 : i32
    return %c0_i32, %c0_i32_0 : i32, i32
  }
  func.func @transform_3(%arg0: i32, %arg1: i32) -> (i32, i32) {
    %c0_i32 = arith.constant 0 : i32
    %c0_i32_0 = arith.constant 0 : i32
    %c0_i32_1 = arith.constant 0 : i32
    return %c0_i32, %c0_i32_0 : i32, i32
  }
  func.func @transform_4(%arg0: i32, %arg1: i32) -> (i32, i32, i32) {
    %c0_i32 = arith.constant 0 : i32
    %c0_i32_0 = arith.constant 0 : i32
    %c0_i32_1 = arith.constant 0 : i32
    return %arg1, %c0_i32, %c0_i32_0 : i32, i32, i32
  }
  func.func @transform_5(%arg0: i32, %arg1: i32) -> (i32, i32, i32) {
    %c0_i32 = arith.constant 0 : i32
    %c0_i32_0 = arith.constant 0 : i32
    %c0_i32_1 = arith.constant 0 : i32
    return %arg1, %c0_i32, %c0_i32_0 : i32, i32, i32
  }
  func.func @transform_6(%arg0: i32, %arg1: i32) -> (i32, i32, i32) {
    %c0_i32 = arith.constant 0 : i32
    %c0_i32_0 = arith.constant 0 : i32
    %c0_i32_1 = arith.constant 0 : i32
    return %arg1, %c0_i32, %c0_i32_0 : i32, i32, i32
  }
  func.func @transform_7(%arg0: i32, %arg1: i32) -> (i32, i32, i32) {
    %c0_i32 = arith.constant 0 : i32
    %c0_i32_0 = arith.constant 0 : i32
    %c0_i32_1 = arith.constant 0 : i32
    return %arg1, %c0_i32, %c0_i32_0 : i32, i32, i32
  }
  func.func @transform_8(%arg0: i32, %arg1: i32) -> (i32, i32, i32) {
    %c0_i32 = arith.constant 0 : i32
    %c0_i32_0 = arith.constant 0 : i32
    %c0_i32_1 = arith.constant 0 : i32
    return %arg1, %c0_i32, %c0_i32_0 : i32, i32, i32
  }
  func.func @transform_9(%arg0: i32, %arg1: i32) -> (i32, i32, i32) {
    %c0_i32 = arith.constant 0 : i32
    %c0_i32_0 = arith.constant 0 : i32
    %c0_i32_1 = arith.constant 0 : i32
    return %arg1, %c0_i32, %c0_i32_0 : i32, i32, i32
  }
  func.func @transform_10(%arg0: i32, %arg1: i32) -> (i32, i32, i32) {
    %c0_i32 = arith.constant 0 : i32
    %c0_i32_0 = arith.constant 0 : i32
    %c0_i32_1 = arith.constant 0 : i32
    return %arg1, %c0_i32, %c0_i32_0 : i32, i32, i32
  }
  func.func @transform_11(%arg0: i32, %arg1: i32) -> (i32, i32, i32) {
    %c0_i32 = arith.constant 0 : i32
    %c0_i32_0 = arith.constant 0 : i32
    %c0_i32_1 = arith.constant 0 : i32
    return %arg1, %c0_i32, %c0_i32_0 : i32, i32, i32
  }
  func.func @transform_12(%arg0: i32, %arg1: i32) -> (i32, i32, i32) {
    %c0_i32 = arith.constant 0 : i32
    %c0_i32_0 = arith.constant 0 : i32
    %c0_i32_1 = arith.constant 0 : i32
    return %arg1, %c0_i32, %c0_i32_0 : i32, i32, i32
  }
  func.func @transform_13(%arg0: i32, %arg1: i32) -> (i32, i32, i32) {
    %c0_i32 = arith.constant 0 : i32
    %c0_i32_0 = arith.constant 0 : i32
    %c0_i32_1 = arith.constant 0 : i32
    return %arg1, %c0_i32, %c0_i32_0 : i32, i32, i32
  }
  func.func @transform_14(%arg0: i32, %arg1: i32) -> (i32, i32, i32) {
    %c0_i32 = arith.constant 0 : i32
    %c0_i32_0 = arith.constant 0 : i32
    %c0_i32_1 = arith.constant 0 : i32
    return %arg1, %c0_i32, %c0_i32_0 : i32, i32, i32
  }
  func.func @transform_15(%arg0: i32, %arg1: i32) -> (i32, i32, i32) {
    %c0_i32 = arith.constant 0 : i32
    %c0_i32_0 = arith.constant 0 : i32
    %c0_i32_1 = arith.constant 0 : i32
    return %arg1, %c0_i32, %c0_i32_0 : i32, i32, i32
  }
  func.func @transform_16(%arg0: i32, %arg1: i32) -> (i32, i32, i32) {
    %c0_i32 = arith.constant 0 : i32
    %c0_i32_0 = arith.constant 0 : i32
    %c0_i32_1 = arith.constant 0 : i32
    return %arg0, %c0_i32, %c0_i32_0 : i32, i32, i32
  }
}

module attributes {stable_mosaic.version = 11 : i64} {
  func.func @_decoder_stack_kernel(%arg0: i32, %arg1: i32, %arg2: memref<1x8x32xf32, #tpu.memory_space<vmem>>, %arg3: memref<1x8x128xf32, #tpu.memory_space<vmem>>, %arg4: memref<1x8x8xf32, #tpu.memory_space<vmem>>, %arg5: memref<1x8x8xf32, #tpu.memory_space<vmem>>, %arg6: memref<32x128xf32, #tpu.memory_space<vmem>>, %arg7: memref<1x32x96xf32, #tpu.memory_space<vmem>>, %arg8: memref<1x1x96xf32, #tpu.memory_space<vmem>>, %arg9: memref<1x32x32xf32, #tpu.memory_space<vmem>>, %arg10: memref<1x1x32xf32, #tpu.memory_space<vmem>>, %arg11: memref<1x1x32xf32, #tpu.memory_space<vmem>>, %arg12: memref<1x1x32xf32, #tpu.memory_space<vmem>>, %arg13: memref<1x32x32xf32, #tpu.memory_space<vmem>>, %arg14: memref<1x1x32xf32, #tpu.memory_space<vmem>>, %arg15: memref<1x128x64xf32, #tpu.memory_space<vmem>>, %arg16: memref<1x1x64xf32, #tpu.memory_space<vmem>>, %arg17: memref<1x32x32xf32, #tpu.memory_space<vmem>>, %arg18: memref<1x1x32xf32, #tpu.memory_space<vmem>>, %arg19: memref<1x1x32xf32, #tpu.memory_space<vmem>>, %arg20: memref<1x1x32xf32, #tpu.memory_space<vmem>>, %arg21: memref<1x32x64xf32, #tpu.memory_space<vmem>>, %arg22: memref<1x1x64xf32, #tpu.memory_space<vmem>>, %arg23: memref<1x64x32xf32, #tpu.memory_space<vmem>>, %arg24: memref<1x1x32xf32, #tpu.memory_space<vmem>>, %arg25: memref<1x1x32xf32, #tpu.memory_space<vmem>>, %arg26: memref<1x1x32xf32, #tpu.memory_space<vmem>>, %arg27: memref<1x8x128xf32, #tpu.memory_space<vmem>>, %arg28: memref<8x32xf32, #tpu.memory_space<vmem>>) attributes {dimension_semantics = [#tpu.dimension_semantics<parallel>, #tpu.dimension_semantics<arbitrary>], iteration_bounds = array<i64: 2, 2>, scalar_prefetch = 0 : i64, scratch_operands = 1 : i64, tpu.core_type = #tpu.core_type<tc>, window_params = [{transform_indices = @transform_0, window_bounds = array<i64: 1, 8, 32>}, {transform_indices = @transform_1, window_bounds = array<i64: 1, 8, 128>}, {transform_indices = @transform_2, window_bounds = array<i64: 1, 8, 8>}, {transform_indices = @transform_3, window_bounds = array<i64: 1, 8, 8>}, {pipeline_mode = #tpu.pipeline_mode<synchronous>, transform_indices = @transform_4, window_bounds = array<i64: 32, 128>}, {transform_indices = @transform_5, window_bounds = array<i64: 1, 32, 96>}, {transform_indices = @transform_6, window_bounds = array<i64: 1, 1, 96>}, {transform_indices = @transform_7, window_bounds = array<i64: 1, 32, 32>}, {transform_indices = @transform_8, window_bounds = array<i64: 1, 1, 32>}, {transform_indices = @transform_9, window_bounds = array<i64: 1, 1, 32>}, {transform_indices = @transform_10, window_bounds = array<i64: 1, 1, 32>}, {transform_indices = @transform_11, window_bounds = array<i64: 1, 32, 32>}, {transform_indices = @transform_12, window_bounds = array<i64: 1, 1, 32>}, {transform_indices = @transform_13, window_bounds = array<i64: 1, 128, 64>}, {transform_indices = @transform_14, window_bounds = array<i64: 1, 1, 64>}, {transform_indices = @transform_15, window_bounds = array<i64: 1, 32, 32>}, {transform_indices = @transform_16, window_bounds = array<i64: 1, 1, 32>}, {transform_indices = @transform_17, window_bounds = array<i64: 1, 1, 32>}, {transform_indices = @transform_18, window_bounds = array<i64: 1, 1, 32>}, {transform_indices = @transform_19, window_bounds = array<i64: 1, 32, 64>}, {transform_indices = @transform_20, window_bounds = array<i64: 1, 1, 64>}, {transform_indices = @transform_21, window_bounds = array<i64: 1, 64, 32>}, {transform_indices = @transform_22, window_bounds = array<i64: 1, 1, 32>}, {transform_indices = @transform_23, window_bounds = array<i64: 1, 1, 32>}, {transform_indices = @transform_24, window_bounds = array<i64: 1, 1, 32>}, {transform_indices = @transform_25, window_bounds = array<i64: 1, 8, 128>}]} {
    %c0_i32 = arith.constant 0 : i32
    %0 = arith.cmpi eq, %arg1, %c0_i32 : i32
    %1 = arith.extui %0 : i1 to i32
    %c0_i32_0 = arith.constant 0 : i32
    %2 = arith.cmpi ne, %1, %c0_i32_0 : i32
    scf.if %2 {
      %c0_152 = arith.constant 0 : index
      %c0_153 = arith.constant 0 : index
      %c0_154 = arith.constant 0 : index
      %321 = vector.load %arg2[%c0_152, %c0_153, %c0_154] : memref<1x8x32xf32, #tpu.memory_space<vmem>>, vector<1x8x32xf32>
      %322 = vector.shape_cast %321 : vector<1x8x32xf32> to vector<8x32xf32>
      %c0_155 = arith.constant 0 : index
      %c0_156 = arith.constant 0 : index
      %323 = vector.load %arg28[%c0_155, %c0_156] : memref<8x32xf32, #tpu.memory_space<vmem>>, vector<8x32xf32>
      tpu.vector_store %arg28[%c0_155, %c0_156], %322 {strides = array<i32>} : memref<8x32xf32, #tpu.memory_space<vmem>>, vector<8x32xf32>,
    } else {
    }
    %c0 = arith.constant 0 : index
    %c0_1 = arith.constant 0 : index
    %3 = vector.load %arg28[%c0, %c0_1] : memref<8x32xf32, #tpu.memory_space<vmem>>, vector<8x32xf32>
    %c0_2 = arith.constant 0 : index
    %c0_3 = arith.constant 0 : index
    %c0_4 = arith.constant 0 : index
    %4 = vector.load %arg3[%c0_2, %c0_3, %c0_4] : memref<1x8x128xf32, #tpu.memory_space<vmem>>, vector<1x8x128xf32>
    %5 = vector.shape_cast %4 : vector<1x8x128xf32> to vector<8x128xf32>
    %c0_5 = arith.constant 0 : index
    %c0_6 = arith.constant 0 : index
    %c0_7 = arith.constant 0 : index
    %6 = vector.load %arg4[%c0_5, %c0_6, %c0_7] : memref<1x8x8xf32, #tpu.memory_space<vmem>>, vector<1x8x8xf32>
    %7 = vector.shape_cast %6 : vector<1x8x8xf32> to vector<8x8xf32>
    %c0_8 = arith.constant 0 : index
    %c0_9 = arith.constant 0 : index
    %c0_10 = arith.constant 0 : index
    %8 = vector.load %arg5[%c0_8, %c0_9, %c0_10] : memref<1x8x8xf32, #tpu.memory_space<vmem>>, vector<1x8x8xf32>
    %9 = vector.shape_cast %8 : vector<1x8x8xf32> to vector<8x8xf32>
    %c0_11 = arith.constant 0 : index
    %c0_12 = arith.constant 0 : index
    %c0_13 = arith.constant 0 : index
    %10 = vector.load %arg7[%c0_11, %c0_12, %c0_13] : memref<1x32x96xf32, #tpu.memory_space<vmem>>, vector<1x32x96xf32>
    %11 = vector.shape_cast %10 : vector<1x32x96xf32> to vector<32x96xf32>
    %cst = arith.constant dense<0.000000e+00> : vector<8x96xf32>
    %12 = tpu.matmul %3, %11, %cst {dimension_numbers = #tpu.dot_dimension_numbers<[1], [0], [0], [1], [0, 0, 1, 1], [], []>} : vector<8x32xf32>, vector<32x96xf32>, vector<8x96xf32> -> vector<8x96xf32>
    %c0_14 = arith.constant 0 : index
    %c0_15 = arith.constant 0 : index
    %c0_16 = arith.constant 0 : index
    %13 = vector.load %arg8[%c0_14, %c0_15, %c0_16] : memref<1x1x96xf32, #tpu.memory_space<vmem>>, vector<1x1x96xf32>
    %14 = vector.shape_cast %13 : vector<1x1x96xf32> to vector<1x96xf32>
    %15 = vector.broadcast %14 : vector<1x96xf32> to vector<8x96xf32>
    %16 = arith.addf %12, %15 : vector<8x96xf32>
    %17 = vector.extract_strided_slice %16 {offsets = [0, 0], sizes = [8, 32], strides = [1, 1]} : vector<8x96xf32> to vector<8x32xf32>
    %18 = vector.extract_strided_slice %16 {offsets = [0, 32], sizes = [8, 32], strides = [1, 1]} : vector<8x96xf32> to vector<8x32xf32>
    %19 = vector.extract_strided_slice %16 {offsets = [0, 64], sizes = [8, 32], strides = [1, 1]} : vector<8x96xf32> to vector<8x32xf32>
    %20 = vector.extract_strided_slice %17 {offsets = [0, 0], sizes = [8, 8], strides = [1, 1]} : vector<8x32xf32> to vector<8x8xf32>
    %21 = vector.extract_strided_slice %18 {offsets = [0, 0], sizes = [8, 8], strides = [1, 1]} : vector<8x32xf32> to vector<8x8xf32>
    %22 = vector.extract_strided_slice %19 {offsets = [0, 0], sizes = [8, 8], strides = [1, 1]} : vector<8x32xf32> to vector<8x8xf32>
    %cst_17 = arith.constant dense<0.000000e+00> : vector<8x8xf32>
    %23 = tpu.matmul %20, %21, %cst_17 {dimension_numbers = #tpu.dot_dimension_numbers<[1], [1], [0], [0], [0, 0, 1, 0], [], []>} : vector<8x8xf32>, vector<8x8xf32>, vector<8x8xf32> -> vector<8x8xf32>
    %cst_18 = arith.constant 0.353553385 : f32
    %24 = vector.broadcast %cst_18 : f32 to vector<8x8xf32>
    %25 = arith.mulf %23, %24 : vector<8x8xf32>
    %cst_19 = arith.constant 5.000000e-01 : f32
    %26 = vector.broadcast %cst_19 : f32 to vector<8x8xf32>
    %27 = arith.cmpf ogt, %7, %26 : vector<8x8xf32>
    %cst_20 = arith.constant -1.000000e+09 : f32
    %28 = vector.broadcast %cst_20 : f32 to vector<8x8xf32>
    %29 = arith.select %27, %28, %25 : vector<8x8xi1>, vector<8x8xf32>
    %cst_21 = arith.constant dense<0xFF800000> : vector<8xf32>
    %30 = vector.multi_reduction <maximumf>, %29, %cst_21 [1] : vector<8x8xf32> to vector<8xf32>
    %31 = vector.shape_cast %30 : vector<8xf32> to vector<8x1xf32>
    %32 = vector.broadcast %31 : vector<8x1xf32> to vector<8x8xf32>
    %33 = arith.subf %29, %32 : vector<8x8xf32>
    %34 = math.exp %33 : vector<8x8xf32>
    %cst_22 = arith.constant dense<0.000000e+00> : vector<8xf32>
    %35 = vector.multi_reduction <add>, %34, %cst_22 [1] : vector<8x8xf32> to vector<8xf32>
    %36 = vector.shape_cast %35 : vector<8xf32> to vector<8x1xf32>
    %37 = tpu.reciprocal %36 {approx = true} : vector<8x1xf32> -> vector<8x1xf32>
    %38 = vector.broadcast %37 : vector<8x1xf32> to vector<8x8xf32>
    %39 = arith.mulf %34, %38 : vector<8x8xf32>
    %cst_23 = arith.constant dense<0.000000e+00> : vector<8x8xf32>
    %40 = tpu.matmul %39, %22, %cst_23 {dimension_numbers = #tpu.dot_dimension_numbers<[1], [0], [0], [1], [0, 0, 1, 1], [], []>} : vector<8x8xf32>, vector<8x8xf32>, vector<8x8xf32> -> vector<8x8xf32>
    %41 = vector.extract_strided_slice %17 {offsets = [0, 8], sizes = [8, 8], strides = [1, 1]} : vector<8x32xf32> to vector<8x8xf32>
    %42 = vector.extract_strided_slice %18 {offsets = [0, 8], sizes = [8, 8], strides = [1, 1]} : vector<8x32xf32> to vector<8x8xf32>
    %43 = vector.extract_strided_slice %19 {offsets = [0, 8], sizes = [8, 8], strides = [1, 1]} : vector<8x32xf32> to vector<8x8xf32>
    %cst_24 = arith.constant dense<0.000000e+00> : vector<8x8xf32>
    %44 = tpu.matmul %41, %42, %cst_24 {dimension_numbers = #tpu.dot_dimension_numbers<[1], [1], [0], [0], [0, 0, 1, 0], [], []>} : vector<8x8xf32>, vector<8x8xf32>, vector<8x8xf32> -> vector<8x8xf32>
    %cst_25 = arith.constant 0.353553385 : f32
    %45 = vector.broadcast %cst_25 : f32 to vector<8x8xf32>
    %46 = arith.mulf %44, %45 : vector<8x8xf32>
    %cst_26 = arith.constant 5.000000e-01 : f32
    %47 = vector.broadcast %cst_26 : f32 to vector<8x8xf32>
    %48 = arith.cmpf ogt, %7, %47 : vector<8x8xf32>
    %cst_27 = arith.constant -1.000000e+09 : f32
    %49 = vector.broadcast %cst_27 : f32 to vector<8x8xf32>
    %50 = arith.select %48, %49, %46 : vector<8x8xi1>, vector<8x8xf32>
    %cst_28 = arith.constant dense<0xFF800000> : vector<8xf32>
    %51 = vector.multi_reduction <maximumf>, %50, %cst_28 [1] : vector<8x8xf32> to vector<8xf32>
    %52 = vector.shape_cast %51 : vector<8xf32> to vector<8x1xf32>
    %53 = vector.broadcast %52 : vector<8x1xf32> to vector<8x8xf32>
    %54 = arith.subf %50, %53 : vector<8x8xf32>
    %55 = math.exp %54 : vector<8x8xf32>
    %cst_29 = arith.constant dense<0.000000e+00> : vector<8xf32>
    %56 = vector.multi_reduction <add>, %55, %cst_29 [1] : vector<8x8xf32> to vector<8xf32>
    %57 = vector.shape_cast %56 : vector<8xf32> to vector<8x1xf32>
    %58 = tpu.reciprocal %57 {approx = true} : vector<8x1xf32> -> vector<8x1xf32>
    %59 = vector.broadcast %58 : vector<8x1xf32> to vector<8x8xf32>
    %60 = arith.mulf %55, %59 : vector<8x8xf32>
    %cst_30 = arith.constant dense<0.000000e+00> : vector<8x8xf32>
    %61 = tpu.matmul %60, %43, %cst_30 {dimension_numbers = #tpu.dot_dimension_numbers<[1], [0], [0], [1], [0, 0, 1, 1], [], []>} : vector<8x8xf32>, vector<8x8xf32>, vector<8x8xf32> -> vector<8x8xf32>
    %62 = vector.extract_strided_slice %17 {offsets = [0, 16], sizes = [8, 8], strides = [1, 1]} : vector<8x32xf32> to vector<8x8xf32>
    %63 = vector.extract_strided_slice %18 {offsets = [0, 16], sizes = [8, 8], strides = [1, 1]} : vector<8x32xf32> to vector<8x8xf32>
    %64 = vector.extract_strided_slice %19 {offsets = [0, 16], sizes = [8, 8], strides = [1, 1]} : vector<8x32xf32> to vector<8x8xf32>
    %cst_31 = arith.constant dense<0.000000e+00> : vector<8x8xf32>
    %65 = tpu.matmul %62, %63, %cst_31 {dimension_numbers = #tpu.dot_dimension_numbers<[1], [1], [0], [0], [0, 0, 1, 0], [], []>} : vector<8x8xf32>, vector<8x8xf32>, vector<8x8xf32> -> vector<8x8xf32>
    %cst_32 = arith.constant 0.353553385 : f32
    %66 = vector.broadcast %cst_32 : f32 to vector<8x8xf32>
    %67 = arith.mulf %65, %66 : vector<8x8xf32>
    %cst_33 = arith.constant 5.000000e-01 : f32
    %68 = vector.broadcast %cst_33 : f32 to vector<8x8xf32>
    %69 = arith.cmpf ogt, %7, %68 : vector<8x8xf32>
    %cst_34 = arith.constant -1.000000e+09 : f32
    %70 = vector.broadcast %cst_34 : f32 to vector<8x8xf32>
    %71 = arith.select %69, %70, %67 : vector<8x8xi1>, vector<8x8xf32>
    %cst_35 = arith.constant dense<0xFF800000> : vector<8xf32>
    %72 = vector.multi_reduction <maximumf>, %71, %cst_35 [1] : vector<8x8xf32> to vector<8xf32>
    %73 = vector.shape_cast %72 : vector<8xf32> to vector<8x1xf32>
    %74 = vector.broadcast %73 : vector<8x1xf32> to vector<8x8xf32>
    %75 = arith.subf %71, %74 : vector<8x8xf32>
    %76 = math.exp %75 : vector<8x8xf32>
    %cst_36 = arith.constant dense<0.000000e+00> : vector<8xf32>
    %77 = vector.multi_reduction <add>, %76, %cst_36 [1] : vector<8x8xf32> to vector<8xf32>
    %78 = vector.shape_cast %77 : vector<8xf32> to vector<8x1xf32>
    %79 = tpu.reciprocal %78 {approx = true} : vector<8x1xf32> -> vector<8x1xf32>
    %80 = vector.broadcast %79 : vector<8x1xf32> to vector<8x8xf32>
    %81 = arith.mulf %76, %80 : vector<8x8xf32>
    %cst_37 = arith.constant dense<0.000000e+00> : vector<8x8xf32>
    %82 = tpu.matmul %81, %64, %cst_37 {dimension_numbers = #tpu.dot_dimension_numbers<[1], [0], [0], [1], [0, 0, 1, 1], [], []>} : vector<8x8xf32>, vector<8x8xf32>, vector<8x8xf32> -> vector<8x8xf32>
    %83 = vector.extract_strided_slice %17 {offsets = [0, 24], sizes = [8, 8], strides = [1, 1]} : vector<8x32xf32> to vector<8x8xf32>
    %84 = vector.extract_strided_slice %18 {offsets = [0, 24], sizes = [8, 8], strides = [1, 1]} : vector<8x32xf32> to vector<8x8xf32>
    %85 = vector.extract_strided_slice %19 {offsets = [0, 24], sizes = [8, 8], strides = [1, 1]} : vector<8x32xf32> to vector<8x8xf32>
    %cst_38 = arith.constant dense<0.000000e+00> : vector<8x8xf32>
    %86 = tpu.matmul %83, %84, %cst_38 {dimension_numbers = #tpu.dot_dimension_numbers<[1], [1], [0], [0], [0, 0, 1, 0], [], []>} : vector<8x8xf32>, vector<8x8xf32>, vector<8x8xf32> -> vector<8x8xf32>
    %cst_39 = arith.constant 0.353553385 : f32
    %87 = vector.broadcast %cst_39 : f32 to vector<8x8xf32>
    %88 = arith.mulf %86, %87 : vector<8x8xf32>
    %cst_40 = arith.constant 5.000000e-01 : f32
    %89 = vector.broadcast %cst_40 : f32 to vector<8x8xf32>
    %90 = arith.cmpf ogt, %7, %89 : vector<8x8xf32>
    %cst_41 = arith.constant -1.000000e+09 : f32
    %91 = vector.broadcast %cst_41 : f32 to vector<8x8xf32>
    %92 = arith.select %90, %91, %88 : vector<8x8xi1>, vector<8x8xf32>
    %cst_42 = arith.constant dense<0xFF800000> : vector<8xf32>
    %93 = vector.multi_reduction <maximumf>, %92, %cst_42 [1] : vector<8x8xf32> to vector<8xf32>
    %94 = vector.shape_cast %93 : vector<8xf32> to vector<8x1xf32>
    %95 = vector.broadcast %94 : vector<8x1xf32> to vector<8x8xf32>
    %96 = arith.subf %92, %95 : vector<8x8xf32>
    %97 = math.exp %96 : vector<8x8xf32>
    %cst_43 = arith.constant dense<0.000000e+00> : vector<8xf32>
    %98 = vector.multi_reduction <add>, %97, %cst_43 [1] : vector<8x8xf32> to vector<8xf32>
    %99 = vector.shape_cast %98 : vector<8xf32> to vector<8x1xf32>
    %100 = tpu.reciprocal %99 {approx = true} : vector<8x1xf32> -> vector<8x1xf32>
    %101 = vector.broadcast %100 : vector<8x1xf32> to vector<8x8xf32>
    %102 = arith.mulf %97, %101 : vector<8x8xf32>
    %cst_44 = arith.constant dense<0.000000e+00> : vector<8x8xf32>
    %103 = tpu.matmul %102, %85, %cst_44 {dimension_numbers = #tpu.dot_dimension_numbers<[1], [0], [0], [1], [0, 0, 1, 1], [], []>} : vector<8x8xf32>, vector<8x8xf32>, vector<8x8xf32> -> vector<8x8xf32>
    %104 = tpu.concatenate %40, %61, %82, %103 in 1 : vector<8x8xf32>, vector<8x8xf32>, vector<8x8xf32>, vector<8x8xf32> -> vector<8x32xf32>
    %c0_45 = arith.constant 0 : index
    %c0_46 = arith.constant 0 : index
    %c0_47 = arith.constant 0 : index
    %105 = vector.load %arg9[%c0_45, %c0_46, %c0_47] : memref<1x32x32xf32, #tpu.memory_space<vmem>>, vector<1x32x32xf32>
    %106 = vector.shape_cast %105 : vector<1x32x32xf32> to vector<32x32xf32>
    %cst_48 = arith.constant dense<0.000000e+00> : vector<8x32xf32>
    %107 = tpu.matmul %104, %106, %cst_48 {dimension_numbers = #tpu.dot_dimension_numbers<[1], [0], [0], [1], [0, 0, 1, 1], [], []>} : vector<8x32xf32>, vector<32x32xf32>, vector<8x32xf32> -> vector<8x32xf32>
    %c0_49 = arith.constant 0 : index
    %c0_50 = arith.constant 0 : index
    %c0_51 = arith.constant 0 : index
    %108 = vector.load %arg10[%c0_49, %c0_50, %c0_51] : memref<1x1x32xf32, #tpu.memory_space<vmem>>, vector<1x1x32xf32>
    %109 = vector.shape_cast %108 : vector<1x1x32xf32> to vector<1x32xf32>
    %110 = vector.broadcast %109 : vector<1x32xf32> to vector<8x32xf32>
    %111 = arith.addf %107, %110 : vector<8x32xf32>
    %112 = arith.addf %111, %3 : vector<8x32xf32>
    %c0_52 = arith.constant 0 : index
    %c0_53 = arith.constant 0 : index
    %c0_54 = arith.constant 0 : index
    %113 = vector.load %arg11[%c0_52, %c0_53, %c0_54] : memref<1x1x32xf32, #tpu.memory_space<vmem>>, vector<1x1x32xf32>
    %114 = vector.shape_cast %113 : vector<1x1x32xf32> to vector<1x32xf32>
    %c0_55 = arith.constant 0 : index
    %c0_56 = arith.constant 0 : index
    %c0_57 = arith.constant 0 : index
    %115 = vector.load %arg12[%c0_55, %c0_56, %c0_57] : memref<1x1x32xf32, #tpu.memory_space<vmem>>, vector<1x1x32xf32>
    %116 = vector.shape_cast %115 : vector<1x1x32xf32> to vector<1x32xf32>
    %cst_58 = arith.constant dense<0.000000e+00> : vector<8xf32>
    %117 = vector.multi_reduction <add>, %112, %cst_58 [1] : vector<8x32xf32> to vector<8xf32>
    %118 = vector.shape_cast %117 : vector<8xf32> to vector<8x1xf32>
    %cst_59 = arith.constant 3.200000e+01 : f32
    %119 = vector.broadcast %cst_59 : f32 to vector<8x1xf32>
    %120 = arith.divf %118, %119 : vector<8x1xf32>
    %121 = vector.broadcast %120 : vector<8x1xf32> to vector<8x32xf32>
    %122 = arith.subf %112, %121 : vector<8x32xf32>
    %123 = arith.mulf %122, %122 : vector<8x32xf32>
    %cst_60 = arith.constant dense<0.000000e+00> : vector<8xf32>
    %124 = vector.multi_reduction <add>, %123, %cst_60 [1] : vector<8x32xf32> to vector<8xf32>
    %125 = vector.shape_cast %124 : vector<8xf32> to vector<8x1xf32>
    %cst_61 = arith.constant 3.200000e+01 : f32
    %126 = vector.broadcast %cst_61 : f32 to vector<8x1xf32>
    %127 = arith.divf %125, %126 : vector<8x1xf32>
    %128 = vector.broadcast %120 : vector<8x1xf32> to vector<8x32xf32>
    %129 = arith.subf %112, %128 : vector<8x32xf32>
    %cst_62 = arith.constant 9.99999974E-6 : f32
    %130 = vector.broadcast %cst_62 : f32 to vector<8x1xf32>
    %131 = arith.addf %127, %130 : vector<8x1xf32>
    %132 = math.rsqrt %131 : vector<8x1xf32>
    %133 = vector.broadcast %132 : vector<8x1xf32> to vector<8x32xf32>
    %134 = arith.mulf %129, %133 : vector<8x32xf32>
    %135 = vector.broadcast %114 : vector<1x32xf32> to vector<8x32xf32>
    %136 = arith.mulf %134, %135 : vector<8x32xf32>
    %137 = vector.broadcast %116 : vector<1x32xf32> to vector<8x32xf32>
    %138 = arith.addf %136, %137 : vector<8x32xf32>
    %c0_63 = arith.constant 0 : index
    %c0_64 = arith.constant 0 : index
    %c0_65 = arith.constant 0 : index
    %139 = vector.load %arg13[%c0_63, %c0_64, %c0_65] : memref<1x32x32xf32, #tpu.memory_space<vmem>>, vector<1x32x32xf32>
    %140 = vector.shape_cast %139 : vector<1x32x32xf32> to vector<32x32xf32>
    %cst_66 = arith.constant dense<0.000000e+00> : vector<8x32xf32>
    %141 = tpu.matmul %138, %140, %cst_66 {dimension_numbers = #tpu.dot_dimension_numbers<[1], [0], [0], [1], [0, 0, 1, 1], [], []>} : vector<8x32xf32>, vector<32x32xf32>, vector<8x32xf32> -> vector<8x32xf32>
    %c0_67 = arith.constant 0 : index
    %c0_68 = arith.constant 0 : index
    %c0_69 = arith.constant 0 : index
    %142 = vector.load %arg14[%c0_67, %c0_68, %c0_69] : memref<1x1x32xf32, #tpu.memory_space<vmem>>, vector<1x1x32xf32>
    %143 = vector.shape_cast %142 : vector<1x1x32xf32> to vector<1x32xf32>
    %144 = vector.broadcast %143 : vector<1x32xf32> to vector<8x32xf32>
    %145 = arith.addf %141, %144 : vector<8x32xf32>
    %c0_70 = arith.constant 0 : index
    %c0_71 = arith.constant 0 : index
    %c0_72 = arith.constant 0 : index
    %146 = vector.load %arg15[%c0_70, %c0_71, %c0_72] : memref<1x128x64xf32, #tpu.memory_space<vmem>>, vector<1x128x64xf32>
    %147 = vector.shape_cast %146 : vector<1x128x64xf32> to vector<128x64xf32>
    %cst_73 = arith.constant dense<0.000000e+00> : vector<8x64xf32>
    %148 = tpu.matmul %5, %147, %cst_73 {dimension_numbers = #tpu.dot_dimension_numbers<[1], [0], [0], [1], [0, 0, 1, 1], [], []>} : vector<8x128xf32>, vector<128x64xf32>, vector<8x64xf32> -> vector<8x64xf32>
    %c0_74 = arith.constant 0 : index
    %c0_75 = arith.constant 0 : index
    %c0_76 = arith.constant 0 : index
    %149 = vector.load %arg16[%c0_74, %c0_75, %c0_76] : memref<1x1x64xf32, #tpu.memory_space<vmem>>, vector<1x1x64xf32>
    %150 = vector.shape_cast %149 : vector<1x1x64xf32> to vector<1x64xf32>
    %151 = vector.broadcast %150 : vector<1x64xf32> to vector<8x64xf32>
    %152 = arith.addf %148, %151 : vector<8x64xf32>
    %153 = vector.extract_strided_slice %152 {offsets = [0, 0], sizes = [8, 32], strides = [1, 1]} : vector<8x64xf32> to vector<8x32xf32>
    %154 = vector.extract_strided_slice %152 {offsets = [0, 32], sizes = [8, 32], strides = [1, 1]} : vector<8x64xf32> to vector<8x32xf32>
    %155 = vector.extract_strided_slice %145 {offsets = [0, 0], sizes = [8, 8], strides = [1, 1]} : vector<8x32xf32> to vector<8x8xf32>
    %156 = vector.extract_strided_slice %153 {offsets = [0, 0], sizes = [8, 8], strides = [1, 1]} : vector<8x32xf32> to vector<8x8xf32>
    %157 = vector.extract_strided_slice %154 {offsets = [0, 0], sizes = [8, 8], strides = [1, 1]} : vector<8x32xf32> to vector<8x8xf32>
    %cst_77 = arith.constant dense<0.000000e+00> : vector<8x8xf32>
    %158 = tpu.matmul %155, %156, %cst_77 {dimension_numbers = #tpu.dot_dimension_numbers<[1], [1], [0], [0], [0, 0, 1, 0], [], []>} : vector<8x8xf32>, vector<8x8xf32>, vector<8x8xf32> -> vector<8x8xf32>
    %cst_78 = arith.constant 0.353553385 : f32
    %159 = vector.broadcast %cst_78 : f32 to vector<8x8xf32>
    %160 = arith.mulf %158, %159 : vector<8x8xf32>
    %cst_79 = arith.constant 5.000000e-01 : f32
    %161 = vector.broadcast %cst_79 : f32 to vector<8x8xf32>
    %162 = arith.cmpf ogt, %9, %161 : vector<8x8xf32>
    %cst_80 = arith.constant -1.000000e+09 : f32
    %163 = vector.broadcast %cst_80 : f32 to vector<8x8xf32>
    %164 = arith.select %162, %163, %160 : vector<8x8xi1>, vector<8x8xf32>
    %cst_81 = arith.constant dense<0xFF800000> : vector<8xf32>
    %165 = vector.multi_reduction <maximumf>, %164, %cst_81 [1] : vector<8x8xf32> to vector<8xf32>
    %166 = vector.shape_cast %165 : vector<8xf32> to vector<8x1xf32>
    %167 = vector.broadcast %166 : vector<8x1xf32> to vector<8x8xf32>
    %168 = arith.subf %164, %167 : vector<8x8xf32>
    %169 = math.exp %168 : vector<8x8xf32>
    %cst_82 = arith.constant dense<0.000000e+00> : vector<8xf32>
    %170 = vector.multi_reduction <add>, %169, %cst_82 [1] : vector<8x8xf32> to vector<8xf32>
    %171 = vector.shape_cast %170 : vector<8xf32> to vector<8x1xf32>
    %172 = tpu.reciprocal %171 {approx = true} : vector<8x1xf32> -> vector<8x1xf32>
    %173 = vector.broadcast %172 : vector<8x1xf32> to vector<8x8xf32>
    %174 = arith.mulf %169, %173 : vector<8x8xf32>
    %cst_83 = arith.constant dense<0.000000e+00> : vector<8x8xf32>
    %175 = tpu.matmul %174, %157, %cst_83 {dimension_numbers = #tpu.dot_dimension_numbers<[1], [0], [0], [1], [0, 0, 1, 1], [], []>} : vector<8x8xf32>, vector<8x8xf32>, vector<8x8xf32> -> vector<8x8xf32>
    %176 = vector.extract_strided_slice %145 {offsets = [0, 8], sizes = [8, 8], strides = [1, 1]} : vector<8x32xf32> to vector<8x8xf32>
    %177 = vector.extract_strided_slice %153 {offsets = [0, 8], sizes = [8, 8], strides = [1, 1]} : vector<8x32xf32> to vector<8x8xf32>
    %178 = vector.extract_strided_slice %154 {offsets = [0, 8], sizes = [8, 8], strides = [1, 1]} : vector<8x32xf32> to vector<8x8xf32>
    %cst_84 = arith.constant dense<0.000000e+00> : vector<8x8xf32>
    %179 = tpu.matmul %176, %177, %cst_84 {dimension_numbers = #tpu.dot_dimension_numbers<[1], [1], [0], [0], [0, 0, 1, 0], [], []>} : vector<8x8xf32>, vector<8x8xf32>, vector<8x8xf32> -> vector<8x8xf32>
    %cst_85 = arith.constant 0.353553385 : f32
    %180 = vector.broadcast %cst_85 : f32 to vector<8x8xf32>
    %181 = arith.mulf %179, %180 : vector<8x8xf32>
    %cst_86 = arith.constant 5.000000e-01 : f32
    %182 = vector.broadcast %cst_86 : f32 to vector<8x8xf32>
    %183 = arith.cmpf ogt, %9, %182 : vector<8x8xf32>
    %cst_87 = arith.constant -1.000000e+09 : f32
    %184 = vector.broadcast %cst_87 : f32 to vector<8x8xf32>
    %185 = arith.select %183, %184, %181 : vector<8x8xi1>, vector<8x8xf32>
    %cst_88 = arith.constant dense<0xFF800000> : vector<8xf32>
    %186 = vector.multi_reduction <maximumf>, %185, %cst_88 [1] : vector<8x8xf32> to vector<8xf32>
    %187 = vector.shape_cast %186 : vector<8xf32> to vector<8x1xf32>
    %188 = vector.broadcast %187 : vector<8x1xf32> to vector<8x8xf32>
    %189 = arith.subf %185, %188 : vector<8x8xf32>
    %190 = math.exp %189 : vector<8x8xf32>
    %cst_89 = arith.constant dense<0.000000e+00> : vector<8xf32>
    %191 = vector.multi_reduction <add>, %190, %cst_89 [1] : vector<8x8xf32> to vector<8xf32>
    %192 = vector.shape_cast %191 : vector<8xf32> to vector<8x1xf32>
    %193 = tpu.reciprocal %192 {approx = true} : vector<8x1xf32> -> vector<8x1xf32>
    %194 = vector.broadcast %193 : vector<8x1xf32> to vector<8x8xf32>
    %195 = arith.mulf %190, %194 : vector<8x8xf32>
    %cst_90 = arith.constant dense<0.000000e+00> : vector<8x8xf32>
    %196 = tpu.matmul %195, %178, %cst_90 {dimension_numbers = #tpu.dot_dimension_numbers<[1], [0], [0], [1], [0, 0, 1, 1], [], []>} : vector<8x8xf32>, vector<8x8xf32>, vector<8x8xf32> -> vector<8x8xf32>
    %197 = vector.extract_strided_slice %145 {offsets = [0, 16], sizes = [8, 8], strides = [1, 1]} : vector<8x32xf32> to vector<8x8xf32>
    %198 = vector.extract_strided_slice %153 {offsets = [0, 16], sizes = [8, 8], strides = [1, 1]} : vector<8x32xf32> to vector<8x8xf32>
    %199 = vector.extract_strided_slice %154 {offsets = [0, 16], sizes = [8, 8], strides = [1, 1]} : vector<8x32xf32> to vector<8x8xf32>
    %cst_91 = arith.constant dense<0.000000e+00> : vector<8x8xf32>
    %200 = tpu.matmul %197, %198, %cst_91 {dimension_numbers = #tpu.dot_dimension_numbers<[1], [1], [0], [0], [0, 0, 1, 0], [], []>} : vector<8x8xf32>, vector<8x8xf32>, vector<8x8xf32> -> vector<8x8xf32>
    %cst_92 = arith.constant 0.353553385 : f32
    %201 = vector.broadcast %cst_92 : f32 to vector<8x8xf32>
    %202 = arith.mulf %200, %201 : vector<8x8xf32>
    %cst_93 = arith.constant 5.000000e-01 : f32
    %203 = vector.broadcast %cst_93 : f32 to vector<8x8xf32>
    %204 = arith.cmpf ogt, %9, %203 : vector<8x8xf32>
    %cst_94 = arith.constant -1.000000e+09 : f32
    %205 = vector.broadcast %cst_94 : f32 to vector<8x8xf32>
    %206 = arith.select %204, %205, %202 : vector<8x8xi1>, vector<8x8xf32>
    %cst_95 = arith.constant dense<0xFF800000> : vector<8xf32>
    %207 = vector.multi_reduction <maximumf>, %206, %cst_95 [1] : vector<8x8xf32> to vector<8xf32>
    %208 = vector.shape_cast %207 : vector<8xf32> to vector<8x1xf32>
    %209 = vector.broadcast %208 : vector<8x1xf32> to vector<8x8xf32>
    %210 = arith.subf %206, %209 : vector<8x8xf32>
    %211 = math.exp %210 : vector<8x8xf32>
    %cst_96 = arith.constant dense<0.000000e+00> : vector<8xf32>
    %212 = vector.multi_reduction <add>, %211, %cst_96 [1] : vector<8x8xf32> to vector<8xf32>
    %213 = vector.shape_cast %212 : vector<8xf32> to vector<8x1xf32>
    %214 = tpu.reciprocal %213 {approx = true} : vector<8x1xf32> -> vector<8x1xf32>
    %215 = vector.broadcast %214 : vector<8x1xf32> to vector<8x8xf32>
    %216 = arith.mulf %211, %215 : vector<8x8xf32>
    %cst_97 = arith.constant dense<0.000000e+00> : vector<8x8xf32>
    %217 = tpu.matmul %216, %199, %cst_97 {dimension_numbers = #tpu.dot_dimension_numbers<[1], [0], [0], [1], [0, 0, 1, 1], [], []>} : vector<8x8xf32>, vector<8x8xf32>, vector<8x8xf32> -> vector<8x8xf32>
    %218 = vector.extract_strided_slice %145 {offsets = [0, 24], sizes = [8, 8], strides = [1, 1]} : vector<8x32xf32> to vector<8x8xf32>
    %219 = vector.extract_strided_slice %153 {offsets = [0, 24], sizes = [8, 8], strides = [1, 1]} : vector<8x32xf32> to vector<8x8xf32>
    %220 = vector.extract_strided_slice %154 {offsets = [0, 24], sizes = [8, 8], strides = [1, 1]} : vector<8x32xf32> to vector<8x8xf32>
    %cst_98 = arith.constant dense<0.000000e+00> : vector<8x8xf32>
    %221 = tpu.matmul %218, %219, %cst_98 {dimension_numbers = #tpu.dot_dimension_numbers<[1], [1], [0], [0], [0, 0, 1, 0], [], []>} : vector<8x8xf32>, vector<8x8xf32>, vector<8x8xf32> -> vector<8x8xf32>
    %cst_99 = arith.constant 0.353553385 : f32
    %222 = vector.broadcast %cst_99 : f32 to vector<8x8xf32>
    %223 = arith.mulf %221, %222 : vector<8x8xf32>
    %cst_100 = arith.constant 5.000000e-01 : f32
    %224 = vector.broadcast %cst_100 : f32 to vector<8x8xf32>
    %225 = arith.cmpf ogt, %9, %224 : vector<8x8xf32>
    %cst_101 = arith.constant -1.000000e+09 : f32
    %226 = vector.broadcast %cst_101 : f32 to vector<8x8xf32>
    %227 = arith.select %225, %226, %223 : vector<8x8xi1>, vector<8x8xf32>
    %cst_102 = arith.constant dense<0xFF800000> : vector<8xf32>
    %228 = vector.multi_reduction <maximumf>, %227, %cst_102 [1] : vector<8x8xf32> to vector<8xf32>
    %229 = vector.shape_cast %228 : vector<8xf32> to vector<8x1xf32>
    %230 = vector.broadcast %229 : vector<8x1xf32> to vector<8x8xf32>
    %231 = arith.subf %227, %230 : vector<8x8xf32>
    %232 = math.exp %231 : vector<8x8xf32>
    %cst_103 = arith.constant dense<0.000000e+00> : vector<8xf32>
    %233 = vector.multi_reduction <add>, %232, %cst_103 [1] : vector<8x8xf32> to vector<8xf32>
    %234 = vector.shape_cast %233 : vector<8xf32> to vector<8x1xf32>
    %235 = tpu.reciprocal %234 {approx = true} : vector<8x1xf32> -> vector<8x1xf32>
    %236 = vector.broadcast %235 : vector<8x1xf32> to vector<8x8xf32>
    %237 = arith.mulf %232, %236 : vector<8x8xf32>
    %cst_104 = arith.constant dense<0.000000e+00> : vector<8x8xf32>
    %238 = tpu.matmul %237, %220, %cst_104 {dimension_numbers = #tpu.dot_dimension_numbers<[1], [0], [0], [1], [0, 0, 1, 1], [], []>} : vector<8x8xf32>, vector<8x8xf32>, vector<8x8xf32> -> vector<8x8xf32>
    %239 = tpu.concatenate %175, %196, %217, %238 in 1 : vector<8x8xf32>, vector<8x8xf32>, vector<8x8xf32>, vector<8x8xf32> -> vector<8x32xf32>
    %c0_105 = arith.constant 0 : index
    %c0_106 = arith.constant 0 : index
    %c0_107 = arith.constant 0 : index
    %240 = vector.load %arg17[%c0_105, %c0_106, %c0_107] : memref<1x32x32xf32, #tpu.memory_space<vmem>>, vector<1x32x32xf32>
    %241 = vector.shape_cast %240 : vector<1x32x32xf32> to vector<32x32xf32>
    %cst_108 = arith.constant dense<0.000000e+00> : vector<8x32xf32>
    %242 = tpu.matmul %239, %241, %cst_108 {dimension_numbers = #tpu.dot_dimension_numbers<[1], [0], [0], [1], [0, 0, 1, 1], [], []>} : vector<8x32xf32>, vector<32x32xf32>, vector<8x32xf32> -> vector<8x32xf32>
    %c0_109 = arith.constant 0 : index
    %c0_110 = arith.constant 0 : index
    %c0_111 = arith.constant 0 : index
    %243 = vector.load %arg18[%c0_109, %c0_110, %c0_111] : memref<1x1x32xf32, #tpu.memory_space<vmem>>, vector<1x1x32xf32>
    %244 = vector.shape_cast %243 : vector<1x1x32xf32> to vector<1x32xf32>
    %245 = vector.broadcast %244 : vector<1x32xf32> to vector<8x32xf32>
    %246 = arith.addf %242, %245 : vector<8x32xf32>
    %247 = arith.addf %246, %138 : vector<8x32xf32>
    %c0_112 = arith.constant 0 : index
    %c0_113 = arith.constant 0 : index
    %c0_114 = arith.constant 0 : index
    %248 = vector.load %arg19[%c0_112, %c0_113, %c0_114] : memref<1x1x32xf32, #tpu.memory_space<vmem>>, vector<1x1x32xf32>
    %249 = vector.shape_cast %248 : vector<1x1x32xf32> to vector<1x32xf32>
    %c0_115 = arith.constant 0 : index
    %c0_116 = arith.constant 0 : index
    %c0_117 = arith.constant 0 : index
    %250 = vector.load %arg20[%c0_115, %c0_116, %c0_117] : memref<1x1x32xf32, #tpu.memory_space<vmem>>, vector<1x1x32xf32>
    %251 = vector.shape_cast %250 : vector<1x1x32xf32> to vector<1x32xf32>
    %cst_118 = arith.constant dense<0.000000e+00> : vector<8xf32>
    %252 = vector.multi_reduction <add>, %247, %cst_118 [1] : vector<8x32xf32> to vector<8xf32>
    %253 = vector.shape_cast %252 : vector<8xf32> to vector<8x1xf32>
    %cst_119 = arith.constant 3.200000e+01 : f32
    %254 = vector.broadcast %cst_119 : f32 to vector<8x1xf32>
    %255 = arith.divf %253, %254 : vector<8x1xf32>
    %256 = vector.broadcast %255 : vector<8x1xf32> to vector<8x32xf32>
    %257 = arith.subf %247, %256 : vector<8x32xf32>
    %258 = arith.mulf %257, %257 : vector<8x32xf32>
    %cst_120 = arith.constant dense<0.000000e+00> : vector<8xf32>
    %259 = vector.multi_reduction <add>, %258, %cst_120 [1] : vector<8x32xf32> to vector<8xf32>
    %260 = vector.shape_cast %259 : vector<8xf32> to vector<8x1xf32>
    %cst_121 = arith.constant 3.200000e+01 : f32
    %261 = vector.broadcast %cst_121 : f32 to vector<8x1xf32>
    %262 = arith.divf %260, %261 : vector<8x1xf32>
    %263 = vector.broadcast %255 : vector<8x1xf32> to vector<8x32xf32>
    %264 = arith.subf %247, %263 : vector<8x32xf32>
    %cst_122 = arith.constant 9.99999974E-6 : f32
    %265 = vector.broadcast %cst_122 : f32 to vector<8x1xf32>
    %266 = arith.addf %262, %265 : vector<8x1xf32>
    %267 = math.rsqrt %266 : vector<8x1xf32>
    %268 = vector.broadcast %267 : vector<8x1xf32> to vector<8x32xf32>
    %269 = arith.mulf %264, %268 : vector<8x32xf32>
    %270 = vector.broadcast %249 : vector<1x32xf32> to vector<8x32xf32>
    %271 = arith.mulf %269, %270 : vector<8x32xf32>
    %272 = vector.broadcast %251 : vector<1x32xf32> to vector<8x32xf32>
    %273 = arith.addf %271, %272 : vector<8x32xf32>
    %c0_123 = arith.constant 0 : index
    %c0_124 = arith.constant 0 : index
    %c0_125 = arith.constant 0 : index
    %274 = vector.load %arg21[%c0_123, %c0_124, %c0_125] : memref<1x32x64xf32, #tpu.memory_space<vmem>>, vector<1x32x64xf32>
    %275 = vector.shape_cast %274 : vector<1x32x64xf32> to vector<32x64xf32>
    %cst_126 = arith.constant dense<0.000000e+00> : vector<8x64xf32>
    %276 = tpu.matmul %273, %275, %cst_126 {dimension_numbers = #tpu.dot_dimension_numbers<[1], [0], [0], [1], [0, 0, 1, 1], [], []>} : vector<8x32xf32>, vector<32x64xf32>, vector<8x64xf32> -> vector<8x64xf32>
    %c0_127 = arith.constant 0 : index
    %c0_128 = arith.constant 0 : index
    %c0_129 = arith.constant 0 : index
    %277 = vector.load %arg22[%c0_127, %c0_128, %c0_129] : memref<1x1x64xf32, #tpu.memory_space<vmem>>, vector<1x1x64xf32>
    %278 = vector.shape_cast %277 : vector<1x1x64xf32> to vector<1x64xf32>
    %279 = vector.broadcast %278 : vector<1x64xf32> to vector<8x64xf32>
    %280 = arith.addf %276, %279 : vector<8x64xf32>
    %cst_130 = arith.constant 0.000000e+00 : f32
    %281 = vector.broadcast %cst_130 : f32 to vector<8x64xf32>
    %282 = arith.maximumf %280, %281 : vector<8x64xf32>
    %c0_131 = arith.constant 0 : index
    %c0_132 = arith.constant 0 : index
    %c0_133 = arith.constant 0 : index
    %283 = vector.load %arg23[%c0_131, %c0_132, %c0_133] : memref<1x64x32xf32, #tpu.memory_space<vmem>>, vector<1x64x32xf32>
    %284 = vector.shape_cast %283 : vector<1x64x32xf32> to vector<64x32xf32>
    %cst_134 = arith.constant dense<0.000000e+00> : vector<8x32xf32>
    %285 = tpu.matmul %282, %284, %cst_134 {dimension_numbers = #tpu.dot_dimension_numbers<[1], [0], [0], [1], [0, 0, 1, 1], [], []>} : vector<8x64xf32>, vector<64x32xf32>, vector<8x32xf32> -> vector<8x32xf32>
    %c0_135 = arith.constant 0 : index
    %c0_136 = arith.constant 0 : index
    %c0_137 = arith.constant 0 : index
    %286 = vector.load %arg24[%c0_135, %c0_136, %c0_137] : memref<1x1x32xf32, #tpu.memory_space<vmem>>, vector<1x1x32xf32>
    %287 = vector.shape_cast %286 : vector<1x1x32xf32> to vector<1x32xf32>
    %288 = vector.broadcast %287 : vector<1x32xf32> to vector<8x32xf32>
    %289 = arith.addf %285, %288 : vector<8x32xf32>
    %290 = arith.addf %289, %273 : vector<8x32xf32>
    %c0_138 = arith.constant 0 : index
    %c0_139 = arith.constant 0 : index
    %c0_140 = arith.constant 0 : index
    %291 = vector.load %arg25[%c0_138, %c0_139, %c0_140] : memref<1x1x32xf32, #tpu.memory_space<vmem>>, vector<1x1x32xf32>
    %292 = vector.shape_cast %291 : vector<1x1x32xf32> to vector<1x32xf32>
    %c0_141 = arith.constant 0 : index
    %c0_142 = arith.constant 0 : index
    %c0_143 = arith.constant 0 : index
    %293 = vector.load %arg26[%c0_141, %c0_142, %c0_143] : memref<1x1x32xf32, #tpu.memory_space<vmem>>, vector<1x1x32xf32>
    %294 = vector.shape_cast %293 : vector<1x1x32xf32> to vector<1x32xf32>
    %cst_144 = arith.constant dense<0.000000e+00> : vector<8xf32>
    %295 = vector.multi_reduction <add>, %290, %cst_144 [1] : vector<8x32xf32> to vector<8xf32>
    %296 = vector.shape_cast %295 : vector<8xf32> to vector<8x1xf32>
    %cst_145 = arith.constant 3.200000e+01 : f32
    %297 = vector.broadcast %cst_145 : f32 to vector<8x1xf32>
    %298 = arith.divf %296, %297 : vector<8x1xf32>
    %299 = vector.broadcast %298 : vector<8x1xf32> to vector<8x32xf32>
    %300 = arith.subf %290, %299 : vector<8x32xf32>
    %301 = arith.mulf %300, %300 : vector<8x32xf32>
    %cst_146 = arith.constant dense<0.000000e+00> : vector<8xf32>
    %302 = vector.multi_reduction <add>, %301, %cst_146 [1] : vector<8x32xf32> to vector<8xf32>
    %303 = vector.shape_cast %302 : vector<8xf32> to vector<8x1xf32>
    %cst_147 = arith.constant 3.200000e+01 : f32
    %304 = vector.broadcast %cst_147 : f32 to vector<8x1xf32>
    %305 = arith.divf %303, %304 : vector<8x1xf32>
    %306 = vector.broadcast %298 : vector<8x1xf32> to vector<8x32xf32>
    %307 = arith.subf %290, %306 : vector<8x32xf32>
    %cst_148 = arith.constant 9.99999974E-6 : f32
    %308 = vector.broadcast %cst_148 : f32 to vector<8x1xf32>
    %309 = arith.addf %305, %308 : vector<8x1xf32>
    %310 = math.rsqrt %309 : vector<8x1xf32>
    %311 = vector.broadcast %310 : vector<8x1xf32> to vector<8x32xf32>
    %312 = arith.mulf %307, %311 : vector<8x32xf32>
    %313 = vector.broadcast %292 : vector<1x32xf32> to vector<8x32xf32>
    %314 = arith.mulf %312, %313 : vector<8x32xf32>
    %315 = vector.broadcast %294 : vector<1x32xf32> to vector<8x32xf32>
    %316 = arith.addf %314, %315 : vector<8x32xf32>
    %c0_149 = arith.constant 0 : index
    %c0_150 = arith.constant 0 : index
    %317 = vector.load %arg28[%c0_149, %c0_150] : memref<8x32xf32, #tpu.memory_space<vmem>>, vector<8x32xf32>
    tpu.vector_store %arg28[%c0_149, %c0_150], %316 {strides = array<i32>} : memref<8x32xf32, #tpu.memory_space<vmem>>, vector<8x32xf32>,
    %c1_i32 = arith.constant 1 : i32
    %318 = arith.cmpi eq, %arg1, %c1_i32 : i32
    %319 = arith.extui %318 : i1 to i32
    %c0_i32_151 = arith.constant 0 : i32
    %320 = arith.cmpi ne, %319, %c0_i32_151 : i32
    scf.if %320 {
      %c0_152 = arith.constant 0 : index
      %c0_153 = arith.constant 0 : index
      %321 = vector.load %arg6[%c0_152, %c0_153] : memref<32x128xf32, #tpu.memory_space<vmem>>, vector<32x128xf32>
      %cst_154 = arith.constant dense<0.000000e+00> : vector<8x128xf32>
      %322 = tpu.matmul %316, %321, %cst_154 {dimension_numbers = #tpu.dot_dimension_numbers<[1], [0], [0], [1], [0, 0, 1, 1], [], []>} : vector<8x32xf32>, vector<32x128xf32>, vector<8x128xf32> -> vector<8x128xf32>
      %c0_155 = arith.constant 0 : index
      %c0_156 = arith.constant 0 : index
      %c0_157 = arith.constant 0 : index
      %323 = vector.load %arg27[%c0_155, %c0_156, %c0_157] : memref<1x8x128xf32, #tpu.memory_space<vmem>>, vector<1x8x128xf32>
      %324 = vector.shape_cast %323 : vector<1x8x128xf32> to vector<8x128xf32>
      %325 = vector.shape_cast %322 : vector<8x128xf32> to vector<1x8x128xf32>
      tpu.vector_store %arg27[%c0_155, %c0_156, %c0_157], %325 {strides = array<i32>} : memref<1x8x128xf32, #tpu.memory_space<vmem>>, vector<1x8x128xf32>,
    } else {
    }
    return
  }
  func.func @transform_0(%arg0: i32, %arg1: i32) -> (i32, i32, i32) {
    %c0_i32 = arith.constant 0 : i32
    %c0_i32_0 = arith.constant 0 : i32
    %c0_i32_1 = arith.constant 0 : i32
    return %arg0, %c0_i32, %c0_i32_0 : i32, i32, i32
  }
  func.func @transform_1(%arg0: i32, %arg1: i32) -> (i32, i32, i32) {
    %c0_i32 = arith.constant 0 : i32
    %c0_i32_0 = arith.constant 0 : i32
    %c0_i32_1 = arith.constant 0 : i32
    return %arg0, %c0_i32, %c0_i32_0 : i32, i32, i32
  }
  func.func @transform_2(%arg0: i32, %arg1: i32) -> (i32, i32, i32) {
    %c0_i32 = arith.constant 0 : i32
    %c0_i32_0 = arith.constant 0 : i32
    %c0_i32_1 = arith.constant 0 : i32
    return %arg0, %c0_i32, %c0_i32_0 : i32, i32, i32
  }
  func.func @transform_3(%arg0: i32, %arg1: i32) -> (i32, i32, i32) {
    %c0_i32 = arith.constant 0 : i32
    %c0_i32_0 = arith.constant 0 : i32
    %c0_i32_1 = arith.constant 0 : i32
    return %arg0, %c0_i32, %c0_i32_0 : i32, i32, i32
  }
  func.func @transform_4(%arg0: i32, %arg1: i32) -> (i32, i32) {
    %c0_i32 = arith.constant 0 : i32
    %c0_i32_0 = arith.constant 0 : i32
    %c0_i32_1 = arith.constant 0 : i32
    return %c0_i32, %c0_i32_0 : i32, i32
  }
  func.func @transform_5(%arg0: i32, %arg1: i32) -> (i32, i32, i32) {
    %c0_i32 = arith.constant 0 : i32
    %c0_i32_0 = arith.constant 0 : i32
    %c0_i32_1 = arith.constant 0 : i32
    return %arg1, %c0_i32, %c0_i32_0 : i32, i32, i32
  }
  func.func @transform_6(%arg0: i32, %arg1: i32) -> (i32, i32, i32) {
    %c0_i32 = arith.constant 0 : i32
    %c0_i32_0 = arith.constant 0 : i32
    %c0_i32_1 = arith.constant 0 : i32
    return %arg1, %c0_i32, %c0_i32_0 : i32, i32, i32
  }
  func.func @transform_7(%arg0: i32, %arg1: i32) -> (i32, i32, i32) {
    %c0_i32 = arith.constant 0 : i32
    %c0_i32_0 = arith.constant 0 : i32
    %c0_i32_1 = arith.constant 0 : i32
    return %arg1, %c0_i32, %c0_i32_0 : i32, i32, i32
  }
  func.func @transform_8(%arg0: i32, %arg1: i32) -> (i32, i32, i32) {
    %c0_i32 = arith.constant 0 : i32
    %c0_i32_0 = arith.constant 0 : i32
    %c0_i32_1 = arith.constant 0 : i32
    return %arg1, %c0_i32, %c0_i32_0 : i32, i32, i32
  }
  func.func @transform_9(%arg0: i32, %arg1: i32) -> (i32, i32, i32) {
    %c0_i32 = arith.constant 0 : i32
    %c0_i32_0 = arith.constant 0 : i32
    %c0_i32_1 = arith.constant 0 : i32
    return %arg1, %c0_i32, %c0_i32_0 : i32, i32, i32
  }
  func.func @transform_10(%arg0: i32, %arg1: i32) -> (i32, i32, i32) {
    %c0_i32 = arith.constant 0 : i32
    %c0_i32_0 = arith.constant 0 : i32
    %c0_i32_1 = arith.constant 0 : i32
    return %arg1, %c0_i32, %c0_i32_0 : i32, i32, i32
  }
  func.func @transform_11(%arg0: i32, %arg1: i32) -> (i32, i32, i32) {
    %c0_i32 = arith.constant 0 : i32
    %c0_i32_0 = arith.constant 0 : i32
    %c0_i32_1 = arith.constant 0 : i32
    return %arg1, %c0_i32, %c0_i32_0 : i32, i32, i32
  }
  func.func @transform_12(%arg0: i32, %arg1: i32) -> (i32, i32, i32) {
    %c0_i32 = arith.constant 0 : i32
    %c0_i32_0 = arith.constant 0 : i32
    %c0_i32_1 = arith.constant 0 : i32
    return %arg1, %c0_i32, %c0_i32_0 : i32, i32, i32
  }
  func.func @transform_13(%arg0: i32, %arg1: i32) -> (i32, i32, i32) {
    %c0_i32 = arith.constant 0 : i32
    %c0_i32_0 = arith.constant 0 : i32
    %c0_i32_1 = arith.constant 0 : i32
    return %arg1, %c0_i32, %c0_i32_0 : i32, i32, i32
  }
  func.func @transform_14(%arg0: i32, %arg1: i32) -> (i32, i32, i32) {
    %c0_i32 = arith.constant 0 : i32
    %c0_i32_0 = arith.constant 0 : i32
    %c0_i32_1 = arith.constant 0 : i32
    return %arg1, %c0_i32, %c0_i32_0 : i32, i32, i32
  }
  func.func @transform_15(%arg0: i32, %arg1: i32) -> (i32, i32, i32) {
    %c0_i32 = arith.constant 0 : i32
    %c0_i32_0 = arith.constant 0 : i32
    %c0_i32_1 = arith.constant 0 : i32
    return %arg1, %c0_i32, %c0_i32_0 : i32, i32, i32
  }
  func.func @transform_16(%arg0: i32, %arg1: i32) -> (i32, i32, i32) {
    %c0_i32 = arith.constant 0 : i32
    %c0_i32_0 = arith.constant 0 : i32
    %c0_i32_1 = arith.constant 0 : i32
    return %arg1, %c0_i32, %c0_i32_0 : i32, i32, i32
  }
  func.func @transform_17(%arg0: i32, %arg1: i32) -> (i32, i32, i32) {
    %c0_i32 = arith.constant 0 : i32
    %c0_i32_0 = arith.constant 0 : i32
    %c0_i32_1 = arith.constant 0 : i32
    return %arg1, %c0_i32, %c0_i32_0 : i32, i32, i32
  }
  func.func @transform_18(%arg0: i32, %arg1: i32) -> (i32, i32, i32) {
    %c0_i32 = arith.constant 0 : i32
    %c0_i32_0 = arith.constant 0 : i32
    %c0_i32_1 = arith.constant 0 : i32
    return %arg1, %c0_i32, %c0_i32_0 : i32, i32, i32
  }
  func.func @transform_19(%arg0: i32, %arg1: i32) -> (i32, i32, i32) {
    %c0_i32 = arith.constant 0 : i32
    %c0_i32_0 = arith.constant 0 : i32
    %c0_i32_1 = arith.constant 0 : i32
    return %arg1, %c0_i32, %c0_i32_0 : i32, i32, i32
  }
  func.func @transform_20(%arg0: i32, %arg1: i32) -> (i32, i32, i32) {
    %c0_i32 = arith.constant 0 : i32
    %c0_i32_0 = arith.constant 0 : i32
    %c0_i32_1 = arith.constant 0 : i32
    return %arg1, %c0_i32, %c0_i32_0 : i32, i32, i32
  }
  func.func @transform_21(%arg0: i32, %arg1: i32) -> (i32, i32, i32) {
    %c0_i32 = arith.constant 0 : i32
    %c0_i32_0 = arith.constant 0 : i32
    %c0_i32_1 = arith.constant 0 : i32
    return %arg1, %c0_i32, %c0_i32_0 : i32, i32, i32
  }
  func.func @transform_22(%arg0: i32, %arg1: i32) -> (i32, i32, i32) {
    %c0_i32 = arith.constant 0 : i32
    %c0_i32_0 = arith.constant 0 : i32
    %c0_i32_1 = arith.constant 0 : i32
    return %arg1, %c0_i32, %c0_i32_0 : i32, i32, i32
  }
  func.func @transform_23(%arg0: i32, %arg1: i32) -> (i32, i32, i32) {
    %c0_i32 = arith.constant 0 : i32
    %c0_i32_0 = arith.constant 0 : i32
    %c0_i32_1 = arith.constant 0 : i32
    return %arg1, %c0_i32, %c0_i32_0 : i32, i32, i32
  }
  func.func @transform_24(%arg0: i32, %arg1: i32) -> (i32, i32, i32) {
    %c0_i32 = arith.constant 0 : i32
    %c0_i32_0 = arith.constant 0 : i32
    %c0_i32_1 = arith.constant 0 : i32
    return %arg1, %c0_i32, %c0_i32_0 : i32, i32, i32
  }
  func.func @transform_25(%arg0: i32, %arg1: i32) -> (i32, i32, i32) {
    %c0_i32 = arith.constant 0 : i32
    %c0_i32_0 = arith.constant 0 : i32
    %c0_i32_1 = arith.constant 0 : i32
    return %arg0, %c0_i32, %c0_i32_0 : i32, i32, i32
  }
}

</mosaic_0001>

<bundles_post_ra>
// kernel: transformer_forward.2
= control target key start
LH: loop header
LB: loop body
LE: loop exit
PB: predicated region body
PF: predicated region fallthrough
CT: control target
= control target key end

     0   :  { %s2149_s21 = smov 0   ;;  %s2151_s22 = smov 0   ;;  %s2415_s0 = inlined_call_operand.vmem [shape: f32[2,8,32], index: 0, kind: input, shape index: {}]   ;;  %s2416_s1 = inlined_call_operand.vmem [shape: f32[2,8,8], index: 1, kind: input, shape index: {}]   ;;  %s2417_s2 = inlined_call_operand.vmem [shape: f32[1,32], index: 2, kind: input, shape index: {}]   ;;  %s2418_s3 = inlined_call_operand.vmem [shape: f32[1,32], index: 3, kind: input, shape index: {}]   ;;  %s2419_s4 = inlined_call_operand.vmem [shape: f32[4,32,96], index: 4, kind: input, shape index: {}]   ;;  %s2420_s5 = inlined_call_operand.vmem [shape: f32[4,1,96], index: 5, kind: input, shape index: {}]   ;;  %s2421_s6 = inlined_call_operand.vmem [shape: f32[4,32,32], index: 6, kind: input, shape index: {}]   ;;  %s2422_s7 = inlined_call_operand.vmem [shape: f32[4,1,32], index: 7, kind: input, shape index: {}]   ;;  %s2423_s8 = inlined_call_operand.vmem [shape: f32[4,1,32], index: 8, kind: input, shape index: {}]   ;;  %s2424_s9 = inlined_call_operand.vmem [shape: f32[4,1,32], index: 9, kind: input, shape index: {}]   ;;  %s2425_s10 = inlined_call_operand.vmem [shape: f32[4,32,128], index: 10, kind: input, shape index: {}]   ;;  %s2426_s11 = inlined_call_operand.vmem [shape: f32[4,1,128], index: 11, kind: input, shape index: {}]   ;;  %s2427_s12 = inlined_call_operand.vmem [shape: f32[4,128,32], index: 12, kind: input, shape index: {}]   ;;  %s2428_s13 = inlined_call_operand.vmem [shape: f32[4,1,32], index: 13, kind: input, shape index: {}]   ;;  %s2429_s14 = inlined_call_operand.vmem [shape: f32[4,1,32], index: 14, kind: input, shape index: {}]   ;;  %s2430_s15 = inlined_call_operand.vmem [shape: f32[4,1,32], index: 15, kind: input, shape index: {}]   ;;  %s2431_s16 = inlined_call_operand.vmem [shape: f32[2,8,128], index: 16, kind: output, shape index: {}]  }
   0x1   :  { %2437 = sst [smem:[#allocation10_spill]] %s2415_s0  ;;  %s2153_s23 = smov 0  }
   0x2   :  { %2438 = sst [smem:[#allocation11_spill]] %s2416_s1  ;;  %s2155_s24 = smov 0  }
   0x3   :  { %2439 = sst [smem:[#allocation12_spill]] %s2417_s2  ;;  %s2157_s25 = smov 0  }
   0x4   :  { %2440 = sst [smem:[#allocation13_spill]] %s2418_s3 }
   0x5   :  { %2441 = sst [smem:[#allocation14_spill]] %s2419_s4 }
   0x6   :  { %2442 = sst [smem:[#allocation15_spill]] %s2421_s6 }
   0x7   :  { %2443 = sst [smem:[#allocation16_spill]] %s2425_s10 }
   0x8   :  { %2444 = sst [smem:[#allocation17_spill]] %s2426_s11 }
   0x9   :  { %2445 = sst [smem:[#allocation18_spill]] %s2431_s16 }
   0xa LB: > { %2446 = sst [smem:[#allocation3_spill]] %s2037_s21  ;;  %s35_s26 = sadd.s32 1, %s2045_s23  ;;  %s2053_s25 = sphi %s2157_s25, %s26_s25   ;;  %s2049_s24 = sphi %s2155_s24, %s2478_s24   ;;  %s2045_s23 = sphi %s2153_s23, %s2477_s23   ;;  %s2041_s22 = sphi %s2151_s22, %s2476_s22   ;;  %s2037_s21 = sphi %s2149_s21, %s2475_s21  }
   0xb   : > { %2447 = sst [smem:[#allocation4_spill]] %s2045_s23  ;;  %s38_s27 = sadd.s32 1, %s2049_s24 }
   0xc   : > { %2448 = sst [smem:[#allocation5_spill]] %s2049_s24  ;;  %p36_p0 = scmp.ge.s32.totalorder %s35_s26, 4 }
   0xd   : > { %2449 = sst [smem:[#allocation6_spill]] %s2053_s25  ;;  %p1741_p1 = scmp.ge.s32.totalorder %s2053_s25, 1 }
   0xe   : > { %p586_p2 = scmp.lt.s32.totalorder %s2053_s25, 9  ;;  %s2480_s26 = smov (%p36_p0, %s35_s26), 0 }
   0xf   : > { %2450 = sst [smem:[#allocation7_spill]] %s2480_s26  ;;  %s2482_s27 = smov (!%p36_p0, %s38_s27), %s2049_s24 }
  0x10   : > { %p587_p3 = pnand %p1741_p1, %p586_p2  ;;  %p40_p4 = scmp.ge.s32.totalorder %s2482_s27, 2 }
  0x12   : > { %s2484_s27 = smov (%p40_p4, %s2482_s27), 0  ;;  %590 = sbr.rel (%p587_p3) target bundleno = 2862 (0xb2e), region = 84 }
  0x13   : > { %2451 = sst [smem:[#allocation8_spill]] %s2484_s27 }
  0x19   : > { %p682_p5 = scmp.lt.s32.totalorder %s2041_s22, 1  ;;  %p690_p6 = scmp.lt.s32.totalorder %s2037_s21, 3 }
  0x1a   : > { %s2452_s17 = sld [smem:[#allocation10_spill]]  ;;  %s2454_s4 = sld [smem:[#allocation14_spill]] }
  0x1b   : > { %s2486_s22 = smov (!%p682_p5, %s2041_s22), 1  ;;  %s2455_s6 = sld [smem:[#allocation15_spill]] }
  0x1c   : > { %s2183_s28 = scalar_select %p690_p6, %s2037_s21, 3 }
  0x1d   : > { %s2185_s29 = sshll.u32 %s2486_s22, 3  ;;  %s2457_s10 = sld [smem:[#allocation16_spill]] }
  0x1e   : > { %s1776_s26 = sshll.u32 %s2183_s28, 5  ;;  %s727_s23 = scalar_lea.vmem %s2428_s13, %s2183_s28 }
  0x1f   : > { %s730_s3 = scalar_lea.vmem %s2429_s14, %s2183_s28  ;;  %s733_s1 = scalar_lea.vmem %s2430_s15, %s2183_s28 }
  0x20   : > { %s685_s18 = scalar_lea.vmem %s2452_s17, %s2185_s29  ;;  %s2203_s2 = scalar_lea.vmem %s2454_s4, %s1776_s26 }
  0x21   : > { %s2208_s0 = scalar_lea.vmem %s2455_s6, %s1776_s26  ;;  %s2459_s6 = sld [smem:[#allocation18_spill]] }
  0x22   : > { %2456 = sst [smem:[#allocation9_spill]] %s2208_s0  ;;  %s1779_s0 = sshll.u32 %s2183_s28, 7 }
  0x23   : > { %s2225_s4 = scalar_lea.vmem %s2457_s10, %s1776_s26  ;;  %s2235_s19 = scalar_lea.vmem %s2427_s12, %s1779_s0 }
  0x24   : > { %s2460_s11 = sld [smem:[#allocation3_spill]] }
  0x27   : > { %s737_s10 = scalar_lea.vmem %s2459_s6, %s2185_s29 }
  0x2a   : > { %p1753_p7 = scmp.ne.s32.totalorder %s2460_s11, 0 }
  0x2b   : > { %v742_v0 = vld [vmem:[%s685_s18] sm:$0xff] (!%p1753_p7)  ;;  %vm745_vm0 = vcmask (!%p1753_p7), 261120   ;;  %s2461_s25 = sld [smem:[#allocation12_spill]] (!%p1753_p7)  ;;  %s2462_s16 = sld [smem:[#allocation13_spill]] (!%p1753_p7) }
  0x2c   : > { %741 = sbr.rel (%p1753_p7) target bundleno = 358 (0x166), region = 88  ;;  %v746_v1 = vsel (!%p1753_p7), %vm745_vm0, %v742_v0, 0.0 }
  0x2d   : > { %747 = vadd.xlane.f32.xlu0 (!%p1753_p7), %v746_v1 }
  0x31   : > { %v1754_v11 = vld [vmem:[%s2461_s25] ss:$0 sm:$0xff] (!%p1753_p7) }
  0x32   : > { %v1755_v13 = vld [vmem:[%s2462_s16] ss:$0 sm:$0xff] (!%p1753_p7) }
  0xba   : > { %v748_v2 = vpop.xlane.xlu0 %747 }
  0xbb   : > { %v750_v3 = vmul.f32 0.03125, %v748_v2 }
  0xbd   : > { %v751_v4 = vsub.f32 %v742_v0, %v750_v3 }
  0xbf   : > { %v752_v5 = vmul.f32 %v751_v4, %v751_v4 }
  0xc1   : > { %v753_v6 = vsel %vm745_vm0, %v752_v5, 0.0 }
  0xc2   : > { %754 = vadd.xlane.f32.xlu0 %v753_v6 }
 0x14f   : > { %v755_v7 = vpop.xlane.xlu0 %754 }
 0x150   : > { %v756_v8 = vmul.f32 0.03125, %v755_v7 }
 0x152   : > { %v757_v9 = vadd.f32 1e-12, %v756_v8 }
 0x154   : > { %1999 = vrsqrt.f32 %v757_v9 }
 0x15e   : > { %v2000_v10 = vpop.eup %1999 }
 0x15f   : > { %v759_v12 = vmul.f32 %v2000_v10, %v751_v4 }
 0x161   : > { %v766_v14 = vmul.f32 %v1754_v11, %v759_v12 }
 0x163   : > { %v773_v15 = vadd.f32 %v1755_v13, %v766_v14 }
 0x165   : > { %774 = vst.msk [vmem:[#allocation2] sm:$0xff] %vm745_vm0, %v773_v15 }
 0x166 PF: > { %v777_v16 = vld [vmem:[%s2203_s2] sm:$0xff]  ;;  %v778_v17 = vld [vmem:[%s2203_s2 + $0x8] sm:$0xff]  ;;  %v779_v18 = vld [vmem:[%s2203_s2 + $0x10] sm:$0xff]  ;;  %v2055_v19 = vmov 0.0|0.0   ;;  %vm2056_vm1 = vmmov 0   ;;  %v2057_v22 = vmov 0.0   ;;  %s2463_s27 = scalar_lea.vmem %s2420_s5, %s2183_s28  ;;  %s2467_s17 = scalar_lea.vmem %s2422_s7, %s2183_s28 }
 0x167   : > { %1908 = vmatprep.subr.bf16.mxu1 %v2055_v19  ;;  %v1909_v20 = vpack.c.bf16 %v778_v17, %v777_v16  ;;  %v780_v21 = vld [vmem:[%s2203_s2 + $0x18] sm:$0xff]  ;;  %1828 = vmatprep.mubr.msk.f32.mxu1 %vm2056_vm1, %v2057_v22  ;;  %vm788_vm2 = vcmask 261120   ;;  %v1756_v25 = vld [vmem:[%s2463_s27] ss:$0 sm:$0xff]  ;;  %s2058_s20 = smov 112   ;;  %s2059_s24 = smov 96  }
 0x168   : > { %1841 = vmatprep.subr.mxu0 %v2057_v22  ;;  %1843 = vmatprep.mubr.msk.f32.mxu0 %vm2056_vm1, %v2057_v22  ;;  %v1912_v23 = vpack.c.bf16 %v780_v21, %v779_v18  ;;  %s2060_s26 = smov 80   ;;  %vm865_vm3 = vcmask 130048   ;;  %s2464_s30 = sld [smem:[#allocation11_spill]]  ;;  %vm943_vm5 = vcmask 64512   ;;  %v1764_v9 = vld [vmem:[%s2467_s17] ss:$0 sm:$0xff] }
 0x169   : > { %1910 = vmatpush3.bf16.msra.mxu1 %v1909_v20  ;;  %s2061_s11 = smov 48   ;;  %s2062_s25 = smov 64   ;;  %v1318_v21 = vld [vmem:[%s2225_s4] sm:$0xff] }
 0x16a   : > { %1911 = vmatprep.subr.bf16.mxu1 %v2055_v19  ;;  %s2466_s18 = sld [smem:[#allocation9_spill]]  ;;  %s2063_s0 = smov 16  }
 0x16b   : > { %s2469_s22 = scalar_lea.vmem %s2424_s9, %s2183_s28  ;;  %s2472_s2 = sld [smem:[#allocation3_spill]] }
 0x16c   : > { %v2274_v24 = vld [vmem:[#allocation2] sm:$0xff] }
 0x16d   : > { %1913 = vmatpush3.bf16.msra.mxu1 %v1912_v23 }
 0x16e   : > { %1831 = vmatprep.subr.mxu1 %v2057_v22  ;;  %s2465_s6 = scalar_lea.vmem %s2464_s30, %s2185_s29 }
 0x16f   : > { %v776_v32 = vld [vmem:[%s2465_s6] sm:$0xff]  ;;  %s2470_s6 = sld [smem:[#allocation17_spill]] }
 0x170   : > { %1829 = vmatmul.mubr.msk.f32.vlgmr.msra.gmra.mrb[0].mxu1 %vm788_vm2, %v2274_v24  ;;  %vm941_vm4 = vcmp.gt.f32.partialorder %v776_v32, 0.5  ;;  %v1203_v61 = vld [vmem:[%s2466_s18] sm:$0xff]  ;;  %v1204_v62 = vld [vmem:[%s2466_s18 + $0x8] sm:$0xff]  ;;  %v1205_v63 = vld [vmem:[%s2466_s18 + $0x10] sm:$0xff] }
 0x171   : > { %1833 = vmatprep.mubr.msk.f32.mxu1 %vm2056_vm1, %v2057_v22  ;;  %v1915_v0 = vpack.c.bf16 %v1204_v62, %v1203_v61  ;;  %v1206_v1 = vld [vmem:[%s2466_s18 + $0x18] sm:$0xff]  ;;  %p1773_p8 = scmp.ne.s32.totalorder %s2472_s2, 3 }
 0x172   : > { %v1918_v2 = vpack.c.bf16 %v1206_v1, %v1205_v63 }
 0x243   : > { %v858_v26 = vpop.f32.mrb[0].mxu1 }
 0x244   : > { %v859_v27 = vadd.f32 %v1756_v25, %v858_v26  ;;  %v1830_v28 = vpop.f32.mrb[1].mxu1  ;;  %v1321_v25 = vld [vmem:[%s2225_s4 + $0x18] sm:$0xff] }
 0x245   : > { %v1412_v28 = vld [vmem:[%s2235_s19 + $0x8] sm:$0xff] }
 0x246   : > { %1031 = vrot.lane.b32.xlu1 %v859_v27, %s2058_s20  ;;  %863 = vrot.lane.b32.xlu0 %v859_v27, %s2059_s24 }
 0x24a   : > { %1033 = vrot.lane.b32.xlu0 %v859_v27, %s2060_s26 }
 0x2b8   : > { %v864_v29 = vpop.permute.xlu0 %863  ;;  %v1032_v31 = vpop.permute.xlu1 %1031 }
 0x2b9   : > { %1832 = vmatpush3.xpose.msk.msra.mxu1 %vm865_vm3, %v864_v29 }
 0x2ba   : > { %1836 = vmatprep.subr.mxu1 %v2057_v22 }
 0x2bc   : > { %1834 = vmatmul.mubr.msk.f32.vlgmr.msra.gmra.mrb[2].mxu1 %vm865_vm3, %v859_v27  ;;  %v1034_v30 = vpop.permute.xlu0 %1033 }
 0x2bd   : > { %1842 = vmatpush3.xpose.msk.msra.mxu0 %vm865_vm3, %v1034_v30  ;;  %1838 = vmatprep.mubr.msk.f32.mxu1 %vm2056_vm1, %v2057_v22 }
 0x2be   : > { %1926 = vmatprep.subr.bf16.mxu0 %v2055_v19 }
 0x2c0   : > { %1844 = vmatmul.mubr.msk.f32.vlgmr.msra.gmra.mrb[0].mxu0 %vm865_vm3, %v1032_v31 }
 0x2c1   : > { %1905 = vmatprep.mubr.msk.f32.mxu0 %vm2056_vm1, %v2057_v22 }
 0x38f   : > { %v936_v33 = vpop.f32.mrb[2].mxu1 }
 0x390   : > { %v940_v34 = vmul.f32 0.25, %v936_v33  ;;  %v1835_v35 = vpop.f32.mrb[3].mxu1 }
 0x392   : > { %v942_v36 = vsel %vm941_vm4, -1e+09, %v940_v34 }
 0x393   : > { %v1105_v37 = vpop.f32.mrb[0].mxu0  ;;  %v944_v38 = vsel %vm943_vm5, %v942_v36, -inf }
 0x394   : > { %v1109_v39 = vmul.f32 0.25, %v1105_v37  ;;  %v1845_v40 = vpop.f32.mrb[1].mxu0  ;;  %945 = vmax.xlane.f32.xlu1 %v944_v38 }
 0x395   : > { %v1414_v40 = vld [vmem:[%s2235_s19 + $0x18] sm:$0xff] }
 0x396   : > { %v1110_v41 = vsel %vm941_vm4, -1e+09, %v1109_v39  ;;  %v1413_v39 = vld [vmem:[%s2235_s19 + $0x10] sm:$0xff] }
 0x397   : > { %v1111_v42 = vsel %vm943_vm5, %v1110_v41, -inf }
 0x398   : > { %1112 = vmax.xlane.f32.xlu0 %v1111_v42  ;;  %v1415_v42 = vld [vmem:[%s2235_s19 + $0x20] sm:$0xff] }
 0x421   : > { %v946_v43 = vpop.xlane.xlu1 %945 }
 0x422   : > { %v947_v44 = vsub.f32 %v942_v36, %v946_v43  ;;  %v1767_v36 = vld [vmem:[%s2469_s22] ss:$0 sm:$0xff]  ;;  %v1416_v43 = vld [vmem:[%s2235_s19 + $0x28] sm:$0xff] }
 0x424   : > { %v948_v45 = vmul.f32 1.442695, %v947_v44  ;;  %v1933_v44 = vpack.c.bf16 %v1416_v43, %v1415_v42 }
 0x425   : > { %v1113_v46 = vpop.xlane.xlu0 %1112 }
 0x426   : > { %2001 = vpow2.f32 %v948_v45  ;;  %v1114_v47 = vsub.f32 %v1110_v41, %v1113_v46  ;;  %v1930_v41 = vpack.c.bf16 %v1414_v40, %v1413_v39  ;;  %v1417_v45 = vld [vmem:[%s2235_s19 + $0x30] sm:$0xff]  ;;  %v1418_v46 = vld [vmem:[%s2235_s19 + $0x38] sm:$0xff] }
 0x428   : > { %v1115_v48 = vmul.f32 1.442695, %v1114_v47  ;;  %v1936_v47 = vpack.c.bf16 %v1418_v46, %v1417_v45 }
 0x42a   : > { %2003 = vpow2.f32 %v1115_v48  ;;  %v1419_v48 = vld [vmem:[%s2235_s19 + $0x40] sm:$0xff] }
 0x430   : > { %v2002_v49 = vpop.eup %2001 }
 0x431   : > { %v950_v50 = vsel %vm943_vm5, %v2002_v49, 0.0 }
 0x432   : > { %951 = vadd.xlane.f32.xlu0 %v950_v50  ;;  %v1421_v50 = vld [vmem:[%s2235_s19 + $0x50] sm:$0xff] }
 0x434   : > { %v2004_v51 = vpop.eup %2003 }
 0x435   : > { %v1117_v52 = vsel %vm943_vm5, %v2004_v51, 0.0 }
 0x436   : > { %1118 = vadd.xlane.f32.xlu1 %v1117_v52  ;;  %v1422_v52 = vld [vmem:[%s2235_s19 + $0x58] sm:$0xff] }
 0x447   : > { %1122 = vrot.lane.b32.xlu1 %v859_v27, %s2061_s11  ;;  %s2471_s11 = scalar_lea.vmem %s2470_s6, %s2183_s28 }
 0x448   : > { %955 = vrot.lane.b32.xlu0 %v859_v27, %s2062_s25  ;;  %v1411_v27 = vld [vmem:[%s2235_s19] sm:$0xff] }
 0x449   : > { %v1927_v29 = vpack.c.bf16 %v1412_v28, %v1411_v27 }
 0x44b   : > { %1928 = vmatpush3.bf16.msra.mxu0 %v1927_v29 }
 0x44c   : > { %1929 = vmatprep.subr.bf16.mxu0 %v2055_v19 }
 0x44f   : > { %1931 = vmatpush3.bf16.msra.mxu0 %v1930_v41 }
 0x450   : > { %1932 = vmatprep.subr.bf16.mxu0 %v2055_v19 }
 0x453   : > { %1934 = vmatpush3.bf16.msra.mxu0 %v1933_v44 }
 0x454   : > { %1935 = vmatprep.subr.bf16.mxu0 %v2055_v19 }
 0x457   : > { %1937 = vmatpush3.bf16.msra.mxu0 %v1936_v47 }
 0x458   : > { %1938 = vmatprep.subr.bf16.mxu0 %v2055_v19 }
 0x4bf   : > { %v952_v53 = vpop.xlane.xlu0 %951 }
 0x4c0   : > { %2005 = vrcp.f32 %v952_v53  ;;  %v1942_v53 = vpack.c.bf16 %v1422_v52, %v1421_v50 }
 0x4c3   : > { %v956_v54 = vpop.permute.xlu0 %955  ;;  %v1119_v55 = vpop.xlane.xlu1 %1118 }
 0x4c4   : > { %2007 = vrcp.f32 %v1119_v55  ;;  %1837 = vmatpush3.msra.mxu1 %v956_v54  ;;  %v1423_v54 = vld [vmem:[%s2235_s19 + $0x60] sm:$0xff]  ;;  %v1424_v55 = vld [vmem:[%s2235_s19 + $0x68] sm:$0xff] }
 0x4c5   : > { %1846 = vmatprep.subr.mxu1 %v2057_v22 }
 0x4c7   : > { %v1123_v58 = vpop.permute.xlu1 %1122 }
 0x4ca   : > { %v2006_v56 = vpop.eup %2005 }
 0x4cb   : > { %v954_v57 = vmul.f32 %v2006_v56, %v2002_v49  ;;  %v1420_v49 = vld [vmem:[%s2235_s19 + $0x48] sm:$0xff]  ;;  %v1945_v56 = vpack.c.bf16 %v1424_v55, %v1423_v54 }
 0x4cd   : > { %1839 = vmatmul.mubr.msk.f32.vlgmr.msra.gmra.mrb[4].mxu1 %vm943_vm5, %v954_v57  ;;  %v1425_v57 = vld [vmem:[%s2235_s19 + $0x70] sm:$0xff] }
 0x4ce   : > { %v2008_v59 = vpop.eup %2007  ;;  %1847 = vmatpush3.msra.mxu1 %v1123_v58  ;;  %1848 = vmatprep.mubr.msk.f32.mxu1 %vm2056_vm1, %v2057_v22  ;;  %v1426_v58 = vld [vmem:[%s2235_s19 + $0x78] sm:$0xff] }
 0x4cf   : > { %v1121_v60 = vmul.f32 %v2008_v59, %v2004_v51  ;;  %1914 = vmatprep.subr.bf16.mxu1 %v2055_v19  ;;  %v1939_v51 = vpack.c.bf16 %v1420_v49, %v1419_v48  ;;  %v1948_v59 = vpack.c.bf16 %v1426_v58, %v1425_v57 }
 0x4d1   : > { %1849 = vmatmul.mubr.msk.f32.vlgmr.msra.gmra.mrb[6].mxu1 %vm943_vm5, %v1121_v60  ;;  %1940 = vmatpush3.bf16.msra.mxu0 %v1939_v51  ;;  %v1768_v60 = vld [vmem:[%s2471_s11] ss:$0 sm:$0xff] }
 0x4d2   : > { %1859 = vmatprep.mubr.msk.f32.mxu1 %vm2056_vm1, %v2057_v22  ;;  %1916 = vmatpush3.bf16.msra.mxu1 %v1915_v0 }
 0x4d3   : > { %1917 = vmatprep.subr.bf16.mxu1 %v2055_v19  ;;  %1941 = vmatprep.subr.bf16.mxu0 %v2055_v19 }
 0x4d5   : > { %1943 = vmatpush3.bf16.msra.mxu0 %v1942_v53 }
 0x4d6   : > { %1919 = vmatpush3.bf16.msra.mxu1 %v1918_v2  ;;  %1944 = vmatprep.subr.bf16.mxu0 %v2055_v19 }
 0x4d7   : > { %1920 = vmatprep.subr.bf16.mxu1 %v2055_v19 }
 0x4d9   : > { %1946 = vmatpush3.bf16.msra.mxu0 %v1945_v56 }
 0x4da   : > { %1947 = vmatprep.subr.bf16.mxu0 %v2055_v19 }
 0x4dd   : > { %1949 = vmatpush3.bf16.msra.mxu0 %v1948_v59 }
 0x5a0   : > { %v1027_v3 = vpop.f32.mrb[4].mxu1 }
 0x5a1   : > { %v1840_v4 = vpop.f32.mrb[5].mxu1 }
 0x5a4   : > { %v1194_v5 = vpop.f32.mrb[6].mxu1 }
 0x5a5   : > { %1199 = vrot.lane.b32.xlu1 %v1194_v5, %s2063_s0  ;;  %v1850_v6 = vpop.f32.mrb[7].mxu1 }
 0x617   : > { %v1200_v7 = vpop.permute.xlu1 %1199 }
 0x618   : > { %v1202_v8 = vsel %vm865_vm3, %v1027_v3, %v1200_v7 }
 0x619   : > { %1860 = vmatmul.mubr.msk.f32.vlgmr.msra.gmra.mrb[8].mxu1 %vm788_vm2, %v1202_v8  ;;  %v1770_v8 = vld [vmem:[%s727_s23] ss:$0 sm:$0xff] }
 0x61a   : > { %1870 = vmatprep.mubr.msk.f32.mxu1 %vm2056_vm1, %v2057_v22  ;;  %v1319_v22 = vld [vmem:[%s2225_s4 + $0x8] sm:$0xff] }
 0x61b   : > { %v1921_v23 = vpack.c.bf16 %v1319_v22, %v1318_v21 }
 0x61d   : > { %1922 = vmatpush3.bf16.msra.mxu1 %v1921_v23 }
 0x61e   : > { %1923 = vmatprep.subr.bf16.mxu1 %v2055_v19 }
 0x6ec   : > { %v1283_v10 = vpop.f32.mrb[8].mxu1 }
 0x6ed   : > { %v1284_v11 = vadd.f32 %v1764_v9, %v1283_v10  ;;  %v1861_v12 = vpop.f32.mrb[9].mxu1 }
 0x6ef   : > { %v1287_v13 = vadd.f32 %v1284_v11, %v2274_v24  ;;  %v1320_v24 = vld [vmem:[%s2225_s4 + $0x10] sm:$0xff]  ;;  %s2468_s4 = scalar_lea.vmem %s2423_s8, %s2183_s28 }
 0x6f0   : > { %v1924_v26 = vpack.c.bf16 %v1321_v25, %v1320_v24  ;;  %v1766_v34 = vld [vmem:[%s2468_s4] ss:$0 sm:$0xff] }
 0x6f1   : > { %v1290_v14 = vsel %vm788_vm2, %v1287_v13, 0.0  ;;  %v1771_v24 = vld [vmem:[%s730_s3] ss:$0 sm:$0xff] }
 0x6f2   : > { %1291 = vadd.xlane.f32.xlu0 %v1290_v14  ;;  %1925 = vmatpush3.bf16.msra.mxu1 %v1924_v26  ;;  %v1772_v26 = vld [vmem:[%s733_s1] ss:$0 sm:$0xff] }
 0x77f   : > { %v1292_v15 = vpop.xlane.xlu0 %1291 }
 0x780   : > { %v1294_v16 = vmul.f32 0.03125, %v1292_v15 }
 0x782   : > { %v1295_v17 = vsub.f32 %v1287_v13, %v1294_v16 }
 0x784   : > { %v1296_v18 = vmul.f32 %v1295_v17, %v1295_v17 }
 0x786   : > { %v1297_v20 = vsel %vm788_vm2, %v1296_v18, 0.0 }
 0x787   : > { %1298 = vadd.xlane.f32.xlu1 %v1297_v20 }
 0x814   : > { %v1299_v30 = vpop.xlane.xlu1 %1298 }
 0x815   : > { %v1300_v31 = vmul.f32 0.03125, %v1299_v30 }
 0x817   : > { %v1301_v32 = vadd.f32 1e-12, %v1300_v31 }
 0x819   : > { %2009 = vrsqrt.f32 %v1301_v32 }
 0x823   : > { %v2010_v33 = vpop.eup %2009 }
 0x824   : > { %v1303_v35 = vmul.f32 %v2010_v33, %v1295_v17 }
 0x826   : > { %v1310_v37 = vmul.f32 %v1766_v34, %v1303_v35 }
 0x828   : > { %v1317_v38 = vadd.f32 %v1767_v36, %v1310_v37 }
 0x82a   : > { %1871 = vmatmul.mubr.msk.f32.vlgmr.msra.gmra.mrb[10].mxu1 %vm788_vm2, %v1317_v38 }
 0x8fd   : > { %v1398_v61 = vpop.f32.mrb[10].mxu1 }
 0x8fe   : > { %v1399_v62 = vadd.f32 %v1768_v60, %v1398_v61  ;;  %v1872_v63 = vpop.f32.mrb[11].mxu1 }
 0x900   : > { %v1402_v0 = vmul.f32 %v1399_v62, %v1399_v62 }
 0x902   : > { %v1403_v1 = vmul.f32 %v1402_v0, %v1399_v62 }
 0x904   : > { %v1404_v2 = vmul.f32 0.044715, %v1403_v1 }
 0x906   : > { %v1405_v3 = vadd.f32 %v1404_v2, %v1399_v62 }
 0x908   : > { %v1406_v4 = vmul.f32 0.7978846, %v1405_v3 }
 0x90a   : > { %2011 = vtanh.f32 %v1406_v4 }
 0x914   : > { %v2012_v5 = vpop.eup %2011 }
 0x915   : > { %v1408_v6 = vadd.f32 1.0, %v2012_v5 }
 0x917   : > { %v1409_v7 = vmul.f32 0.5, %v1408_v6 }
 0x919   : > { %v1410_v19 = vmul.f32 %v1409_v7, %v1399_v62 }
 0x91b   : > { %1906 = vmatmul.mubr.f32.vlgmr.msra.gmra.mrb[2].mxu0 %v1410_v19 }
 0x9ee   : > { %v1500_v9 = vpop.f32.mrb[2].mxu0 }
 0x9ef   : > { %v1501_v10 = vadd.f32 %v1770_v8, %v1500_v9  ;;  %v1907_v11 = vpop.f32.mrb[3].mxu0 }
 0x9f1   : > { %v1504_v12 = vadd.f32 %v1501_v10, %v1317_v38 }
 0x9f3   : > { %v1507_v13 = vsel %vm788_vm2, %v1504_v12, 0.0 }
 0x9f4   : > { %1508 = vadd.xlane.f32.xlu0 %v1507_v13 }
 0xa81   : > { %v1509_v14 = vpop.xlane.xlu0 %1508 }
 0xa82   : > { %v1510_v15 = vmul.f32 0.03125, %v1509_v14 }
 0xa84   : > { %v1511_v16 = vsub.f32 %v1504_v12, %v1510_v15 }
 0xa86   : > { %v1512_v17 = vmul.f32 %v1511_v16, %v1511_v16 }
 0xa88   : > { %v1513_v18 = vsel %vm788_vm2, %v1512_v17, 0.0 }
 0xa89   : > { %1514 = vadd.xlane.f32.xlu0 %v1513_v18 }
 0xb16   : > { %v1515_v20 = vpop.xlane.xlu0 %1514 }
 0xb17   : > { %v1516_v21 = vmul.f32 0.03125, %v1515_v20 }
 0xb19   : > { %v1517_v22 = vadd.f32 1e-12, %v1516_v21 }
 0xb1b   : > { %2013 = vrsqrt.f32 %v1517_v22 }
 0xb25   : > { %v2014_v23 = vpop.eup %2013 }
 0xb26   : > { %v1519_v25 = vmul.f32 %v2014_v23, %v1511_v16  ;;  %1538 = sbr.rel (%p1773_p8) target bundleno = 2862 (0xb2e), region = 92 }
 0xb28   : > { %v1526_v27 = vmul.f32 %v1771_v24, %v1519_v25 }
 0xb2a   : > { %v1533_v28 = vadd.f32 %v1772_v26, %v1526_v27 }
 0xb2c   : > { %1534 = vst.msk [vmem:[#allocation2] sm:$0xff] %vm788_vm2, %v1533_v28  ;;  %v1539_v29 = vsel (!%p1773_p8), %vm788_vm2, %v1533_v28, 0.0 }
 0xb2d   : > { %1540 = vst [vmem:[%s737_s10] sm:$0xff] %v1539_v29 }
 0xb2e PF: > { %s2474_s3 = sld [smem:[#allocation6_spill]]  ;;  %s2475_s21 = sld [smem:[#allocation4_spill]] }
 0xb2f   : > { %s2476_s22 = sld [smem:[#allocation5_spill]]  ;;  %s2477_s23 = sld [smem:[#allocation7_spill]] }
 0xb30   : > { %s2478_s24 = sld [smem:[#allocation8_spill]] }
 0xb34   : > { %s26_s25 = sadd.s32 1, %s2474_s3  }
 0xb35   : > { %p23_p9 = scmp.ge.s32.totalorder %s26_s25, 10  }
 0xb37   :  { %25 = sbr.rel (!%p23_p9) target bundleno = 10 (0xa), region = 161 }

// kernel: transformer_forward.3
= control target key start
LH: loop header
LB: loop body
LE: loop exit
PB: predicated region body
PF: predicated region fallthrough
CT: control target
= control target key end

     0   :  { %s4330_s29 = smov 0   ;;  %s4336_s30 = smov 0   ;;  %s4858_s0 = inlined_call_operand.vmem [shape: f32[2,8,32], index: 0, kind: input, shape index: {}]   ;;  %s4859_s1 = inlined_call_operand.vmem [shape: f32[2,8,128], index: 1, kind: input, shape index: {}]   ;;  %s4860_s2 = inlined_call_operand.vmem [shape: f32[2,8,8], index: 2, kind: input, shape index: {}]   ;;  %s4861_s3 = inlined_call_operand.vmem [shape: f32[2,8,8], index: 3, kind: input, shape index: {}]   ;;  %s4862_s4 = inlined_call_operand.vmem [shape: f32[32,128], index: 4, kind: input, shape index: {}]   ;;  %s4863_s5 = inlined_call_operand.vmem [shape: f32[2,32,96], index: 5, kind: input, shape index: {}]   ;;  %s4864_s6 = inlined_call_operand.vmem [shape: f32[2,1,96], index: 6, kind: input, shape index: {}]   ;;  %s4865_s7 = inlined_call_operand.vmem [shape: f32[2,32,32], index: 7, kind: input, shape index: {}]   ;;  %s4866_s8 = inlined_call_operand.vmem [shape: f32[2,1,32], index: 8, kind: input, shape index: {}]   ;;  %s4867_s9 = inlined_call_operand.vmem [shape: f32[2,1,32], index: 9, kind: input, shape index: {}]   ;;  %s4868_s10 = inlined_call_operand.vmem [shape: f32[2,1,32], index: 10, kind: input, shape index: {}]   ;;  %s4869_s11 = inlined_call_operand.vmem [shape: f32[2,32,32], index: 11, kind: input, shape index: {}]   ;;  %s4870_s12 = inlined_call_operand.vmem [shape: f32[2,1,32], index: 12, kind: input, shape index: {}]   ;;  %s4871_s13 = inlined_call_operand.vmem [shape: f32[2,128,64], index: 13, kind: input, shape index: {}]   ;;  %s4872_s14 = inlined_call_operand.vmem [shape: f32[2,1,64], index: 14, kind: input, shape index: {}]   ;;  %s4873_s15 = inlined_call_operand.vmem [shape: f32[2,32,32], index: 15, kind: input, shape index: {}]   ;;  %s4874_s16 = inlined_call_operand.vmem [shape: f32[2,1,32], index: 16, kind: input, shape index: {}]   ;;  %s4875_s17 = inlined_call_operand.vmem [shape: f32[2,1,32], index: 17, kind: input, shape index: {}]   ;;  %s4876_s18 = inlined_call_operand.vmem [shape: f32[2,1,32], index: 18, kind: input, shape index: {}]   ;;  %s4877_s19 = inlined_call_operand.vmem [shape: f32[2,32,64], index: 19, kind: input, shape index: {}]   ;;  %s4878_s20 = inlined_call_operand.vmem [shape: f32[2,1,64], index: 20, kind: input, shape index: {}]   ;;  %s4879_s21 = inlined_call_operand.vmem [shape: f32[2,64,32], index: 21, kind: input, shape index: {}]   ;;  %s4880_s22 = inlined_call_operand.vmem [shape: f32[2,1,32], index: 22, kind: input, shape index: {}]   ;;  %s4881_s23 = inlined_call_operand.vmem [shape: f32[2,1,32], index: 23, kind: input, shape index: {}]   ;;  %s4882_s24 = inlined_call_operand.vmem [shape: f32[2,1,32], index: 24, kind: input, shape index: {}]   ;;  %s4883_s25 = inlined_call_operand.vmem [shape: f32[2,8,128], index: 25, kind: output, shape index: {}]  }
   0x1   :  { %4891 = sst [smem:[#allocation11_spill]] %s4858_s0 }
   0x2   :  { %4892 = sst [smem:[#allocation12_spill]] %s4859_s1 }
   0x3   :  { %4893 = sst [smem:[#allocation13_spill]] %s4860_s2  ;;  %s4332_s2 = smov 0  }
   0x4   :  { %4894 = sst [smem:[#allocation14_spill]] %s4861_s3 }
   0x5   :  { %4895 = sst [smem:[#allocation15_spill]] %s4862_s4 }
   0x6   :  { %4896 = sst [smem:[#allocation16_spill]] %s4863_s5 }
   0x7   :  { %4897 = sst [smem:[#allocation17_spill]] %s4864_s6  ;;  %s4334_s6 = smov 0  }
   0x8   :  { %4898 = sst [smem:[#allocation18_spill]] %s4865_s7  ;;  %s4338_s7 = smov 0  }
   0x9   :  { %4899 = sst [smem:[#allocation19_spill]] %s4866_s8 }
   0xa   :  { %4900 = sst [smem:[#allocation20_spill]] %s4867_s9 }
   0xb   :  { %4901 = sst [smem:[#allocation21_spill]] %s4869_s11 }
   0xc   :  { %4902 = sst [smem:[#allocation22_spill]] %s4870_s12 }
   0xd   :  { %4903 = sst [smem:[#allocation23_spill]] %s4871_s13 }
   0xe   :  { %4904 = sst [smem:[#allocation24_spill]] %s4873_s15 }
   0xf   :  { %4905 = sst [smem:[#allocation25_spill]] %s4874_s16 }
  0x10   :  { %4906 = sst [smem:[#allocation26_spill]] %s4875_s17 }
  0x11   :  { %4907 = sst [smem:[#allocation27_spill]] %s4876_s18 }
  0x12   :  { %4908 = sst [smem:[#allocation28_spill]] %s4877_s19 }
  0x13   :  { %4909 = sst [smem:[#allocation29_spill]] %s4878_s20 }
  0x14   :  { %4910 = sst [smem:[#allocation30_spill]] %s4879_s21 }
  0x15   :  { %4911 = sst [smem:[#allocation31_spill]] %s4880_s22 }
  0x16   :  { %4912 = sst [smem:[#allocation32_spill]] %s4881_s23 }
  0x17   :  { %4913 = sst [smem:[#allocation33_spill]] %s4882_s24 }
  0x18   :  { %4914 = sst [smem:[#allocation34_spill]] %s4883_s25 }
  0x19 LB: > { %4915 = sst [smem:[#allocation3_spill]] %s4162_s29  ;;  %s44_s3 = sadd.s32 1, %s4170_s6  ;;  %s4178_s7 = sphi %s4338_s7, %s35_s7   ;;  %s4174_s30 = sphi %s4336_s30, %s4983_s30   ;;  %s4170_s6 = sphi %s4334_s6, %s4982_s6   ;;  %s4166_s2 = sphi %s4332_s2, %s4981_s2   ;;  %s4162_s29 = sphi %s4330_s29, %s4980_s29  }
  0x1a   : > { %4916 = sst [smem:[#allocation4_spill]] %s4170_s6  ;;  %s47_s26 = sadd.s32 1, %s4174_s30 }
  0x1b   : > { %4917 = sst [smem:[#allocation5_spill]] %s4174_s30  ;;  %p45_p0 = scmp.ge.s32.totalorder %s44_s3, 2 }
  0x1c   : > { %4918 = sst [smem:[#allocation6_spill]] %s4178_s7  ;;  %p3607_p1 = scmp.ge.s32.totalorder %s4178_s7, 1 }
  0x1d   : > { %p899_p2 = scmp.lt.s32.totalorder %s4178_s7, 5  ;;  %s4985_s3 = smov (%p45_p0, %s44_s3), 0 }
  0x1e   : > { %4919 = sst [smem:[#allocation7_spill]] %s4985_s3  ;;  %s4987_s26 = smov (!%p45_p0, %s47_s26), %s4174_s30 }
  0x1f   : > { %p900_p3 = pnand %p3607_p1, %p899_p2  ;;  %p49_p4 = scmp.ge.s32.totalorder %s4987_s26, 2 }
  0x21   : > { %s4989_s26 = smov (%p49_p4, %s4987_s26), 0  ;;  %903 = sbr.rel (%p900_p3) target bundleno = 6013 (0x177d), region = 120 }
  0x22   : > { %4920 = sst [smem:[#allocation8_spill]] %s4989_s26 }
  0x28   : > { %p1051_p5 = scmp.lt.s32.totalorder %s4166_s2, 1  ;;  %p1067_p6 = scmp.lt.s32.totalorder %s4162_s29, 1 }
  0x29   : > { %s4921_s28 = sld [smem:[#allocation11_spill]]  ;;  %s4926_s5 = sld [smem:[#allocation16_spill]] }
  0x2a   : > { %s4991_s2 = smov (!%p1051_p5, %s4166_s2), 1  ;;  %s4927_s7 = sld [smem:[#allocation18_spill]] }
  0x2b   : > { %s4364_s1 = scalar_select %p1067_p6, %s4162_s29, 1 }
  0x2c   : > { %s4366_s8 = sshll.u32 %s4991_s2, 3  ;;  %s4930_s11 = sld [smem:[#allocation21_spill]] }
  0x2d   : > { %s3675_s27 = sshll.u32 %s4364_s1, 5  ;;  %s3678_s24 = sshll.u32 %s4364_s1, 7 }
  0x2e   : > { %s4932_s13 = sld [smem:[#allocation23_spill]]  ;;  %s4933_s15 = sld [smem:[#allocation24_spill]] }
  0x2f   : > { %s1054_s9 = scalar_lea.vmem %s4921_s28, %s4366_s8  ;;  %s4392_s26 = scalar_lea.vmem %s4926_s5, %s3675_s27 }
  0x30   : > { %s4397_s0 = scalar_lea.vmem %s4927_s7, %s3675_s27  ;;  %s4938_s22 = sld [smem:[#allocation28_spill]] }
  0x31   : > { %s3681_s12 = sshll.u32 %s4364_s1, 6  ;;  %s4941_s30 = sld [smem:[#allocation31_spill]] }
  0x32   : > { %s4414_s6 = scalar_lea.vmem %s4930_s11, %s3675_s27  ;;  %s4942_s11 = sld [smem:[#allocation30_spill]] }
  0x33   : > { %s4943_s3 = sld [smem:[#allocation32_spill]]  ;;  %s4945_s28 = sld [smem:[#allocation34_spill]] }
  0x34   : > { %s4424_s21 = scalar_lea.vmem %s4932_s13, %s3678_s24  ;;  %s4433_s5 = scalar_lea.vmem %s4933_s15, %s3675_s27 }
  0x35   : > { %4934 = sst [smem:[#allocation9_spill]] %s4433_s5 }
  0x36   : > { %s4450_s19 = scalar_lea.vmem %s4938_s22, %s3675_s27  ;;  %s4944_s22 = sld [smem:[#allocation33_spill]] }
  0x37   : > { %4939 = sst [smem:[#allocation10_spill]] %s4450_s19  ;;  %s1134_s16 = scalar_lea.vmem %s4941_s30, %s4364_s1 }
  0x38   : > { %s4464_s17 = scalar_lea.vmem %s4942_s11, %s3681_s12  ;;  %s4946_s19 = sld [smem:[#allocation3_spill]] }
  0x39   : > { %s1137_s13 = scalar_lea.vmem %s4943_s3, %s4364_s1  ;;  %s1144_s5 = scalar_lea.vmem %s4945_s28, %s4366_s8 }
  0x3c   : > { %s1140_s18 = scalar_lea.vmem %s4944_s22, %s4364_s1 }
  0x3e   : > { %p3627_p7 = scmp.ne.s32.totalorder %s4946_s19, 0 }
  0x3f   : > { %v1149_v0 = vld [vmem:[%s1054_s9] sm:$0xff] (!%p3627_p7)  ;;  %vm1150_vm0 = vcmask (!%p3627_p7), 261120  }
  0x40   : > { %1148 = sbr.rel (%p3627_p7) target bundleno = 71 (0x47), region = 124  ;;  %1151 = vst.msk [vmem:[#allocation2] sm:$0xff] (!%p3627_p7), %vm1150_vm0, %v1149_v0 }
  0x47 PF: > { %v1156_v1 = vld [vmem:[%s4392_s26] sm:$0xff]  ;;  %v1157_v2 = vld [vmem:[%s4392_s26 + $0x8] sm:$0xff]  ;;  %v1158_v3 = vld [vmem:[%s4392_s26 + $0x10] sm:$0xff]  ;;  %v4180_v4 = vmov 0.0|0.0   ;;  %vm4181_vm1 = vmmov 0   ;;  %v4182_v7 = vmov 0.0  }
  0x48   : > { %3970 = vmatprep.subr.bf16.mxu1 %v4180_v4  ;;  %v3971_v5 = vpack.c.bf16 %v1157_v2, %v1156_v1  ;;  %v1159_v6 = vld [vmem:[%s4392_s26 + $0x18] sm:$0xff]  ;;  %3778 = vmatprep.mubr.msk.f32.mxu1 %vm4181_vm1, %v4182_v7  ;;  %v4490_v9 = vld [vmem:[#allocation2] sm:$0xff]  ;;  %vm1167_vm2 = vcmask 261120   ;;  %s4947_s9 = sld [smem:[#allocation17_spill]]  ;;  %s4183_s19 = smov 120   ;;  %vm1244_vm3 = vcmask 64512  }
  0x49   : > { %3791 = vmatprep.subr.mxu0 %v4182_v7  ;;  %3793 = vmatprep.mubr.msk.f32.mxu0 %vm4181_vm1, %v4182_v7  ;;  %v3974_v8 = vpack.c.bf16 %v1159_v6, %v1158_v3  ;;  %s4184_s30 = smov 96   ;;  %s4185_s3 = smov 80   ;;  %vm1923_vm5 = vcmask 130048   ;;  %vm1925_vm6 = vcmask 195584   ;;  %vm3115_vm8 = vcmask 523264  }
  0x4a   : > { %3972 = vmatpush3.bf16.msra.mxu1 %v3971_v5  ;;  %s4186_s23 = smov 88   ;;  %s4187_s4 = smov 72  }
  0x4b   : > { %3973 = vmatprep.subr.bf16.mxu1 %v4180_v4  ;;  %s4188_s25 = smov 112   ;;  %s4189_s7 = smov 104  }
  0x4c   : > { %s4949_s27 = sld [smem:[#allocation13_spill]]  ;;  %s4190_s22 = smov 56  }
  0x4d   : > { %s4191_s20 = smov 64   ;;  %s4192_s15 = smov 48  }
  0x4e   : > { %3975 = vmatpush3.bf16.msra.mxu1 %v3974_v8  ;;  %s4948_s26 = scalar_lea.vmem %s4947_s9, %s4364_s1  ;;  %s4193_s28 = smov 40  }
  0x4f   : > { %3781 = vmatprep.subr.mxu1 %v4182_v7  ;;  %v3628_v10 = vld [vmem:[%s4948_s26] ss:$0 sm:$0xff]  ;;  %s4194_s11 = smov 8   ;;  %s4195_s12 = smov 16  }
  0x50   : > { %s4196_s9 = smov 24   ;;  %s4951_s2 = sld [smem:[#allocation19_spill]] }
  0x51   : > { %3779 = vmatmul.mubr.msk.f32.vlgmr.msra.gmra.mrb[0].mxu1 %vm1167_vm2, %v4490_v9 }
  0x52   : > { %3783 = vmatprep.mubr.msk.f32.mxu1 %vm4181_vm1, %v4182_v7  ;;  %s4950_s29 = scalar_lea.vmem %s4949_s27, %s4366_s8  ;;  %s4969_s27 = sld [smem:[#allocation27_spill]] }
  0x53   : > { %v1154_v21 = vld [vmem:[%s4950_s29] sm:$0xff]  ;;  %s4958_s29 = scalar_lea.vmem %s4872_s14, %s4364_s1 }
  0x54   : > { %vm1320_vm4 = vcmp.gt.f32.partialorder %v1154_v21, 0.5 }
  0x56   : > { %s4952_s24 = scalar_lea.vmem %s4951_s2, %s4364_s1  ;;  %s4957_s2 = scalar_lea.vmem %s4868_s10, %s4364_s1 }
 0x124   : > { %v1237_v11 = vpop.f32.mrb[0].mxu1 }
 0x125   : > { %v4502_v12 = vadd.f32 %v3628_v10, %v1237_v11  ;;  %v3780_v13 = vpop.f32.mrb[1].mxu1 }
 0x127   : > { %1409 = vrot.lane.b32.xlu1 %v4502_v12, %s4183_s19  ;;  %1242 = vrot.lane.b32.xlu0 %v4502_v12, %s4184_s30 }
 0x12b   : > { %1578 = vrot.lane.b32.xlu1 %v4502_v12, %s4185_s3  ;;  %1411 = vrot.lane.b32.xlu0 %v4502_v12, %s4186_s23 }
 0x12f   : > { %1745 = vrot.lane.b32.xlu1 %v4502_v12, %s4187_s4  ;;  %1576 = vrot.lane.b32.xlu0 %v4502_v12, %s4188_s25 }
 0x133   : > { %1743 = vrot.lane.b32.xlu0 %v4502_v12, %s4189_s7 }
 0x199   : > { %v1410_v14 = vpop.permute.xlu1 %1409  ;;  %v1243_v15 = vpop.permute.xlu0 %1242 }
 0x19a   : > { %3782 = vmatpush3.xpose.msk.msra.mxu1 %vm1244_vm3, %v1243_v15 }
 0x19b   : > { %3786 = vmatprep.subr.mxu1 %v4182_v7 }
 0x19d   : > { %3784 = vmatmul.mubr.msk.f32.vlgmr.msra.gmra.mrb[2].mxu1 %vm1244_vm3, %v4502_v12  ;;  %v1412_v16 = vpop.permute.xlu0 %1411  ;;  %v1579_v17 = vpop.permute.xlu1 %1578 }
 0x19e   : > { %3792 = vmatpush3.xpose.msk.msra.mxu0 %vm1244_vm3, %v1412_v16  ;;  %3788 = vmatprep.mubr.msk.f32.mxu1 %vm4181_vm1, %v4182_v7 }
 0x19f   : > { %3801 = vmatprep.subr.mxu0 %v4182_v7 }
 0x1a1   : > { %3794 = vmatmul.mubr.msk.f32.vlgmr.msra.gmra.mrb[0].mxu0 %vm1244_vm3, %v1410_v14  ;;  %v1577_v18 = vpop.permute.xlu0 %1576  ;;  %v1746_v19 = vpop.permute.xlu1 %1745 }
 0x1a2   : > { %3802 = vmatpush3.xpose.msk.msra.mxu0 %vm1244_vm3, %v1579_v17  ;;  %3803 = vmatprep.mubr.msk.f32.mxu0 %vm4181_vm1, %v4182_v7  ;;  %v1927_v17 = vld [vmem:[%s4397_s0] sm:$0xff] }
 0x1a3   : > { %3811 = vmatprep.subr.mxu0 %v4182_v7 }
 0x1a5   : > { %3804 = vmatmul.mubr.msk.f32.vlgmr.msra.gmra.mrb[2].mxu0 %vm1244_vm3, %v1577_v18  ;;  %v1744_v20 = vpop.permute.xlu0 %1743  ;;  %v1928_v18 = vld [vmem:[%s4397_s0 + $0x8] sm:$0xff] }
 0x1a6   : > { %3812 = vmatpush3.xpose.msk.msra.mxu0 %vm1244_vm3, %v1746_v19  ;;  %3813 = vmatprep.mubr.msk.f32.mxu0 %vm4181_vm1, %v4182_v7  ;;  %v3977_v19 = vpack.c.bf16 %v1928_v18, %v1927_v17 }
 0x1a7   : > { %3976 = vmatprep.subr.bf16.mxu0 %v4180_v4 }
 0x1a9   : > { %3814 = vmatmul.mubr.msk.f32.vlgmr.msra.gmra.mrb[4].mxu0 %vm1244_vm3, %v1744_v20 }
 0x1aa   : > { %3829 = vmatprep.mubr.msk.f32.mxu0 %vm4181_vm1, %v4182_v7  ;;  %3978 = vmatpush3.bf16.msra.mxu0 %v3977_v19 }
 0x1ab   : > { %3979 = vmatprep.subr.bf16.mxu0 %v4180_v4 }
 0x270   : > { %v1315_v22 = vpop.f32.mrb[2].mxu1 }
 0x271   : > { %v1319_v23 = vmul.f32 0.35355338, %v1315_v22  ;;  %v3785_v24 = vpop.f32.mrb[3].mxu1 }
 0x272   : > { %v1929_v24 = vld [vmem:[%s4397_s0 + $0x10] sm:$0xff] }
 0x273   : > { %v1321_v25 = vsel %vm1320_vm4, -1e+09, %v1319_v23 }
 0x274   : > { %v1483_v26 = vpop.f32.mrb[0].mxu0  ;;  %v1322_v27 = vsel %vm1244_vm3, %v1321_v25, -inf }
 0x275   : > { %v1487_v28 = vmul.f32 0.35355338, %v1483_v26  ;;  %v3795_v29 = vpop.f32.mrb[1].mxu0  ;;  %1323 = vmax.xlane.f32.xlu1 %v1322_v27 }
 0x277   : > { %v1488_v30 = vsel %vm1320_vm4, -1e+09, %v1487_v28 }
 0x278   : > { %v1650_v31 = vpop.f32.mrb[2].mxu0  ;;  %v1489_v32 = vsel %vm1244_vm3, %v1488_v30, -inf }
 0x279   : > { %v1654_v33 = vmul.f32 0.35355338, %v1650_v31  ;;  %1490 = vmax.xlane.f32.xlu0 %v1489_v32  ;;  %v3805_v34 = vpop.f32.mrb[3].mxu0 }
 0x27b   : > { %v1655_v35 = vsel %vm1320_vm4, -1e+09, %v1654_v33 }
 0x27c   : > { %v1817_v36 = vpop.f32.mrb[4].mxu0  ;;  %v1656_v37 = vsel %vm1244_vm3, %v1655_v35, -inf }
 0x27d   : > { %v1821_v38 = vmul.f32 0.35355338, %v1817_v36  ;;  %1657 = vmax.xlane.f32.xlu0 %v1656_v37  ;;  %v3815_v39 = vpop.f32.mrb[5].mxu0  ;;  %v3642_v37 = vld [vmem:[%s4952_s24] ss:$0 sm:$0xff] }
 0x27f   : > { %v1822_v40 = vsel %vm1320_vm4, -1e+09, %v1821_v38 }
 0x280   : > { %v1823_v41 = vsel %vm1244_vm3, %v1822_v40, -inf }
 0x281   : > { %1824 = vmax.xlane.f32.xlu1 %v1823_v41 }
 0x292   : > { %1500 = vrot.lane.b32.xlu1 %v4502_v12, %s4190_s22  ;;  %s4953_s22 = sld [smem:[#allocation12_spill]] }
 0x302   : > { %v1324_v42 = vpop.xlane.xlu1 %1323 }
 0x303   : > { %v1325_v43 = vsub.f32 %v1321_v25, %v1324_v42  ;;  %v1930_v25 = vld [vmem:[%s4397_s0 + $0x18] sm:$0xff] }
 0x304   : > { %v3980_v26 = vpack.c.bf16 %v1930_v25, %v1929_v24 }
 0x305   : > { %v1326_v44 = vmul.f32 1.442695, %v1325_v43  ;;  %v2126_v43 = vld [vmem:[%s4424_s21] sm:$0xff] }
 0x306   : > { %v1491_v45 = vpop.xlane.xlu0 %1490  ;;  %3981 = vmatpush3.bf16.msra.mxu0 %v3980_v26  ;;  %v3648_v26 = vld [vmem:[%s4958_s29] ss:$0 sm:$0xff]  ;;  %s4970_s29 = scalar_lea.vmem %s4969_s27, %s4364_s1 }
 0x307   : > { %4102 = vpow2.f32 %v1326_v44  ;;  %v1492_v46 = vsub.f32 %v1488_v30, %v1491_v45  ;;  %3988 = vmatprep.subr.bf16.mxu0 %v4180_v4  ;;  %v2127_v44 = vld [vmem:[%s4424_s21 + $0x8] sm:$0xff]  ;;  %v2128_v45 = vld [vmem:[%s4424_s21 + $0x10] sm:$0xff] }
 0x309   : > { %v1493_v47 = vmul.f32 1.442695, %v1492_v46  ;;  %v3989_v46 = vpack.c.bf16 %v2127_v44, %v2126_v43 }
 0x30a   : > { %v1658_v57 = vpop.xlane.xlu0 %1657 }
 0x30b   : > { %4104 = vpow2.f32 %v1493_v47  ;;  %v1659_v58 = vsub.f32 %v1655_v35, %v1658_v57  ;;  %v2129_v47 = vld [vmem:[%s4424_s21 + $0x18] sm:$0xff] }
 0x30d   : > { %v1660_v59 = vmul.f32 1.442695, %v1659_v58 }
 0x30e   : > { %v1825_v48 = vpop.xlane.xlu1 %1824 }
 0x30f   : > { %v1826_v49 = vsub.f32 %v1822_v40, %v1825_v48  ;;  %v3992_v48 = vpack.c.bf16 %v2129_v47, %v2128_v45 }
 0x311   : > { %v4103_v50 = vpop.eup %4102  ;;  %v1827_v51 = vmul.f32 1.442695, %v1826_v49  ;;  %v2130_v49 = vld [vmem:[%s4424_s21 + $0x20] sm:$0xff] }
 0x312   : > { %v1328_v52 = vsel %vm1244_vm3, %v4103_v50, 0.0  ;;  %v1501_v62 = vpop.permute.xlu1 %1500 }
 0x313   : > { %4106 = vpow2.f32 %v1827_v51  ;;  %1329 = vadd.xlane.f32.xlu0 %v1328_v52  ;;  %v2133_v52 = vld [vmem:[%s4424_s21 + $0x38] sm:$0xff] }
 0x314   : > { %4108 = vpow2.f32 %v1660_v59  ;;  %v2134_v59 = vld [vmem:[%s4424_s21 + $0x40] sm:$0xff] }
 0x315   : > { %v4105_v53 = vpop.eup %4104 }
 0x316   : > { %v1495_v54 = vsel %vm1244_vm3, %v4105_v53, 0.0 }
 0x317   : > { %1496 = vadd.xlane.f32.xlu1 %v1495_v54 }
 0x31d   : > { %v4107_v55 = vpop.eup %4106 }
 0x31e   : > { %v1829_v56 = vsel %vm1244_vm3, %v4107_v55, 0.0  ;;  %v4109_v60 = vpop.eup %4108 }
 0x31f   : > { %1830 = vadd.xlane.f32.xlu1 %v1829_v56  ;;  %v1662_v61 = vsel %vm1244_vm3, %v4109_v60, 0.0 }
 0x329   : > { %1333 = vrot.lane.b32.xlu0 %v4502_v12, %s4191_s20  ;;  %s4954_s20 = scalar_lea.vmem %s4953_s22, %s4366_s8 }
 0x330   : > { %1667 = vrot.lane.b32.xlu1 %v4502_v12, %s4192_s15  ;;  %s4955_s15 = sld [smem:[#allocation20_spill]] }
 0x348   : > { %1663 = vadd.xlane.f32.xlu0 %v1662_v61 }
 0x35e   : > { %1834 = vrot.lane.b32.xlu0 %v4502_v12, %s4193_s28  ;;  %s4956_s28 = scalar_lea.vmem %s4955_s15, %s4364_s1 }
 0x3a0   : > { %v1330_v63 = vpop.xlane.xlu0 %1329 }
 0x3a1   : > { %4110 = vrcp.f32 %v1330_v63  ;;  %v2137_v63 = vld [vmem:[%s4424_s21 + $0x58] sm:$0xff] }
 0x3a4   : > { %v1334_v0 = vpop.permute.xlu0 %1333  ;;  %v1497_v1 = vpop.xlane.xlu1 %1496 }
 0x3a5   : > { %4112 = vrcp.f32 %v1497_v1  ;;  %3787 = vmatpush3.msra.mxu1 %v1334_v0  ;;  %v2138_v1 = vld [vmem:[%s4424_s21 + $0x60] sm:$0xff] }
 0x3a6   : > { %3796 = vmatprep.subr.mxu1 %v4182_v7 }
 0x3ab   : > { %v4111_v2 = vpop.eup %4110 }
 0x3ac   : > { %v1332_v3 = vmul.f32 %v4111_v2, %v4103_v50  ;;  %v1831_v5 = vpop.xlane.xlu1 %1830  ;;  %v2131_v50 = vld [vmem:[%s4424_s21 + $0x28] sm:$0xff] }
 0x3ad   : > { %v3995_v51 = vpack.c.bf16 %v2131_v50, %v2130_v49  ;;  %v2139_v2 = vld [vmem:[%s4424_s21 + $0x68] sm:$0xff] }
 0x3ae   : > { %3789 = vmatmul.mubr.msk.f32.vlgmr.msra.gmra.mrb[4].mxu1 %vm1244_vm3, %v1332_v3  ;;  %v4007_v3 = vpack.c.bf16 %v2139_v2, %v2138_v1 }
 0x3af   : > { %v4113_v6 = vpop.eup %4112  ;;  %3797 = vmatpush3.msra.mxu1 %v1501_v62  ;;  %3798 = vmatprep.mubr.msk.f32.mxu1 %vm4181_vm1, %v4182_v7  ;;  %v2136_v62 = vld [vmem:[%s4424_s21 + $0x50] sm:$0xff] }
 0x3b0   : > { %v1499_v8 = vmul.f32 %v4113_v6, %v4105_v53  ;;  %v1668_v10 = vpop.permute.xlu1 %1667  ;;  %3806 = vmatprep.subr.mxu1 %v4182_v7  ;;  %v4004_v0 = vpack.c.bf16 %v2137_v63, %v2136_v62  ;;  %v2043_v6 = vld [vmem:[%s4414_s6 + $0x8] sm:$0xff] }
 0x3b2   : > { %3799 = vmatmul.mubr.msk.f32.vlgmr.msra.gmra.mrb[6].mxu1 %vm1244_vm3, %v1499_v8  ;;  %v2140_v8 = vld [vmem:[%s4424_s21 + $0x70] sm:$0xff] }
 0x3b3   : > { %3807 = vmatpush3.msra.mxu1 %v1668_v10  ;;  %3808 = vmatprep.mubr.msk.f32.mxu1 %vm4181_vm1, %v4182_v7 }
 0x3b4   : > { %3816 = vmatprep.subr.mxu1 %v4182_v7 }
 0x3d5   : > { %v1664_v11 = vpop.xlane.xlu0 %1663 }
 0x3d6   : > { %4114 = vrcp.f32 %v1664_v11  ;;  %v2141_v11 = vld [vmem:[%s4424_s21 + $0x78] sm:$0xff] }
 0x3d7   : > { %4116 = vrcp.f32 %v1831_v5  ;;  %v2042_v5 = vld [vmem:[%s4414_s6] sm:$0xff] }
 0x3d8   : > { %v3983_v10 = vpack.c.bf16 %v2043_v6, %v2042_v5 }
 0x3d9   : > { %v1835_v15 = vpop.permute.xlu0 %1834 }
 0x3e0   : > { %v4115_v12 = vpop.eup %4114 }
 0x3e1   : > { %v1666_v13 = vmul.f32 %v4115_v12, %v4109_v60  ;;  %v4117_v14 = vpop.eup %4116  ;;  %v2135_v60 = vld [vmem:[%s4424_s21 + $0x48] sm:$0xff]  ;;  %v4010_v12 = vpack.c.bf16 %v2141_v11, %v2140_v8 }
 0x3e2   : > { %v1833_v16 = vmul.f32 %v4117_v14, %v4107_v55  ;;  %v4001_v61 = vpack.c.bf16 %v2135_v60, %v2134_v59  ;;  %v2045_v14 = vld [vmem:[%s4414_s6 + $0x18] sm:$0xff] }
 0x3e3   : > { %3809 = vmatmul.mubr.msk.f32.vlgmr.msra.gmra.mrb[8].mxu1 %vm1244_vm3, %v1666_v13  ;;  %v2044_v13 = vld [vmem:[%s4414_s6 + $0x10] sm:$0xff]  ;;  %s4959_s6 = sld [smem:[#allocation22_spill]] }
 0x3e4   : > { %3817 = vmatpush3.msra.mxu1 %v1835_v15  ;;  %3818 = vmatprep.mubr.msk.f32.mxu1 %vm4181_vm1, %v4182_v7  ;;  %v1153_v15 = vld [vmem:[%s4954_s20] sm:$0xff] }
 0x3e5   : > { %3982 = vmatprep.subr.bf16.mxu1 %v4180_v4 }
 0x3e7   : > { %3819 = vmatmul.mubr.msk.f32.vlgmr.msra.gmra.mrb[10].mxu1 %vm1244_vm3, %v1833_v16  ;;  %v3986_v16 = vpack.c.bf16 %v2045_v14, %v2044_v13 }
 0x3e8   : > { %3840 = vmatprep.mubr.msk.f32.mxu1 %vm4181_vm1, %v4182_v7  ;;  %3984 = vmatpush3.bf16.msra.mxu1 %v3983_v10 }
 0x3e9   : > { %3985 = vmatprep.subr.bf16.mxu1 %v4180_v4 }
 0x3ec   : > { %3987 = vmatpush3.bf16.msra.mxu1 %v3986_v16 }
 0x3ed   : > { %3878 = vmatprep.subr.mxu1 %v4182_v7 }
 0x481   : > { %v1405_v20 = vpop.f32.mrb[4].mxu1 }
 0x482   : > { %v3790_v21 = vpop.f32.mrb[5].mxu1 }
 0x483   : > { %v3644_v21 = vld [vmem:[%s4956_s28] ss:$0 sm:$0xff]  ;;  %s4961_s28 = sld [smem:[#allocation14_spill]] }
 0x485   : > { %v1572_v22 = vpop.f32.mrb[6].mxu1 }
 0x486   : > { %1911 = vrot.lane.b32.xlu1 %v1572_v22, %s4194_s11  ;;  %v3800_v23 = vpop.f32.mrb[7].mxu1 }
 0x487   : > { %v3645_v23 = vld [vmem:[%s4957_s2] ss:$0 sm:$0xff] }
 0x489   : > { %s4962_s0 = scalar_lea.vmem %s4961_s28, %s4366_s8 }
 0x4b6   : > { %v1739_v27 = vpop.f32.mrb[8].mxu1 }
 0x4b7   : > { %1915 = vrot.lane.b32.xlu0 %v1739_v27, %s4195_s12  ;;  %v3810_v28 = vpop.f32.mrb[9].mxu1 }
 0x4ba   : > { %v1906_v29 = vpop.f32.mrb[10].mxu1 }
 0x4bb   : > { %1919 = vrot.lane.b32.xlu1 %v1906_v29, %s4196_s9  ;;  %v3820_v30 = vpop.f32.mrb[11].mxu1 }
 0x4f8   : > { %v1912_v31 = vpop.permute.xlu1 %1911 }
 0x4f9   : > { %v1922_v33 = vsel %vm1244_vm3, %v1405_v20, %v1912_v31 }
 0x529   : > { %v1916_v32 = vpop.permute.xlu0 %1915 }
 0x52a   : > { %v1924_v34 = vsel %vm1923_vm5, %v1922_v33, %v1916_v32 }
 0x52d   : > { %v1920_v35 = vpop.permute.xlu1 %1919 }
 0x52e   : > { %v1926_v36 = vsel %vm1925_vm6, %v1924_v34, %v1920_v35  ;;  %v4683_v35 = vld [vmem:[%s4962_s0] sm:$0xff] }
 0x52f   : > { %3830 = vmatmul.mubr.msk.f32.vlgmr.msra.gmra.mrb[6].mxu0 %vm1167_vm2, %v1926_v36  ;;  %vm2296_vm7 = vcmp.gt.f32.partialorder %v4683_v35, 0.5 }
 0x530   : > { %3875 = vmatprep.mubr.msk.f32.mxu0 %vm4181_vm1, %v4182_v7  ;;  %3990 = vmatpush3.bf16.msra.mxu0 %v3989_v46 }
 0x531   : > { %3991 = vmatprep.subr.bf16.mxu0 %v4180_v4 }
 0x534   : > { %3993 = vmatpush3.bf16.msra.mxu0 %v3992_v48 }
 0x535   : > { %3994 = vmatprep.subr.bf16.mxu0 %v4180_v4 }
 0x538   : > { %3996 = vmatpush3.bf16.msra.mxu0 %v3995_v51 }
 0x539   : > { %3997 = vmatprep.subr.bf16.mxu0 %v4180_v4 }
 0x602   : > { %v2007_v38 = vpop.f32.mrb[6].mxu0 }
 0x603   : > { %v2008_v39 = vadd.f32 %v3642_v37, %v2007_v38  ;;  %v3831_v40 = vpop.f32.mrb[7].mxu0 }
 0x605   : > { %v2011_v41 = vadd.f32 %v2008_v39, %v4490_v9  ;;  %v2132_v9 = vld [vmem:[%s4424_s21 + $0x30] sm:$0xff]  ;;  %s4960_s21 = scalar_lea.vmem %s4959_s6, %s4364_s1  ;;  %s4971_s6 = sld [smem:[#allocation29_spill]] }
 0x606   : > { %v3998_v53 = vpack.c.bf16 %v2133_v52, %v2132_v9  ;;  %v3646_v30 = vld [vmem:[%s4960_s21] ss:$0 sm:$0xff] }
 0x607   : > { %v2014_v42 = vsel %vm1167_vm2, %v2011_v41, 0.0 }
 0x608   : > { %2015 = vadd.xlane.f32.xlu0 %v2014_v42  ;;  %3999 = vmatpush3.bf16.msra.mxu0 %v3998_v53 }
 0x609   : > { %4000 = vmatprep.subr.bf16.mxu0 %v4180_v4 }
 0x60b   : > { %s4972_s21 = scalar_lea.vmem %s4971_s6, %s4364_s1 }
 0x60c   : > { %4002 = vmatpush3.bf16.msra.mxu0 %v4001_v61 }
 0x60d   : > { %4003 = vmatprep.subr.bf16.mxu0 %v4180_v4 }
 0x610   : > { %4005 = vmatpush3.bf16.msra.mxu0 %v4004_v0 }
 0x611   : > { %4006 = vmatprep.subr.bf16.mxu0 %v4180_v4 }
 0x614   : > { %4008 = vmatpush3.bf16.msra.mxu0 %v4007_v3 }
 0x615   : > { %4009 = vmatprep.subr.bf16.mxu0 %v4180_v4 }
 0x618   : > { %4011 = vmatpush3.bf16.msra.mxu0 %v4010_v12 }
 0x619   : > { %4012 = vmatprep.subr.bf16.mxu0 %v4180_v4 }
 0x61b   : > { %3876 = vmatmul.mubr.f32.vlgmr.msra.gmra.mrb[8].mxu0 %v1153_v15 }
 0x61c   : > { %3926 = vmatprep.mubr.msk.f32.mxu0 %vm4181_vm1, %v4182_v7 }
 0x695   : > { %v2016_v54 = vpop.xlane.xlu0 %2015 }
 0x696   : > { %v2018_v55 = vmul.f32 0.03125, %v2016_v54 }
 0x698   : > { %v2019_v56 = vsub.f32 %v2011_v41, %v2018_v55 }
 0x69a   : > { %v2020_v57 = vmul.f32 %v2019_v56, %v2019_v56 }
 0x69c   : > { %v2021_v58 = vsel %vm1167_vm2, %v2020_v57, 0.0 }
 0x69d   : > { %2022 = vadd.xlane.f32.xlu1 %v2021_v58 }
 0x6ee   : > { %v2215_v27 = vpop.f32.mrb[8].mxu0 }
 0x6ef   : > { %v4657_v28 = vadd.f32 %v3648_v26, %v2215_v27  ;;  %v3877_v29 = vpop.f32.mrb[9].mxu0 }
 0x6f1   : > { %2309 = vrot.lane.b32.xlu1 %v4657_v28, %s4184_s30 }
 0x72a   : > { %v2023_v17 = vpop.xlane.xlu1 %2022 }
 0x72b   : > { %v2024_v18 = vmul.f32 0.03125, %v2023_v17 }
 0x72d   : > { %v2025_v19 = vadd.f32 1e-05, %v2024_v18 }
 0x72f   : > { %4118 = vrsqrt.f32 %v2025_v19 }
 0x739   : > { %v4119_v20 = vpop.eup %4118 }
 0x73a   : > { %v2027_v22 = vmul.f32 %v4119_v20, %v2019_v56 }
 0x73c   : > { %v2034_v24 = vmul.f32 %v3644_v21, %v2027_v22 }
 0x73e   : > { %v4646_v25 = vadd.f32 %v3645_v23, %v2034_v24 }
 0x740   : > { %3841 = vmatmul.mubr.msk.f32.vlgmr.msra.gmra.mrb[12].mxu1 %vm1167_vm2, %v4646_v25 }
 0x741   : > { %3880 = vmatprep.mubr.msk.f32.mxu1 %vm4181_vm1, %v4182_v7  ;;  %3879 = vmatpush3.xpose.msk.msra.mxu1 %vm1244_vm3, %v4657_v28 }
 0x742   : > { %3883 = vmatprep.subr.mxu1 %v4182_v7 }
 0x763   : > { %v2310_v34 = vpop.permute.xlu1 %2309 }
 0x813   : > { %v2122_v31 = vpop.f32.mrb[12].mxu1 }
 0x814   : > { %v4669_v32 = vadd.f32 %v3646_v30, %v2122_v31  ;;  %v3842_v33 = vpop.f32.mrb[13].mxu1 }
 0x816   : > { %2385 = vrot.lane.b32.xlu1 %v4669_v32, %s4183_s19  ;;  %3881 = vmatmul.mubr.msk.f32.vlgmr.msra.gmra.mrb[14].mxu1 %vm1244_vm3, %v4669_v32 }
 0x817   : > { %3884 = vmatpush3.msra.mxu1 %v2310_v34  ;;  %3885 = vmatprep.mubr.msk.f32.mxu1 %vm4181_vm1, %v4182_v7 }
 0x818   : > { %3888 = vmatprep.subr.mxu1 %v4182_v7 }
 0x888   : > { %v2386_v50 = vpop.permute.xlu1 %2385 }
 0x8e9   : > { %v2291_v36 = vpop.f32.mrb[14].mxu1 }
 0x8ea   : > { %v2295_v37 = vmul.f32 0.35355338, %v2291_v36  ;;  %v3882_v38 = vpop.f32.mrb[15].mxu1 }
 0x8ec   : > { %v2297_v39 = vsel %vm2296_vm7, -1e+09, %v2295_v37 }
 0x8ed   : > { %v2298_v40 = vsel %vm1244_vm3, %v2297_v39, -inf }
 0x8ee   : > { %2299 = vmax.xlane.f32.xlu0 %v2298_v40 }
 0x97b   : > { %v2300_v41 = vpop.xlane.xlu0 %2299 }
 0x97c   : > { %v2301_v42 = vsub.f32 %v2297_v39, %v2300_v41 }
 0x97e   : > { %v2302_v43 = vmul.f32 1.442695, %v2301_v42 }
 0x980   : > { %4120 = vpow2.f32 %v2302_v43 }
 0x98a   : > { %v4121_v44 = vpop.eup %4120 }
 0x98b   : > { %v2304_v45 = vsel %vm1244_vm3, %v4121_v44, 0.0 }
 0x98c   : > { %2305 = vadd.xlane.f32.xlu0 %v2304_v45 }
 0x9a2   : > { %2387 = vrot.lane.b32.xlu0 %v4657_v28, %s4183_s19  ;;  %s4963_s19 = sld [smem:[#allocation9_spill]] }
 0x9a8   : > { %v2901_v43 = vld [vmem:[%s4963_s19] sm:$0xff]  ;;  %v2903_v45 = vld [vmem:[%s4963_s19 + $0x10] sm:$0xff] }
 0xa19   : > { %v2306_v46 = vpop.xlane.xlu0 %2305 }
 0xa1a   : > { %4122 = vrcp.f32 %v2306_v46 }
 0xa1d   : > { %v2388_v49 = vpop.permute.xlu0 %2387 }
 0xa24   : > { %v4123_v47 = vpop.eup %4122 }
 0xa25   : > { %v2308_v48 = vmul.f32 %v4123_v47, %v4121_v44  ;;  %v2902_v44 = vld [vmem:[%s4963_s19 + $0x8] sm:$0xff]  ;;  %v2904_v47 = vld [vmem:[%s4963_s19 + $0x18] sm:$0xff] }
 0xa26   : > { %v4013_v46 = vpack.c.bf16 %v2902_v44, %v2901_v43 }
 0xa27   : > { %3886 = vmatmul.mubr.msk.f32.vlgmr.msra.gmra.mrb[16].mxu1 %vm1244_vm3, %v2308_v48 }
 0xa28   : > { %3889 = vmatpush3.xpose.msk.msra.mxu1 %vm1244_vm3, %v2388_v49  ;;  %3890 = vmatprep.mubr.msk.f32.mxu1 %vm4181_vm1, %v4182_v7 }
 0xa29   : > { %3893 = vmatprep.subr.mxu1 %v4182_v7  ;;  %4014 = vmatpush3.bf16.msra.mxu0 %v4013_v46 }
 0xa2a   : > { %4015 = vmatprep.subr.bf16.mxu0 %v4180_v4 }
 0xa2b   : > { %3891 = vmatmul.mubr.msk.f32.vlgmr.msra.gmra.mrb[18].mxu1 %vm1244_vm3, %v2386_v50 }
 0xa2c   : > { %3895 = vmatprep.mubr.msk.f32.mxu1 %vm4181_vm1, %v4182_v7 }
 0xafa   : > { %v4700_v51 = vpop.f32.mrb[16].mxu1 }
 0xafb   : > { %v3887_v9 = vpop.f32.mrb[17].mxu1 }
 0xafe   : > { %v2459_v52 = vpop.f32.mrb[18].mxu1 }
 0xaff   : > { %v2463_v53 = vmul.f32 0.35355338, %v2459_v52  ;;  %v3892_v54 = vpop.f32.mrb[19].mxu1 }
 0xb01   : > { %v2464_v55 = vsel %vm2296_vm7, -1e+09, %v2463_v53 }
 0xb02   : > { %v2465_v56 = vsel %vm1244_vm3, %v2464_v55, -inf }
 0xb03   : > { %2466 = vmax.xlane.f32.xlu1 %v2465_v56 }
 0xb14   : > { %2554 = vrot.lane.b32.xlu1 %v4657_v28, %s4188_s25 }
 0xb18   : > { %2552 = vrot.lane.b32.xlu1 %v4669_v32, %s4188_s25  ;;  %s4965_s25 = sld [smem:[#allocation25_spill]] }
 0xb90   : > { %v2467_v57 = vpop.xlane.xlu1 %2466 }
 0xb91   : > { %v2468_v58 = vsub.f32 %v2464_v55, %v2467_v57 }
 0xb93   : > { %v2469_v59 = vmul.f32 1.442695, %v2468_v58 }
 0xb94   : > { %v2555_v1 = vpop.permute.xlu1 %2554 }
 0xb95   : > { %4124 = vpow2.f32 %v2469_v59 }
 0xb98   : > { %v2553_v3 = vpop.permute.xlu1 %2552 }
 0xb9f   : > { %v4125_v60 = vpop.eup %4124 }
 0xba0   : > { %v2471_v61 = vsel %vm1244_vm3, %v4125_v60, 0.0 }
 0xba1   : > { %2472 = vadd.xlane.f32.xlu0 %v2471_v61 }
 0xbb7   : > { %2476 = vrot.lane.b32.xlu0 %v4657_v28, %s4186_s23 }
 0xc2e   : > { %v2473_v62 = vpop.xlane.xlu0 %2472 }
 0xc2f   : > { %4126 = vrcp.f32 %v2473_v62 }
 0xc32   : > { %v2477_v63 = vpop.permute.xlu0 %2476 }
 0xc33   : > { %3894 = vmatpush3.msra.mxu1 %v2477_v63 }
 0xc34   : > { %3898 = vmatprep.subr.mxu1 %v4182_v7 }
 0xc39   : > { %v4127_v0 = vpop.eup %4126 }
 0xc3a   : > { %v2475_v2 = vmul.f32 %v4127_v0, %v4125_v60 }
 0xc3c   : > { %3896 = vmatmul.mubr.msk.f32.vlgmr.msra.gmra.mrb[20].mxu1 %vm1244_vm3, %v2475_v2 }
 0xc3d   : > { %3899 = vmatpush3.xpose.msk.msra.mxu1 %vm1244_vm3, %v2555_v1  ;;  %3900 = vmatprep.mubr.msk.f32.mxu1 %vm4181_vm1, %v4182_v7 }
 0xc3e   : > { %3903 = vmatprep.subr.mxu1 %v4182_v7 }
 0xc40   : > { %3901 = vmatmul.mubr.msk.f32.vlgmr.msra.gmra.mrb[22].mxu1 %vm1244_vm3, %v2553_v3 }
 0xc41   : > { %3905 = vmatprep.mubr.msk.f32.mxu1 %vm4181_vm1, %v4182_v7 }
 0xd0f   : > { %v2548_v5 = vpop.f32.mrb[20].mxu1 }
 0xd10   : > { %v3897_v6 = vpop.f32.mrb[21].mxu1 }
 0xd13   : > { %v2626_v8 = vpop.f32.mrb[22].mxu1 }
 0xd14   : > { %v2630_v10 = vmul.f32 0.35355338, %v2626_v8  ;;  %v3902_v11 = vpop.f32.mrb[23].mxu1  ;;  %v3100_v8 = vld [vmem:[%s4464_s17] sm:$0xff] }
 0xd15   : > { %v3102_v11 = vld [vmem:[%s4464_s17 + $0x10] sm:$0xff] }
 0xd16   : > { %v2631_v12 = vsel %vm2296_vm7, -1e+09, %v2630_v10  ;;  %v3101_v10 = vld [vmem:[%s4464_s17 + $0x8] sm:$0xff] }
 0xd17   : > { %v2632_v13 = vsel %vm1244_vm3, %v2631_v12, -inf }
 0xd18   : > { %2633 = vmax.xlane.f32.xlu0 %v2632_v13  ;;  %v3103_v13 = vld [vmem:[%s4464_s17 + $0x18] sm:$0xff] }
 0xd2e   : > { %2643 = vrot.lane.b32.xlu0 %v4657_v28, %s4185_s3  ;;  %s4964_s3 = sld [smem:[#allocation10_spill]] }
 0xd32   : > { %2719 = vrot.lane.b32.xlu0 %v4669_v32, %s4189_s7 }
 0xd34   : > { %v3015_v1 = vld [vmem:[%s4964_s3] sm:$0xff]  ;;  %v3016_v2 = vld [vmem:[%s4964_s3 + $0x8] sm:$0xff] }
 0xd35   : > { %v4019_v3 = vpack.c.bf16 %v3016_v2, %v3015_v1 }
 0xda5   : > { %v2634_v14 = vpop.xlane.xlu0 %2633 }
 0xda6   : > { %v2635_v15 = vsub.f32 %v2631_v12, %v2634_v14  ;;  %v4025_v12 = vpack.c.bf16 %v3101_v10, %v3100_v8  ;;  %v4028_v14 = vpack.c.bf16 %v3103_v13, %v3102_v11 }
 0xda8   : > { %v2636_v16 = vmul.f32 1.442695, %v2635_v15  ;;  %v3104_v15 = vld [vmem:[%s4464_s17 + $0x20] sm:$0xff] }
 0xda9   : > { %v2644_v17 = vpop.permute.xlu0 %2643 }
 0xdaa   : > { %4128 = vpow2.f32 %v2636_v16  ;;  %3904 = vmatpush3.msra.mxu1 %v2644_v17  ;;  %v3105_v16 = vld [vmem:[%s4464_s17 + $0x28] sm:$0xff] }
 0xdab   : > { %3908 = vmatprep.subr.mxu1 %v4182_v7  ;;  %v4031_v17 = vpack.c.bf16 %v3105_v16, %v3104_v15 }
 0xdad   : > { %v2720_v24 = vpop.permute.xlu0 %2719 }
 0xdb4   : > { %v4129_v18 = vpop.eup %4128 }
 0xdb5   : > { %v2638_v19 = vsel %vm1244_vm3, %v4129_v18, 0.0 }
 0xdb6   : > { %2639 = vadd.xlane.f32.xlu1 %v2638_v19 }
 0xdc7   : > { %2721 = vrot.lane.b32.xlu1 %v4657_v28, %s4189_s7  ;;  %s4966_s7 = scalar_lea.vmem %s4965_s25, %s4364_s1 }
 0xdc8   : > { %v3661_v56 = vld [vmem:[%s4966_s7] ss:$0 sm:$0xff] }
 0xe43   : > { %v2640_v20 = vpop.xlane.xlu1 %2639 }
 0xe44   : > { %4130 = vrcp.f32 %v2640_v20 }
 0xe47   : > { %v2722_v23 = vpop.permute.xlu1 %2721 }
 0xe4e   : > { %v4131_v21 = vpop.eup %4130 }
 0xe4f   : > { %v2642_v22 = vmul.f32 %v4131_v21, %v4129_v18 }
 0xe51   : > { %3906 = vmatmul.mubr.msk.f32.vlgmr.msra.gmra.mrb[24].mxu1 %vm1244_vm3, %v2642_v22 }
 0xe52   : > { %3909 = vmatpush3.xpose.msk.msra.mxu1 %vm1244_vm3, %v2722_v23  ;;  %3910 = vmatprep.mubr.msk.f32.mxu1 %vm4181_vm1, %v4182_v7 }
 0xe53   : > { %3913 = vmatprep.subr.mxu1 %v4182_v7 }
 0xe55   : > { %3911 = vmatmul.mubr.msk.f32.vlgmr.msra.gmra.mrb[26].mxu1 %vm1244_vm3, %v2720_v24  ;;  %v3664_v24 = vld [vmem:[%s4970_s29] ss:$0 sm:$0xff] }
 0xe56   : > { %3915 = vmatprep.mubr.msk.f32.mxu1 %vm4181_vm1, %v4182_v7 }
 0xf24   : > { %v2715_v26 = vpop.f32.mrb[24].mxu1 }
 0xf25   : > { %v3907_v27 = vpop.f32.mrb[25].mxu1 }
 0xf26   : > { %v3106_v27 = vld [vmem:[%s4464_s17 + $0x30] sm:$0xff] }
 0xf28   : > { %v2793_v29 = vpop.f32.mrb[26].mxu1 }
 0xf29   : > { %v2797_v30 = vmul.f32 0.35355338, %v2793_v29  ;;  %v3912_v31 = vpop.f32.mrb[27].mxu1  ;;  %v3107_v29 = vld [vmem:[%s4464_s17 + $0x38] sm:$0xff] }
 0xf2a   : > { %v3665_v31 = vld [vmem:[%s4972_s21] ss:$0 sm:$0xff] }
 0xf2b   : > { %v2798_v32 = vsel %vm2296_vm7, -1e+09, %v2797_v30  ;;  %v4034_v30 = vpack.c.bf16 %v3107_v29, %v3106_v27 }
 0xf2c   : > { %v2799_v33 = vsel %vm1244_vm3, %v2798_v32, -inf }
 0xf2d   : > { %2800 = vmax.xlane.f32.xlu1 %v2799_v33 }
 0xf3e   : > { %2887 = vrot.lane.b32.xlu1 %v2548_v5, %s4194_s11  ;;  %v3018_v5 = vld [vmem:[%s4964_s3 + $0x18] sm:$0xff] }
 0xf42   : > { %2891 = vrot.lane.b32.xlu1 %v2715_v26, %s4195_s12 }
 0xfba   : > { %v2801_v34 = vpop.xlane.xlu1 %2800 }
 0xfbb   : > { %v2802_v36 = vsub.f32 %v2798_v32, %v2801_v34 }
 0xfbd   : > { %v2803_v37 = vmul.f32 1.442695, %v2802_v36 }
 0xfbe   : > { %v2888_v50 = vpop.permute.xlu1 %2887 }
 0xfbf   : > { %4132 = vpow2.f32 %v2803_v37  ;;  %v2898_v52 = vsel %vm1244_vm3, %v4700_v51, %v2888_v50  ;;  %v3667_v37 = vld [vmem:[%s1134_s16] ss:$0 sm:$0xff] }
 0xfc0   : > { %v3669_v50 = vld [vmem:[%s1137_s13] ss:$0 sm:$0xff] }
 0xfc2   : > { %v2892_v9 = vpop.permute.xlu1 %2891 }
 0xfc3   : > { %v2899_v53 = vsel %vm1923_vm5, %v2898_v52, %v2892_v9  ;;  %v3670_v52 = vld [vmem:[%s1140_s18] ss:$0 sm:$0xff] }
 0xfc9   : > { %v4133_v38 = vpop.eup %4132 }
 0xfca   : > { %v2805_v39 = vsel %vm1244_vm3, %v4133_v38, 0.0 }
 0xfcb   : > { %2806 = vadd.xlane.f32.xlu0 %v2805_v39 }
 0xfe1   : > { %2810 = vrot.lane.b32.xlu0 %v4657_v28, %s4187_s4  ;;  %v4016_v28 = vpack.c.bf16 %v2904_v47, %v2903_v45  ;;  %s4976_s4 = sld [smem:[#allocation3_spill]] }
 0xfe3   : > { %4017 = vmatpush3.bf16.msra.mxu0 %v4016_v28 }
 0xfe4   : > { %4024 = vmatprep.subr.bf16.mxu0 %v4180_v4 }
 0xfe7   : > { %p3671_p8 = scmp.ne.s32.totalorder %s4976_s4, 1 }
 0xfe8   : > { %s4977_s11 = sld [smem:[#allocation15_spill]] (!%p3671_p8)  ;;  %vm4198_vm9 = vmmov (!%p3671_p8), 0  }
0x1058   : > { %v2807_v35 = vpop.xlane.xlu0 %2806 }
0x1059   : > { %4134 = vrcp.f32 %v2807_v35 }
0x105c   : > { %v2811_v40 = vpop.permute.xlu0 %2810 }
0x105d   : > { %3914 = vmatpush3.msra.mxu1 %v2811_v40 }
0x105e   : > { %4018 = vmatprep.subr.bf16.mxu1 %v4180_v4 }
0x1063   : > { %v4135_v41 = vpop.eup %4134 }
0x1064   : > { %v2809_v42 = vmul.f32 %v4135_v41, %v4133_v38 }
0x1066   : > { %3916 = vmatmul.mubr.msk.f32.vlgmr.msra.gmra.mrb[28].mxu1 %vm1244_vm3, %v2809_v42 }
0x1067   : > { %3937 = vmatprep.mubr.msk.f32.mxu1 %vm4181_vm1, %v4182_v7  ;;  %4020 = vmatpush3.bf16.msra.mxu1 %v4019_v3 }
0x1068   : > { %4021 = vmatprep.subr.bf16.mxu1 %v4180_v4 }
0x1139   : > { %v2882_v48 = vpop.f32.mrb[28].mxu1 }
0x113a   : > { %2895 = vrot.lane.b32.xlu0 %v2882_v48, %s4196_s9  ;;  %v3917_v49 = vpop.f32.mrb[29].mxu1  ;;  %s4967_s9 = sld [smem:[#allocation26_spill]] }
0x1140   : > { %s4968_s26 = scalar_lea.vmem %s4967_s9, %s4364_s1 }
0x1141   : > { %v3663_v22 = vld [vmem:[%s4968_s26] ss:$0 sm:$0xff] }
0x11ac   : > { %v2896_v54 = vpop.permute.xlu0 %2895 }
0x11ad   : > { %v2900_v55 = vsel %vm1925_vm6, %v2899_v53, %v2896_v54 }
0x11ae   : > { %3927 = vmatmul.mubr.msk.f32.vlgmr.msra.gmra.mrb[10].mxu0 %vm1167_vm2, %v2900_v55  ;;  %v3224_v55 = vld [vmem:[%s4977_s11] sm:$0xff] (!%p3671_p8) }
0x11af   : > { %3956 = vmatprep.mubr.msk.f32.mxu0 %vm4181_vm1, %v4182_v7  ;;  %4026 = vmatpush3.bf16.msra.mxu0 %v4025_v12 }
0x11b0   : > { %4027 = vmatprep.subr.bf16.mxu0 %v4180_v4 }
0x11b3   : > { %4029 = vmatpush3.bf16.msra.mxu0 %v4028_v14 }
0x11b4   : > { %4030 = vmatprep.subr.bf16.mxu0 %v4180_v4 }
0x11b7   : > { %4032 = vmatpush3.bf16.msra.mxu0 %v4031_v17 }
0x11b8   : > { %4033 = vmatprep.subr.bf16.mxu0 %v4180_v4 }
0x11bb   : > { %4035 = vmatpush3.bf16.msra.mxu0 %v4034_v30 }
0x1281   : > { %v2981_v57 = vpop.f32.mrb[10].mxu0 }
0x1282   : > { %v2982_v51 = vadd.f32 %v3661_v56, %v2981_v57  ;;  %v3928_v58 = vpop.f32.mrb[11].mxu0  ;;  %v3225_v56 = vld [vmem:[%s4977_s11 + $0x8] sm:$0xff] (!%p3671_p8)  ;;  %v3226_v57 = vld [vmem:[%s4977_s11 + $0x10] sm:$0xff] (!%p3671_p8) }
0x1283   : > { %v4037_v58 = vpack.c.bf16 (!%p3671_p8), %v3225_v56, %v3224_v55 }
0x1284   : > { %v2985_v59 = vadd.f32 %v2982_v51, %v4646_v25  ;;  %v3017_v25 = vld [vmem:[%s4964_s3 + $0x10] sm:$0xff]  ;;  %v4197_v51 = vmov (!%p3671_p8), 0.0|0.0  }
0x1285   : > { %v4022_v6 = vpack.c.bf16 %v3018_v5, %v3017_v25  ;;  %4036 = vmatprep.subr.bf16.mxu0 (!%p3671_p8), %v4197_v51 }
0x1286   : > { %v2988_v60 = vsel %vm1167_vm2, %v2985_v59, 0.0 }
0x1287   : > { %2989 = vadd.xlane.f32.xlu1 %v2988_v60  ;;  %4023 = vmatpush3.bf16.msra.mxu1 %v4022_v6  ;;  %v4199_v60 = vmov (!%p3671_p8), 0.0  }
0x1314   : > { %v2990_v61 = vpop.xlane.xlu1 %2989 }
0x1315   : > { %v2991_v62 = vmul.f32 0.03125, %v2990_v61 }
0x1317   : > { %v2992_v7 = vsub.f32 %v2985_v59, %v2991_v62  ;;  %v3227_v59 = vld [vmem:[%s4977_s11 + $0x18] sm:$0xff] (!%p3671_p8) }
0x1318   : > { %v4040_v61 = vpack.c.bf16 (!%p3671_p8), %v3227_v59, %v3226_v57 }
0x1319   : > { %v2993_v63 = vmul.f32 %v2992_v7, %v2992_v7 }
0x131b   : > { %v2994_v0 = vsel %vm1167_vm2, %v2993_v63, 0.0 }
0x131c   : > { %2995 = vadd.xlane.f32.xlu0 %v2994_v0 }
0x13a9   : > { %v2996_v18 = vpop.xlane.xlu0 %2995 }
0x13aa   : > { %v2997_v19 = vmul.f32 0.03125, %v2996_v18 }
0x13ac   : > { %v2998_v20 = vadd.f32 1e-05, %v2997_v19 }
0x13ae   : > { %4136 = vrsqrt.f32 %v2998_v20 }
0x13b8   : > { %v4137_v21 = vpop.eup %4136 }
0x13b9   : > { %v3000_v23 = vmul.f32 %v4137_v21, %v2992_v7 }
0x13bb   : > { %v3007_v26 = vmul.f32 %v3663_v22, %v3000_v23 }
0x13bd   : > { %v3014_v4 = vadd.f32 %v3664_v24, %v3007_v26 }
0x13bf   : > { %3938 = vmatmul.mubr.msk.f32.vlgmr.msra.gmra.mrb[30].mxu1 %vm1167_vm2, %v3014_v4 }
0x1492   : > { %v3095_v32 = vpop.f32.mrb[30].mxu1 }
0x1493   : > { %v3096_v33 = vadd.f32 %v3665_v31, %v3095_v32  ;;  %v3939_v34 = vpop.f32.mrb[31].mxu1 }
0x1495   : > { %v3099_v36 = vmax.f32 %v3096_v33, 0.0 }
0x1497   : > { %3957 = vmatmul.mubr.msk.f32.vlgmr.msra.gmra.mrb[12].mxu0 %vm3115_vm8, %v3099_v36 }
0x1498   : > { %3967 = vmatprep.mubr.msk.f32.mxu0 (!%p3671_p8), %vm4198_vm9, %v4199_v60  ;;  %4038 = vmatpush3.bf16.msra.mxu0 (!%p3671_p8), %v4037_v58 }
0x1499   : > { %4039 = vmatprep.subr.bf16.mxu0 (!%p3671_p8), %v4197_v51 }
0x149c   : > { %4041 = vmatpush3.bf16.msra.mxu0 (!%p3671_p8), %v4040_v61 }
0x156a   : > { %v3185_v38 = vpop.f32.mrb[12].mxu0 }
0x156b   : > { %v3186_v39 = vadd.f32 %v3667_v37, %v3185_v38  ;;  %v3958_v35 = vpop.f32.mrb[13].mxu0 }
0x156d   : > { %v3189_v40 = vadd.f32 %v3186_v39, %v3014_v4 }
0x156f   : > { %v3192_v41 = vsel %vm1167_vm2, %v3189_v40, 0.0 }
0x1570   : > { %3193 = vadd.xlane.f32.xlu0 %v3192_v41 }
0x15fd   : > { %v3194_v42 = vpop.xlane.xlu0 %3193 }
0x15fe   : > { %v3195_v43 = vmul.f32 0.03125, %v3194_v42 }
0x1600   : > { %v3196_v44 = vsub.f32 %v3189_v40, %v3195_v43 }
0x1602   : > { %v3197_v45 = vmul.f32 %v3196_v44, %v3196_v44 }
0x1604   : > { %v3198_v46 = vsel %vm1167_vm2, %v3197_v45, 0.0 }
0x1605   : > { %3199 = vadd.xlane.f32.xlu1 %v3198_v46 }
0x1692   : > { %v3200_v47 = vpop.xlane.xlu1 %3199 }
0x1693   : > { %v3201_v28 = vmul.f32 0.03125, %v3200_v47 }
0x1695   : > { %v3202_v48 = vadd.f32 1e-05, %v3201_v28 }
0x1697   : > { %4138 = vrsqrt.f32 %v3202_v48 }
0x16a1   : > { %v4139_v49 = vpop.eup %4138 }
0x16a2   : > { %v3204_v9 = vmul.f32 %v4139_v49, %v3196_v44  ;;  %3223 = sbr.rel (%p3671_p8) target bundleno = 6013 (0x177d), region = 128 }
0x16a4   : > { %v3211_v53 = vmul.f32 %v3669_v50, %v3204_v9 }
0x16a6   : > { %v3218_v54 = vadd.f32 %v3670_v52, %v3211_v53 }
0x16a8   : > { %3219 = vst.msk [vmem:[#allocation2] sm:$0xff] %vm1167_vm2, %v3218_v54  ;;  %3968 = vmatmul.mubr.msk.f32.vlgmr.msra.gmra.mrb[0].mxu0 (!%p3671_p8), %vm1167_vm2, %v3218_v54 }
0x177b   : > { %v3297_v62 = vpop.f32.mrb[0].mxu0 }
0x177c   : > { %3301 = vst [vmem:[%s1144_s5] sm:$0xff] %v3297_v62  ;;  %v3969_v7 = vpop.f32.mrb[1].mxu0 }
0x177d PF: > { %s4979_s29 = sld [smem:[#allocation6_spill]]  ;;  %s4981_s2 = sld [smem:[#allocation5_spill]] }
0x177e   : > { %s4982_s6 = sld [smem:[#allocation7_spill]]  ;;  %s4983_s30 = sld [smem:[#allocation8_spill]] }
0x1783   : > { %s35_s7 = sadd.s32 1, %s4979_s29   ;;  %s4980_s29 = sld [smem:[#allocation4_spill]] }
0x1784   : > { %p32_p9 = scmp.ge.s32.totalorder %s35_s7, 6  }
0x1786   :  { %34 = sbr.rel (!%p32_p9) target bundleno = 25 (0x19), region = 227 }

</bundles_post_ra>
